<compile_context>
chip_gen: v6e
topology: v6e:2x2x1
jax: 0.10.0
libtpu: 0.0.40
codegen_flags: <defaults>
</compile_context>

<pallas_src>
import functools
import math

import jax
import jax.numpy as jnp
from jax import lax
from jax.experimental import pallas as pl
from jax.experimental.pallas import tpu as pltpu


_LANES = 128
_HALF_PI = math.pi / 2.0
_TARGET_BLOCK_BYTES = 4 * 1024 * 1024   # one output block; x2 buffers <= 8 MiB
_MIN_GRID_STEPS = 4                     # >= 2 steps per TensorCore on v7x
_MAX_FLAT_WIDTH = 4096                  # cap on lcm(d_model, 128) lane width


def _choose_row_tile(n_rows: int, row_bytes: int) -> int:
    """Row tile: fits the VMEM budget AND leaves >= _MIN_GRID_STEPS grid steps."""
    if n_rows <= 8:
        return n_rows                                   # full dim -> always legal
    budget = max(8, (_TARGET_BLOCK_BYTES // row_bytes) // 8 * 8)
    split = max(8, (n_rows // _MIN_GRID_STEPS) // 8 * 8)
    return min(budget, split, n_rows)


def _lane_vectors(width: int, d_model: int):
    """Grid-invariant per-lane vectors (host precompute, like torch's div_term).

    freq[l]     = exp((col//2) * (-2*ln(1e4)/d))   with col = l % d_model
    phase[l]    = (col % 2) * pi/2                 (cos(x) = sin(x + pi/2))
    pos_lane[l] = l // d_model                     (position offset inside a row)
    """
    idx = jnp.arange(width, dtype=jnp.int32)
    col = idx % d_model
    pair = (col // 2).astype(jnp.float32)
    freq = jnp.exp(pair * jnp.float32(-2.0 * math.log(10000.0) / d_model))
    phase = (col % 2).astype(jnp.float32) * jnp.float32(_HALF_PI)
    pos_lane = (idx // d_model).astype(jnp.float32)
    return freq[None, :], phase[None, :], pos_lane[None, :]


def _pe_kernel(freq_ref, phase_ref, pos_lane_ref, o_ref, *,
               row_tile: int, pos_per_row: int):
    """One (row_tile, width) tile of the flattened table.

    pos  = (grid_row * row_tile + r) * pos_per_row + pos_lane   (exact f32 ints)
    out  = sin(pos * freq + phase)
    """
    i = pl.program_id(0)
    base = (i * (row_tile * pos_per_row)).astype(jnp.float32)
    row_pos = (lax.broadcasted_iota(jnp.int32, (row_tile, 1), 0)
               * pos_per_row).astype(jnp.float32) + base
    pos = row_pos + pos_lane_ref[...]                       # (row_tile, width)
    o_ref[...] = jnp.sin(pos * freq_ref[...] + phase_ref[...]).astype(o_ref.dtype)


def _build_table(n_rows: int, width: int, d_model: int, pos_per_row: int, dtype):
    freq, phase, pos_lane = _lane_vectors(width, d_model)
    itemsize = jnp.dtype(dtype).itemsize
    row_tile = _choose_row_tile(n_rows, width * itemsize)
    grid = (pl.cdiv(n_rows, row_tile),)
    kernel = functools.partial(_pe_kernel, row_tile=row_tile,
                               pos_per_row=pos_per_row)
    vec_spec = pl.BlockSpec((1, width), lambda i: (0, 0))
    return pl.pallas_call(
        kernel,
        out_shape=jax.ShapeDtypeStruct((n_rows, width), dtype),
        grid_spec=pltpu.PrefetchScalarGridSpec(
            num_scalar_prefetch=0,
            grid=grid,
            in_specs=[vec_spec, vec_spec, vec_spec],
            out_specs=pl.BlockSpec((row_tile, width), lambda i: (i, 0)),
        ),
        compiler_params=pltpu.CompilerParams(
            dimension_semantics=("parallel",)),     # megacore split on v7x
    )(freq, phase, pos_lane)


def build_pe_table(seq_len: int, d_model: int, dtype=jnp.float32):
    """(seq_len, d_model) sin/cos positional table, built with Pallas."""
    assert d_model % 2 == 0, "d_model must be even (same as the PyTorch module)"
    if d_model % _LANES == 0:
        width, pos_per_row = d_model, 1              # already lane-dense 2-D
    else:
        width = d_model * (_LANES // math.gcd(d_model, _LANES))   # lcm(d, 128)
        if width <= _MAX_FLAT_WIDTH:
            pos_per_row = width // _LANES * 0 + width // d_model  # = 128/gcd
        else:
            width, pos_per_row = d_model, 1          # rare fallback: masked vst
    # Pad the sequence so the flattening is exact; trailing rows sliced off.
    padded_seq = -(-seq_len // pos_per_row) * pos_per_row
    n_rows = padded_seq // pos_per_row
    flat = _build_table(n_rows, width, d_model, pos_per_row, dtype)
    pe = flat.reshape(padded_seq, d_model)           # contiguous reshape, free
    return pe if padded_seq == seq_len else pe[:seq_len]


class PositionalEmbedding:
    """Mirror of the PyTorch module: table built once, forward just slices it."""

    def __init__(self, d_model: int, max_len: int = 5000, dtype=jnp.float32):
        self.pe = build_pe_table(max_len, d_model, dtype)[None]   # (1, max_len, d)

    def __call__(self, x):
        return self.pe[:, : x.shape[1]]


def _bucket_len(seq_len: int) -> int:
    """Power-of-two bucket (>=128) so distinct seq_lens share one compiled table."""
    return max(_LANES, 1 << (max(int(seq_len), 1) - 1).bit_length())


@functools.lru_cache(maxsize=32)
def _cached_pe(d_model: int, bucket: int, dtype_name: str):
    return build_pe_table(bucket, d_model, jnp.dtype(dtype_name))[None]


def positional_embedding_forward(x):
    """Stateless mirror of forward: only x.shape[1] / x.shape[2] matter."""
    _, seq_len, d_model = x.shape
    pe = _cached_pe(int(d_model), _bucket_len(seq_len), "float32")
    return pe[:, : seq_len]


def _reference(seq_len, d_model):
    """Pure-JAX reference identical to the PyTorch buffer construction."""
    position = jnp.arange(seq_len, dtype=jnp.float32)[:, None]
    div_term = jnp.exp(
        jnp.arange(0, d_model, 2, dtype=jnp.float32)
        * -(math.log(10000.0) / d_model))
    pe = jnp.zeros((seq_len, d_model), jnp.float32)
    pe = pe.at[:, 0::2].set(jnp.sin(position * div_term))
    pe = pe.at[:, 1::2].set(jnp.cos(position * div_term))
    return pe[None]


if __name__ == "__main__":
    key = jax.random.PRNGKey(0)

    # 1) Module-style usage (matches the PyTorch spec): d_model=32, max_len=5000.
    #    Lane-dense flat path (width=lcm(32,128)=128), grid split into 5 steps.
    batch, seq_len, d_model = 2, 8, 32
    x = jax.random.normal(key, (batch, seq_len, d_model), dtype=jnp.float32)
    mod = PositionalEmbedding(d_model, max_len=5000)
    out = jax.block_until_ready(mod(x))
    assert out.shape == (1, seq_len, d_model), out.shape
    assert jnp.allclose(out, _reference(seq_len, d_model), atol=1e-5, rtol=1e-5)

    # 2) Stateless path, non-power-of-two d_model=48: now lane-dense too
    #    (width=lcm(48,128)=384), built at the 128-row bucket and sliced.
    x2 = jax.random.normal(key, (2, 100, 48), dtype=jnp.float32)
    out2 = jax.block_until_ready(positional_embedding_forward(x2))
    assert out2.shape == (1, 100, 48), out2.shape
    assert jnp.allclose(out2, _reference(100, 48), atol=2e-5, rtol=1e-5)

    # 2b) Different seq_len, same d_model: hits the same cached bucket table
    #     (no recompile), result is literally a slice of the same array.
    x2b = jax.random.normal(key, (2, 64, 48), dtype=jnp.float32)
    out2b = jax.block_until_ready(positional_embedding_forward(x2b))
    assert out2b.shape == (1, 64, 48), out2b.shape
    assert jnp.array_equal(out2b, out2[:, :64])

    # 3) Lane-aligned d_model (d % 128 == 0): plain 2-D lane-dense path.
    x3 = jax.random.normal(key, (2, 64, 128), dtype=jnp.float32)
    out3 = jax.block_until_ready(positional_embedding_forward(x3))
    assert out3.shape == (1, 64, 128), out3.shape
    assert jnp.allclose(out3, _reference(64, 128), atol=2e-5, rtol=1e-5)

    print("KERNEL_OK")
</pallas_src>

<mosaic_0001>
module attributes {stable_mosaic.version = 11 : i64} {
  func.func @_pe_kernel(%arg0: i32, %arg1: memref<1x128xf32, #tpu.memory_space<vmem>>, %arg2: memref<1x128xf32, #tpu.memory_space<vmem>>, %arg3: memref<1x128xf32, #tpu.memory_space<vmem>>, %arg4: memref<312x128xf32, #tpu.memory_space<vmem>>) attributes {dimension_semantics = [#tpu.dimension_semantics<parallel>], iteration_bounds = array<i64: 5>, scalar_prefetch = 0 : i64, scratch_operands = 0 : i64, tpu.core_type = #tpu.core_type<tc>, window_params = [{pipeline_mode = #tpu.pipeline_mode<synchronous>, transform_indices = @transform_0, window_bounds = array<i64: 1, 128>}, {pipeline_mode = #tpu.pipeline_mode<synchronous>, transform_indices = @transform_1, window_bounds = array<i64: 1, 128>}, {pipeline_mode = #tpu.pipeline_mode<synchronous>, transform_indices = @transform_2, window_bounds = array<i64: 1, 128>}, {transform_indices = @transform_3, window_bounds = array<i64: 312, 128>}]} {
    %c1248_i32 = arith.constant 1248 : i32
    %0 = arith.muli %arg0, %c1248_i32 : i32
    %1 = arith.sitofp %0 : i32 to f32
    %2 = tpu.iota {dimensions = array<i32: 0>} : vector<312x1xi32>
    %c4_i32 = arith.constant 4 : i32
    %3 = vector.broadcast %c4_i32 : i32 to vector<312x1xi32>
    %4 = arith.muli %2, %3 : vector<312x1xi32>
    %5 = arith.sitofp %4 : vector<312x1xi32> to vector<312x1xf32>
    %6 = vector.broadcast %1 : f32 to vector<312x1xf32>
    %7 = arith.addf %5, %6 : vector<312x1xf32>
    %c0 = arith.constant 0 : index
    %c0_0 = arith.constant 0 : index
    %8 = vector.load %arg3[%c0, %c0_0] : memref<1x128xf32, #tpu.memory_space<vmem>>, vector<1x128xf32>
    %9 = vector.broadcast %7 : vector<312x1xf32> to vector<312x128xf32>
    %10 = vector.broadcast %8 : vector<1x128xf32> to vector<312x128xf32>
    %11 = arith.addf %9, %10 : vector<312x128xf32>
    %c0_1 = arith.constant 0 : index
    %c0_2 = arith.constant 0 : index
    %12 = vector.load %arg1[%c0_1, %c0_2] : memref<1x128xf32, #tpu.memory_space<vmem>>, vector<1x128xf32>
    %13 = vector.broadcast %12 : vector<1x128xf32> to vector<312x128xf32>
    %14 = arith.mulf %11, %13 : vector<312x128xf32>
    %c0_3 = arith.constant 0 : index
    %c0_4 = arith.constant 0 : index
    %15 = vector.load %arg2[%c0_3, %c0_4] : memref<1x128xf32, #tpu.memory_space<vmem>>, vector<1x128xf32>
    %16 = vector.broadcast %15 : vector<1x128xf32> to vector<312x128xf32>
    %17 = arith.addf %14, %16 : vector<312x128xf32>
    %18 = math.sin %17 : vector<312x128xf32>
    %c0_5 = arith.constant 0 : index
    %c0_6 = arith.constant 0 : index
    %19 = vector.load %arg4[%c0_5, %c0_6] : memref<312x128xf32, #tpu.memory_space<vmem>>, vector<312x128xf32>
    tpu.vector_store %arg4[%c0_5, %c0_6], %18 {strides = array<i32>} : memref<312x128xf32, #tpu.memory_space<vmem>>, vector<312x128xf32>,
    return
  }
  func.func @transform_0(%arg0: i32) -> (i32, i32) {
    %c0_i32 = arith.constant 0 : i32
    %c0_i32_0 = arith.constant 0 : i32
    %c0_i32_1 = arith.constant 0 : i32
    return %c0_i32, %c0_i32_0 : i32, i32
  }
  func.func @transform_1(%arg0: i32) -> (i32, i32) {
    %c0_i32 = arith.constant 0 : i32
    %c0_i32_0 = arith.constant 0 : i32
    %c0_i32_1 = arith.constant 0 : i32
    return %c0_i32, %c0_i32_0 : i32, i32
  }
  func.func @transform_2(%arg0: i32) -> (i32, i32) {
    %c0_i32 = arith.constant 0 : i32
    %c0_i32_0 = arith.constant 0 : i32
    %c0_i32_1 = arith.constant 0 : i32
    return %c0_i32, %c0_i32_0 : i32, i32
  }
  func.func @transform_3(%arg0: i32) -> (i32, i32) {
    %c0_i32 = arith.constant 0 : i32
    %c0_i32_0 = arith.constant 0 : i32
    return %arg0, %c0_i32 : i32, i32
  }
}

</mosaic_0001>

<bundles_post_ra>
// kernel: tpu_custom_call.1
= control target key start
LH: loop header
LB: loop body
LE: loop exit
PB: predicated region body
PF: predicated region fallthrough
CT: control target
= control target key end

     0   :  { %8 = vsyncpa [#allocation3], 0  ;;  %s8595_s0 = inlined_call_operand.hbm [shape: f32[1,128], index: 0, kind: input, shape index: {}]   ;;  %s8596_s1 = inlined_call_operand.vmem [shape: f32[1,128], index: 1, kind: input, shape index: {}]   ;;  %s8597_s2 = inlined_call_operand.vmem [shape: f32[1,128], index: 2, kind: input, shape index: {}]   ;;  %s8598_s3 = inlined_call_operand.hbm [shape: f32[1250,128], index: 3, kind: output, shape index: {}]  }
   0x1   :  { %9 = vsyncpa [#allocation4], 0 }
   0x2   :  { %11 = vsyncpa [#allocation4 + $0x1], 0  ;;  %s5306_s12 = smov 0   ;;  %s5308_s13 = smov 0  }
   0x3   :  { %s5310_s14 = smov 0   ;;  %s5312_s15 = smov 0  }
   0x4 LB: > { %s5327_s16 = sadd.s32 4294967295, %s5274_s15   ;;  %s4642_s17 = sadd.s32 4294967294, %s5274_s15   ;;  %s5274_s15 = sphi %s5312_s15, %s8756_s15   ;;  %s5270_s14 = sphi %s5310_s14, %s8755_s14   ;;  %s5266_s13 = sphi %s5308_s13, %s8754_s13   ;;  %s5262_s12 = sphi %s5306_s12, %s8753_s12  }
   0x5   : > { %s5331_s18 = sadd.s32 1, %s5274_s15   ;;  %s87_s19 = sadd.s32 1, %s5270_s14 }
   0x6   : > { %s84_s20 = ssub.s32 %s5274_s15, %s5331_s18  ;;  %p97_p0 = scmp.ne.s32.totalorder %s5270_s14, %s5266_s13 }
   0x7   : > { %p85_p1 = scmp.eq.s32.totalorder %s84_s20, 0  ;;  %p98_p2 = scmp.eq.s32.totalorder %s5327_s16, 4 }
   0x8   : > { %p103_p3 = scmp.ne.s32.totalorder %s5266_s13, %s5262_s12  ;;  %p104_p4 = scmp.eq.s32.totalorder %s4642_s17, 4 }
   0x9   : > { %s5342_s21 = scalar_select %p85_p1, %s5270_s14, %s87_s19  }
   0xa   : > { %p5344_p5 = por %p98_p2, %p97_p0  ;;  %p5348_p6 = por %p104_p4, %p103_p3 }
   0xb   : > { %p4643_p7 = scmp.ge.s32.totalorder %s5274_s15, 1  ;;  %p111_p8 = scmp.lt.s32.totalorder %s5274_s15, 6 }
   0xc   : > { %p4984_p9 = scmp.eq.s32.totalorder %s5327_s16, 0  ;;  %s5276_s25 = smov [#allocation2]  }
   0xd   : > { %p5355_p10 = pnand %p4643_p7, %p111_p8  ;;  %s124_s26 = sshll.u32 %s5276_s25, 4  ;;  %s125_s26 = int_to_ptr.vmem [resolvable:$true] %s124_s26 }
   0xe   : > { %s5195_s27 = scalar_lea.vmem %s125_s26, 16  ;;  %s5202_s28 = scalar_lea.vmem %s125_s26, 32 }
   0xf   : > { %p4976_p11 = pneg %p5355_p10  ;;  %p5196_p0 = scmp.ne.s32.totalorder %s125_s26, %s5195_s27 }
  0x10   : > { %p5203_p3 = scmp.lt.s32.totalorder %s125_s26, %s125_s26  ;;  %p5204_p4 = scmp.lt.s32.totalorder %s5202_s28, %s5195_s27 }
  0x11   : > { %p4977_p12 = pnand %p4984_p9, %p4976_p11 }
  0x12   : > { %p5205_p7 = por %p5204_p4, %p5203_p3 }
  0x13   : > { %p5186_p13 = pneg %p4977_p12 }
  0x15   : > { %p5198_p1 = pnand %p5196_p0, %p5186_p13 }
  0x17   : > { %p5199_p2 = pneg %p5198_p1 }
  0x19   : > { %p5206_p8 = pnand %p5205_p7, %p5199_p2 }
  0x1b   : > { %5209 = shalt.err (!%p5206_p8)
}
  0x1c   : > { %4979 = dma.hbm_to_vmem [thread:$0]  (!%p4977_p12), %s8595_s0, 16, %s125_s26, [#allocation3]  }
  0x1d   : > { %143 = sbr.rel (%p5355_p10) target bundleno = 1133 (0x46d), region = 32 }
  0x22   : > { %5253 = dma.done.wait (%p4984_p9), [#allocation3], 16  }
  0x23   : > { %5255 = vsyncadd (%p4984_p9), [#allocation3], 4294967280  ;;  %v169_v0 = vlaneseq  ;;  %s167_s4 = smul.u32 1248, %s5327_s16  ;;  %s159_s10 = sand.u32 1, %s5266_s13  }
  0x24   : > { %s5969_s11 = smul.u32 312, %s159_s10  ;;  %s8535_s19 = scalar_lea.sflag [#allocation4], %s159_s10 }
  0x25   : > { %v170_v1 = vshrl.u32 %v169_v0, 7  ;;  %s168_s5 = scvt.s32.f32 %s167_s4  ;;  %s4568_s20 = smul.u32 (%p5344_p5), 39, %s5327_s16 }
  0x26   : > { %s5997_s17 = scalar_lea.vmem [#allocation5], %s5969_s11 }
  0x27   : > { %v171_v2 = vadd.s32 8, %v170_v1  ;;  %v172_v3 = vadd.s32 16, %v170_v1  ;;  %v5372_v4 = vadd.s32 24, %v170_v1  ;;  %v174_v5 = vadd.s32 32, %v170_v1  ;;  %s4569_s24 = ssub.s32 (%p5344_p5), 157, %s4568_s20 }
  0x28   : > { %v175_v6 = vadd.s32 40, %v170_v1  ;;  %v176_v7 = vadd.s32 48, %v170_v1  ;;  %v177_v8 = vadd.s32 56, %v170_v1  ;;  %v178_v9 = vadd.s32 64, %v170_v1  ;;  %p4570_p9 = scmp.lt.s32.totalorder (%p5344_p5), %s4569_s24, 39 }
  0x29   : > { %v179_v10 = vadd.s32 72, %v170_v1  ;;  %v180_v11 = vadd.s32 80, %v170_v1  ;;  %v181_v12 = vadd.s32 88, %v170_v1  ;;  %v182_v13 = vadd.s32 96, %v170_v1 }
  0x2a   : > { %v183_v14 = vadd.s32 104, %v170_v1  ;;  %v184_v15 = vadd.s32 112, %v170_v1  ;;  %v185_v16 = vadd.s32 120, %v170_v1  ;;  %v5375_v17 = vadd.s32 128, %v170_v1 }
  0x2b   : > { %v5377_v18 = vadd.s32 136, %v170_v1  ;;  %v5379_v19 = vadd.s32 144, %v170_v1  ;;  %v5381_v20 = vadd.s32 152, %v170_v1  ;;  %v5383_v21 = vadd.s32 160, %v170_v1 }
  0x2c   : > { %v5385_v22 = vadd.s32 168, %v170_v1  ;;  %v5387_v23 = vadd.s32 176, %v170_v1  ;;  %v5389_v24 = vadd.s32 184, %v170_v1  ;;  %v5391_v25 = vadd.s32 192, %v170_v1 }
  0x2d   : > { %v5393_v26 = vadd.s32 200, %v170_v1  ;;  %v5395_v27 = vadd.s32 208, %v170_v1  ;;  %v5397_v28 = vadd.s32 216, %v170_v1  ;;  %v5399_v29 = vadd.s32 224, %v170_v1 }
  0x2e   : > { %v5401_v30 = vadd.s32 232, %v170_v1  ;;  %v5403_v31 = vadd.s32 240, %v170_v1  ;;  %v5405_v32 = vadd.s32 248, %v170_v1  ;;  %v5407_v33 = vadd.s32 256, %v170_v1 }
  0x2f   : > { %v5409_v34 = vadd.s32 264, %v170_v1  ;;  %v209_v35 = vmul.u32 4, %v170_v1  ;;  %v210_v36 = vmul.u32 4, %v171_v2  ;;  %v5411_v37 = vadd.s32 272, %v170_v1 }
  0x30   : > { %v5413_v38 = vadd.s32 280, %v170_v1  ;;  %v5415_v39 = vadd.s32 288, %v170_v1  ;;  %v211_v40 = vmul.u32 4, %v172_v3  ;;  %v5417_v41 = vadd.s32 296, %v170_v1 }
  0x31   : > { %v5419_v42 = vadd.s32 304, %v170_v1  ;;  %v213_v43 = vmul.u32 4, %v174_v5  ;;  %v214_v44 = vmul.u32 4, %v175_v6  ;;  %v5421_v47 = vcvt.s32.f32 %v209_v35 }
  0x32   : > { %v215_v45 = vmul.u32 4, %v176_v7  ;;  %v216_v46 = vmul.u32 4, %v177_v8  ;;  %v5423_v48 = vstv %s168_s5  ;;  %v5425_v51 = vcvt.s32.f32 %v210_v36 }
  0x33   : > { %v217_v49 = vmul.u32 4, %v178_v9  ;;  %v218_v50 = vmul.u32 4, %v179_v10  ;;  %v5427_v52 = vcvt.s32.f32 %v211_v40  ;;  %v5429_v55 = vcvt.s32.f32 %v213_v43 }
  0x34   : > { %v219_v53 = vmul.u32 4, %v180_v11  ;;  %v220_v54 = vmul.u32 4, %v181_v12  ;;  %v5431_v56 = vcvt.s32.f32 %v214_v44  ;;  %v254_v59 = vcvt.s32.f32 %v215_v45 }
  0x35   : > { %v221_v57 = vmul.u32 4, %v182_v13  ;;  %v222_v58 = vmul.u32 4, %v183_v14  ;;  %v255_v60 = vcvt.s32.f32 %v216_v46  ;;  %v256_v63 = vcvt.s32.f32 %v217_v49 }
  0x36   : > { %v223_v61 = vmul.u32 4, %v184_v15  ;;  %v224_v62 = vmul.u32 4, %v185_v16  ;;  %v257_v0 = vcvt.s32.f32 %v218_v50  ;;  %v258_v3 = vcvt.s32.f32 %v219_v53 }
  0x37   : > { %v225_v1 = vmul.u32 4, %v5375_v17  ;;  %v226_v2 = vmul.u32 4, %v5377_v18  ;;  %v259_v5 = vcvt.s32.f32 %v220_v54  ;;  %v260_v8 = vcvt.s32.f32 %v221_v57 }
  0x38   : > { %v227_v6 = vmul.u32 4, %v5379_v19  ;;  %v228_v7 = vmul.u32 4, %v5381_v20  ;;  %v261_v9 = vcvt.s32.f32 %v222_v58  ;;  %v262_v12 = vcvt.s32.f32 %v223_v61 }
  0x39   : > { %v229_v10 = vmul.u32 4, %v5383_v21  ;;  %v230_v11 = vmul.u32 4, %v5385_v22  ;;  %v263_v13 = vcvt.s32.f32 %v224_v62  ;;  %v264_v16 = vcvt.s32.f32 %v225_v1 }
  0x3a   : > { %v231_v14 = vmul.u32 4, %v5387_v23  ;;  %v232_v15 = vmul.u32 4, %v5389_v24  ;;  %v265_v17 = vcvt.s32.f32 %v226_v2  ;;  %v266_v35 = vcvt.s32.f32 %v227_v6 }
  0x3b   : > { %v233_v18 = vmul.u32 4, %v5391_v25  ;;  %v234_v19 = vmul.u32 4, %v5393_v26  ;;  %v267_v20 = vcvt.s32.f32 %v228_v7  ;;  %v268_v40 = vcvt.s32.f32 %v229_v10 }
  0x3c   : > { %v235_v36 = vmul.u32 4, %v5395_v27  ;;  %v236_v21 = vmul.u32 4, %v5397_v28  ;;  %v269_v22 = vcvt.s32.f32 %v230_v11  ;;  %v270_v44 = vcvt.s32.f32 %v231_v14 }
  0x3d   : > { %v237_v43 = vmul.u32 4, %v5399_v29  ;;  %v238_v23 = vmul.u32 4, %v5401_v30  ;;  %v271_v24 = vcvt.s32.f32 %v232_v15  ;;  %v272_v46 = vcvt.s32.f32 %v233_v18 }
  0x3e   : > { %v239_v45 = vmul.u32 4, %v5403_v31  ;;  %v240_v25 = vmul.u32 4, %v5405_v32  ;;  %v273_v26 = vcvt.s32.f32 %v234_v19  ;;  %v274_v50 = vcvt.s32.f32 %v235_v36 }
  0x3f   : > { %v241_v49 = vmul.u32 4, %v5407_v33  ;;  %v242_v27 = vmul.u32 4, %v5409_v34  ;;  %v275_v28 = vcvt.s32.f32 %v236_v21  ;;  %v276_v54 = vcvt.s32.f32 %v237_v43 }
  0x40   : > { %v243_v53 = vmul.u32 4, %v5411_v37  ;;  %v244_v29 = vmul.u32 4, %v5413_v38  ;;  %v277_v30 = vcvt.s32.f32 %v238_v23  ;;  %v278_v58 = vcvt.s32.f32 %v239_v45 }
  0x41   : > { %v245_v57 = vmul.u32 4, %v5415_v39  ;;  %v246_v31 = vmul.u32 4, %v5417_v41  ;;  %v279_v32 = vcvt.s32.f32 %v240_v25  ;;  %v280_v62 = vcvt.s32.f32 %v241_v49 }
  0x42   : > { %v247_v61 = vmul.u32 4, %v5419_v42  ;;  %v281_v33 = vcvt.s32.f32 %v242_v27  ;;  %v282_v1 = vcvt.s32.f32 %v243_v53  ;;  %v283_v34 = vcvt.s32.f32 %v244_v29 }
  0x43   : > { %v284_v2 = vcvt.s32.f32 %v245_v57  ;;  %v285_v6 = vcvt.s32.f32 %v246_v31  ;;  %v288_v37 = vadd.f32 %v5423_v48, %v5421_v47  ;;  %v289_v7 = vadd.f32 %v5423_v48, %v5425_v51 }
  0x44   : > { %v286_v38 = vcvt.s32.f32 %v247_v61  ;;  %v292_v39 = vadd.f32 %v5423_v48, %v5429_v55  ;;  %v293_v41 = vadd.f32 %v5423_v48, %v5431_v56  ;;  %v294_v42 = vadd.f32 %v5423_v48, %v254_v59 }
  0x45   : > { %v295_v10 = vadd.f32 %v5423_v48, %v255_v60  ;;  %v296_v11 = vadd.f32 %v5423_v48, %v256_v63  ;;  %v297_v14 = vadd.f32 %v5423_v48, %v257_v0  ;;  %v298_v47 = vadd.f32 %v5423_v48, %v258_v3 }
  0x46   : > { %v299_v15 = vadd.f32 %v5423_v48, %v259_v5  ;;  %v300_v51 = vadd.f32 %v5423_v48, %v260_v8  ;;  %v301_v18 = vadd.f32 %v5423_v48, %v261_v9  ;;  %v302_v55 = vadd.f32 %v5423_v48, %v262_v12 }
  0x47   : > { %v303_v56 = vadd.f32 %v5423_v48, %v263_v13  ;;  %v304_v59 = vadd.f32 %v5423_v48, %v264_v16  ;;  %v305_v60 = vadd.f32 %v5423_v48, %v265_v17  ;;  %v306_v63 = vadd.f32 %v5423_v48, %v266_v35 }
  0x48   : > { %v307_v0 = vadd.f32 %v5423_v48, %v267_v20  ;;  %v308_v3 = vadd.f32 %v5423_v48, %v268_v40  ;;  %v309_v5 = vadd.f32 %v5423_v48, %v269_v22  ;;  %v310_v8 = vadd.f32 %v5423_v48, %v270_v44  ;;  %v5491_v20 = vld [vmem:[%s8597_s2] ss:$0 sm:$0xff] }
  0x49   : > { %v311_v9 = vadd.f32 %v5423_v48, %v271_v24  ;;  %v312_v12 = vadd.f32 %v5423_v48, %v272_v46  ;;  %v313_v13 = vadd.f32 %v5423_v48, %v273_v26  ;;  %v314_v16 = vadd.f32 %v5423_v48, %v274_v50 }
  0x4a   : > { %v315_v17 = vadd.f32 %v5423_v48, %v275_v28  ;;  %v316_v19 = vadd.f32 %v5423_v48, %v276_v54  ;;  %v317_v35 = vadd.f32 %v5423_v48, %v277_v30  ;;  %v318_v36 = vadd.f32 %v5423_v48, %v278_v58 }
  0x4b   : > { %v319_v21 = vadd.f32 %v5423_v48, %v279_v32  ;;  %v320_v40 = vadd.f32 %v5423_v48, %v280_v62  ;;  %v321_v22 = vadd.f32 %v5423_v48, %v281_v33  ;;  %v322_v43 = vadd.f32 %v5423_v48, %v282_v1 }
  0x4c   : > { %v323_v23 = vadd.f32 %v5423_v48, %v283_v34  ;;  %v324_v44 = vadd.f32 %v5423_v48, %v284_v2  ;;  %v325_v24 = vadd.f32 %v5423_v48, %v285_v6  ;;  %v212_v45 = vmul.u32 4, %v5372_v4 }
  0x4d   : > { %v290_v25 = vadd.f32 %v5423_v48, %v5427_v52  ;;  %v326_v46 = vadd.f32 %v5423_v48, %v286_v38  ;;  %v334_v26 = vadd.f32 %v5491_v20, %v288_v37  ;;  %v335_v49 = vadd.f32 %v5491_v20, %v289_v7 }
  0x4e   : > { %v338_v27 = vadd.f32 %v5491_v20, %v292_v39  ;;  %v339_v50 = vadd.f32 %v5491_v20, %v293_v41  ;;  %v340_v28 = vadd.f32 %v5491_v20, %v294_v42  ;;  %v341_v53 = vadd.f32 %v5491_v20, %v295_v10 }
  0x4f   : > { %v342_v29 = vadd.f32 %v5491_v20, %v296_v11  ;;  %v343_v4 = vadd.f32 %v5491_v20, %v297_v14  ;;  %v344_v52 = vadd.f32 %v5491_v20, %v298_v47  ;;  %v345_v54 = vadd.f32 %v5491_v20, %v299_v15  ;;  %v5534_v11 = vld [vmem:[#allocation2] ss:$0 sm:$0xff] }
  0x50   : > { %v346_v30 = vadd.f32 %v5491_v20, %v300_v51  ;;  %v347_v57 = vadd.f32 %v5491_v20, %v301_v18  ;;  %v348_v31 = vadd.f32 %v5491_v20, %v302_v55  ;;  %v349_v58 = vadd.f32 %v5491_v20, %v303_v56 }
  0x51   : > { %v350_v32 = vadd.f32 %v5491_v20, %v304_v59  ;;  %v351_v61 = vadd.f32 %v5491_v20, %v305_v60  ;;  %v352_v62 = vadd.f32 %v5491_v20, %v306_v63  ;;  %v353_v33 = vadd.f32 %v5491_v20, %v307_v0 }
  0x52   : > { %v354_v1 = vadd.f32 %v5491_v20, %v308_v3  ;;  %v355_v34 = vadd.f32 %v5491_v20, %v309_v5  ;;  %v356_v2 = vadd.f32 %v5491_v20, %v310_v8  ;;  %v357_v6 = vadd.f32 %v5491_v20, %v311_v9 }
  0x53   : > { %v358_v37 = vadd.f32 %v5491_v20, %v312_v12  ;;  %v359_v38 = vadd.f32 %v5491_v20, %v313_v13  ;;  %v360_v7 = vadd.f32 %v5491_v20, %v314_v16  ;;  %v361_v39 = vadd.f32 %v5491_v20, %v315_v17 }
  0x54   : > { %v362_v41 = vadd.f32 %v5491_v20, %v316_v19  ;;  %v363_v42 = vadd.f32 %v5491_v20, %v317_v35  ;;  %v364_v10 = vadd.f32 %v5491_v20, %v318_v36  ;;  %v365_v14 = vadd.f32 %v5491_v20, %v319_v21 }
  0x55   : > { %v366_v47 = vadd.f32 %v5491_v20, %v320_v40  ;;  %v367_v15 = vadd.f32 %v5491_v20, %v321_v22  ;;  %v368_v51 = vadd.f32 %v5491_v20, %v322_v43  ;;  %v369_v18 = vadd.f32 %v5491_v20, %v323_v23 }
  0x56   : > { %v370_v55 = vadd.f32 %v5491_v20, %v324_v44  ;;  %v371_v56 = vadd.f32 %v5491_v20, %v325_v24  ;;  %v372_v59 = vadd.f32 %v5491_v20, %v326_v46  ;;  %v251_v60 = vcvt.s32.f32 %v212_v45 }
  0x57   : > { %v336_v63 = vadd.f32 %v5491_v20, %v290_v25  ;;  %v380_v0 = vmul.f32 %v5534_v11, %v334_v26  ;;  %v381_v3 = vmul.f32 %v5534_v11, %v335_v49  ;;  %v384_v5 = vmul.f32 %v5534_v11, %v338_v27 }
  0x58   : > { %v385_v8 = vmul.f32 %v5534_v11, %v339_v50  ;;  %v386_v9 = vmul.f32 %v5534_v11, %v340_v28  ;;  %v387_v12 = vmul.f32 %v5534_v11, %v341_v53  ;;  %v388_v13 = vmul.f32 %v5534_v11, %v342_v29 }
  0x59   : > { %v389_v16 = vmul.f32 %v5534_v11, %v343_v4  ;;  %v390_v17 = vmul.f32 %v5534_v11, %v344_v52  ;;  %v391_v19 = vmul.f32 %v5534_v11, %v345_v54  ;;  %v392_v35 = vmul.f32 %v5534_v11, %v346_v30  ;;  %v5578_v52 = vld [vmem:[%s8596_s1] ss:$0 sm:$0xff] }
  0x5a   : > { %v393_v36 = vmul.f32 %v5534_v11, %v347_v57  ;;  %v394_v21 = vmul.f32 %v5534_v11, %v348_v31  ;;  %v395_v40 = vmul.f32 %v5534_v11, %v349_v58  ;;  %v396_v22 = vmul.f32 %v5534_v11, %v350_v32 }
  0x5b   : > { %v397_v43 = vmul.f32 %v5534_v11, %v351_v61  ;;  %v398_v23 = vmul.f32 %v5534_v11, %v352_v62  ;;  %v399_v44 = vmul.f32 %v5534_v11, %v353_v33  ;;  %v400_v24 = vmul.f32 %v5534_v11, %v354_v1 }
  0x5c   : > { %v401_v45 = vmul.f32 %v5534_v11, %v355_v34  ;;  %v402_v25 = vmul.f32 %v5534_v11, %v356_v2  ;;  %v403_v46 = vmul.f32 %v5534_v11, %v357_v6  ;;  %v404_v26 = vmul.f32 %v5534_v11, %v358_v37 }
  0x5d   : > { %v405_v49 = vmul.f32 %v5534_v11, %v359_v38  ;;  %v406_v27 = vmul.f32 %v5534_v11, %v360_v7  ;;  %v407_v50 = vmul.f32 %v5534_v11, %v361_v39  ;;  %v408_v28 = vmul.f32 %v5534_v11, %v362_v41 }
  0x5e   : > { %v409_v53 = vmul.f32 %v5534_v11, %v363_v42  ;;  %v410_v29 = vmul.f32 %v5534_v11, %v364_v10  ;;  %v411_v4 = vmul.f32 %v5534_v11, %v365_v14  ;;  %v412_v54 = vmul.f32 %v5534_v11, %v366_v47 }
  0x5f   : > { %v413_v30 = vmul.f32 %v5534_v11, %v367_v15  ;;  %v414_v57 = vmul.f32 %v5534_v11, %v368_v51  ;;  %v415_v31 = vmul.f32 %v5534_v11, %v369_v18  ;;  %v291_v58 = vadd.f32 %v5423_v48, %v251_v60 }
  0x60   : > { %v416_v32 = vmul.f32 %v5534_v11, %v370_v55  ;;  %v417_v61 = vmul.f32 %v5534_v11, %v371_v56  ;;  %v418_v62 = vmul.f32 %v5534_v11, %v372_v59  ;;  %v382_v33 = vmul.f32 %v5534_v11, %v336_v63 }
  0x61   : > { %v5590_v1 = vadd.f32 %v5578_v52, %v380_v0  ;;  %v5593_v34 = vadd.f32 %v5578_v52, %v381_v3  ;;  %v5596_v2 = vadd.f32 %v5578_v52, %v384_v5  ;;  %v5599_v6 = vadd.f32 %v5578_v52, %v385_v8 }
  0x62   : > { %v5602_v48 = vadd.f32 %v5578_v52, %v386_v9  ;;  %v5605_v37 = vadd.f32 %v5578_v52, %v387_v12  ;;  %v5608_v38 = vadd.f32 %v5578_v52, %v388_v13  ;;  %v5611_v7 = vadd.f32 %v5578_v52, %v389_v16 }
  0x63   : > { %v5614_v39 = vadd.f32 %v5578_v52, %v390_v17  ;;  %v5617_v41 = vadd.f32 %v5578_v52, %v391_v19  ;;  %v5620_v42 = vadd.f32 %v5578_v52, %v392_v35  ;;  %v5623_v10 = vadd.f32 %v5578_v52, %v393_v36 }
  0x64   : > { %v5626_v14 = vadd.f32 %v5578_v52, %v394_v21  ;;  %v5629_v47 = vadd.f32 %v5578_v52, %v395_v40  ;;  %v5632_v15 = vadd.f32 %v5578_v52, %v396_v22  ;;  %v5635_v51 = vadd.f32 %v5578_v52, %v397_v43 }
  0x65   : > { %v5638_v18 = vadd.f32 %v5578_v52, %v398_v23  ;;  %v5641_v55 = vadd.f32 %v5578_v52, %v399_v44  ;;  %v5644_v56 = vadd.f32 %v5578_v52, %v400_v24  ;;  %v5647_v59 = vadd.f32 %v5578_v52, %v401_v45 }
  0x66   : > { %v5650_v60 = vadd.f32 %v5578_v52, %v402_v25  ;;  %v5653_v63 = vadd.f32 %v5578_v52, %v403_v46  ;;  %v5656_v0 = vadd.f32 %v5578_v52, %v404_v26  ;;  %v5659_v3 = vadd.f32 %v5578_v52, %v405_v49 }
  0x67   : > { %v5662_v5 = vadd.f32 %v5578_v52, %v406_v27  ;;  %v5665_v8 = vadd.f32 %v5578_v52, %v407_v50  ;;  %v5668_v9 = vadd.f32 %v5578_v52, %v408_v28  ;;  %v5671_v12 = vadd.f32 %v5578_v52, %v409_v53 }
  0x68   : > { %8634 = vst [vmem:[#allocation8_spill] sm:$0xff] %v5650_v60  ;;  %8635 = vst [vmem:[#allocation9_spill] sm:$0xff] %v5653_v63  ;;  %v5674_v13 = vadd.f32 %v5578_v52, %v410_v29  ;;  %v5677_v16 = vadd.f32 %v5578_v52, %v411_v4  ;;  %v5680_v17 = vadd.f32 %v5578_v52, %v412_v54  ;;  %v8601_v23 = vand.u32 2147483647, %v5590_v1 }
  0x69   : > { %8636 = vst [vmem:[#allocation10_spill] sm:$0xff] %v5656_v0  ;;  %8637 = vst [vmem:[#allocation11_spill] sm:$0xff] %v5659_v3  ;;  %v5683_v19 = vadd.f32 %v5578_v52, %v413_v30  ;;  %v5686_v35 = vadd.f32 %v5578_v52, %v414_v57  ;;  %v5689_v36 = vadd.f32 %v5578_v52, %v415_v31  ;;  %v468_v44 = vand.u32 2139095040, %v5590_v1 }
  0x6a   : > { %8638 = vst [vmem:[#allocation12_spill] sm:$0xff] %v5662_v5  ;;  %8639 = vst [vmem:[#allocation13_spill] sm:$0xff] %v5665_v8  ;;  %v5692_v21 = vadd.f32 %v5578_v52, %v416_v32  ;;  %v5695_v40 = vadd.f32 %v5578_v52, %v382_v33  ;;  %v5698_v22 = vadd.f32 %v5578_v52, %v417_v61  ;;  %v8600_v24 = vand.u32 2147483647, %v5593_v34 }
  0x6b   : > { %8640 = vst [vmem:[#allocation14_spill] sm:$0xff] %v5668_v9  ;;  %8641 = vst [vmem:[#allocation15_spill] sm:$0xff] %v5671_v12  ;;  %v5701_v43 = vadd.f32 %v5578_v52, %v418_v62  ;;  %v337_v45 = vadd.f32 %v5491_v20, %v291_v58  ;;  %v572_v25 = vand.u32 2139095040, %v5593_v34  ;;  %v469_v46 = vshrl.u32 %v468_v44, 23 }
  0x6c   : > { %8642 = vst [vmem:[#allocation16_spill] sm:$0xff] %v5674_v13  ;;  %8643 = vst [vmem:[#allocation17_spill] sm:$0xff] %v5677_v16  ;;  %v472_v26 = vand.u32 8388607, %v8601_v23  ;;  %v576_v27 = vand.u32 8388607, %v8600_v24 }
  0x6d   : > { %8644 = vst [vmem:[#allocation18_spill] sm:$0xff] %v5680_v17  ;;  %8645 = vst [vmem:[#allocation19_spill] sm:$0xff] %v5683_v19  ;;  %v573_v49 = vshrl.u32 %v572_v25, 23  ;;  %v676_v50 = vand.u32 2139095040, %v5695_v40  ;;  %v4650_v28 = vadd.s32 4294967169, %v469_v46  ;;  %v383_v53 = vmul.f32 %v5534_v11, %v337_v45 }
  0x6e   : > { %8646 = vst [vmem:[#allocation20_spill] sm:$0xff] %v5686_v35  ;;  %8647 = vst [vmem:[#allocation21_spill] sm:$0xff] %v5689_v36  ;;  %v473_v54 = vor.u32 8388608, %v472_v26  ;;  %v577_v20 = vor.u32 8388608, %v576_v27  ;;  %v8599_v31 = vand.u32 2147483647, %v5695_v40 }
  0x6f   : > { %8648 = vst [vmem:[#allocation22_spill] sm:$0xff] %v5692_v21  ;;  %8649 = vst [vmem:[#allocation23_spill] sm:$0xff] %v5698_v22  ;;  %v4654_v29 = vadd.s32 4294967169, %v573_v49  ;;  %v677_v4 = vshrl.u32 %v676_v50, 23  ;;  %v475_v30 = vadd.s32 1, %v4650_v28  ;;  %v5716_v32 = vadd.f32 %v5578_v52, %v383_v53 }
  0x70   : > { %8650 = vst [vmem:[#allocation24_spill] sm:$0xff] %v5701_v43  ;;  %v5718_v44 = vshll.u32 %v473_v54, 8  ;;  %v5720_v25 = vshll.u32 %v577_v20, 8  ;;  %v5724_v46 = vand.u32 8388607, %v8599_v31  ;;  %vm467_vm12 = vcmp.lt.s32.totalorder %v5590_v1, 0 }
  0x71   : > { %v579_v57 = vadd.s32 1, %v4654_v29  ;;  %v4658_v58 = vadd.s32 4294967169, %v677_v4  ;;  %vm476_vm0 = vcmp.gt.s32.totalorder %v475_v30, 0  ;;  %v8621_v27 = vmov 683565275  }
  0x72   : > { %v477_v61 = vsel %vm476_vm0, %v475_v30, 0  ;;  %v8608_v50 = vmov 2475754826   ;;  %v8610_v53 = vmov 2131351028  }
  0x73   : > { %vm580_vm1 = vcmp.gt.s32.totalorder %v579_v57, 0  ;;  %v478_v62 = vshrl.u32 %v477_v61, 5  ;;  %v479_v33 = vand.u32 31, %v477_v61  ;;  %v5726_v26 = vadd.s32 1, %v4658_v58 }
  0x74   : > { %v581_v11 = vsel %vm580_vm1, %v579_v57, 0  ;;  %v8613_v4 = vmov 2102212464   ;;  %v8615_v30 = vmov 920167782  }
  0x75   : > { %v583_v45 = vand.u32 31, %v581_v11  ;;  %v480_v49 = vsub.s32 32, %v479_v33  ;;  %v482_v52 = vshll.u32 %v8621_v27, %v479_v33  ;;  %v485_v28 = vshll.u32 %v8608_v50, %v479_v33 }
  0x76   : > { %v488_v29 = vshll.u32 %v8610_v53, %v479_v33  ;;  %v491_v54 = vshll.u32 %v8613_v4, %v479_v33  ;;  %v494_v20 = vshll.u32 %v8615_v30, %v479_v33  ;;  %vm497_vm2 = vcmp.lt.s32.totalorder %v478_v62, 1 }
  0x77   : > { %v5733_v57 = vshrl.u32 %v581_v11, 5  ;;  %v481_v58 = vshrl.u32 %v8621_v27, %v480_v49  ;;  %v483_v61 = vshrl.u32 %v8608_v50, %v480_v49  ;;  %v486_v31 = vshrl.u32 %v8610_v53, %v480_v49 }
  0x78   : > { %v489_v24 = vshrl.u32 %v8613_v4, %v480_v49  ;;  %v492_v23 = vshrl.u32 %v8615_v30, %v480_v49  ;;  %v8618_v43 = vmov 1326507024   ;;  %vm498_vm3 = vcmp.lt.s32.totalorder %v478_v62, 2 }
  0x79   : > { %v495_v22 = vshrl.u32 %v8618_v43, %v480_v49  ;;  %vm500_vm4 = vcmp.lt.s32.totalorder %v478_v62, 4  ;;  %v484_v21 = vor.u32 %v483_v61, %v482_v52  ;;  %v487_v33 = vor.u32 %v486_v31, %v485_v28 }
  0x7a   : > { %v490_v36 = vor.u32 %v489_v24, %v488_v29  ;;  %v584_v11 = vsub.s32 32, %v583_v45  ;;  %v493_v35 = vor.u32 %v492_v23, %v491_v54  ;;  %vm499_vm5 = vcmp.lt.s32.totalorder %v478_v62, 3 }
  0x7b   : > { %v496_v19 = vor.u32 %v495_v22, %v494_v20  ;;  %v586_v50 = vshll.u32 %v8621_v27, %v583_v45  ;;  %v501_v53 = vsel %vm497_vm2, %v481_v58, %v484_v21  ;;  %v505_v4 = vsel %vm497_vm2, %v484_v21, %v487_v33 }
  0x7c   : > { %v502_v17 = vsel %vm500_vm4, %v490_v36, 2102212464  ;;  %v509_v30 = vsel %vm497_vm2, %v487_v33, %v490_v36  ;;  %v506_v49 = vsel %vm500_vm4, %v493_v35, 920167782  ;;  %v8651_v13 = vmov 2475754826  }
  0x7d   : > { %v503_v16 = vsel %vm499_vm5, %v487_v33, %v502_v17  ;;  %v510_v43 = vsel %vm500_vm4, %v496_v19, 1326507024  ;;  %v589_v52 = vshll.u32 %v8651_v13, %v583_v45  ;;  %vm684_vm6 = vcmp.gt.s32.totalorder %v5726_v26, 0 }
  0x7e   : > { %v507_v24 = vsel %vm499_vm5, %v490_v36, %v506_v49  ;;  %v511_v23 = vsel %vm499_vm5, %v493_v35, %v510_v43  ;;  %v585_v22 = vshrl.u32 %v8621_v27, %v584_v11  ;;  %v587_v31 = vshrl.u32 %v8651_v13, %v584_v11 }
  0x7f   : > { %v504_v28 = vsel %vm498_vm3, %v501_v53, %v503_v16  ;;  %v508_v29 = vsel %vm498_vm3, %v505_v4, %v507_v24  ;;  %v512_v21 = vsel %vm498_vm3, %v509_v30, %v511_v23  ;;  %v8652_v54 = vmov 2131351028  }
  0x80   : > { %v590_v17 = vshrl.u32 %v8652_v54, %v584_v11  ;;  %v5754_v19 = vmul.u32.u64.low %v5718_v44, %v512_v21  ;;  %v5755_v20 = vmul.u32.u64.high %v5718_v44, %v512_v21, %v5754_v19  ;;  %v588_v35 = vor.u32 %v587_v31, %v586_v50 }
  0x81   : > { %v5758_v58 = vmul.u32.u64.low %v5718_v44, %v508_v29  ;;  %v5759_v36 = vmul.u32.u64.high %v5718_v44, %v508_v29, %v5758_v58  ;;  %v592_v61 = vshll.u32 %v8652_v54, %v583_v45  ;;  %v8653_v16 = vmov 2102212464  }
  0x82   : > { %v591_v43 = vor.u32 %v590_v17, %v589_v52  ;;  %v593_v53 = vshrl.u32 %v8653_v16, %v584_v11  ;;  %v595_v62 = vshll.u32 %v8653_v16, %v583_v45  ;;  %v8654_v4 = vmov 920167782  }
  0x83   : > { %v596_v30 = vshrl.u32 %v8654_v4, %v584_v11  ;;  %v598_v33 = vshll.u32 %v8654_v4, %v583_v45  ;;  %v8655_v49 = vmov 1326507024   ;;  %v520_v23 = vmul.u32 %v5718_v44, %v504_v28 }
  0x84   : > { %v599_v24 = vshrl.u32 %v8655_v49, %v584_v11  ;;  %v594_v21 = vor.u32 %v593_v53, %v592_v61  ;;  %vm601_vm7 = vcmp.lt.s32.totalorder %v5733_v57, 1  ;;  %vm602_vm8 = vcmp.lt.s32.totalorder %v5733_v57, 2 }
  0x85   : > { %vm522_vm9 = vc.u32 %v5755_v20, %v5758_v58  ;;  %v523_v50 = vadd.s32 1, %v5759_v36  ;;  %v597_v52 = vor.u32 %v596_v30, %v595_v62  ;;  %vm603_vm10 = vcmp.lt.s32.totalorder %v5733_v57, 3 }
  0x86   : > { %v600_v31 = vor.u32 %v599_v24, %v598_v33  ;;  %vm604_vm11 = vcmp.lt.s32.totalorder %v5733_v57, 4  ;;  %v605_v45 = vsel %vm601_vm7, %v585_v22, %v588_v35  ;;  %v609_v11 = vsel %vm601_vm7, %v588_v35, %v591_v43 }
  0x87   : > { %v524_v44 = vsel %vm522_vm9, %v523_v50, %v5759_v36  ;;  %v606_v28 = vsel %vm604_vm11, %v594_v21, 2102212464  ;;  %v610_v29 = vsel %vm604_vm11, %v597_v52, 920167782  ;;  %v613_v17 = vsel %vm601_vm7, %v591_v43, %v594_v21 }
  0x88   : > { %v525_v19 = vadd.s32 %v524_v44, %v520_v23  ;;  %v607_v61 = vsel %vm603_vm10, %v591_v43, %v606_v28  ;;  %v611_v53 = vsel %vm603_vm10, %v594_v21, %v610_v29  ;;  %v614_v27 = vsel %vm604_vm11, %v600_v31, 1326507024 }
  0x89   : > { %v608_v12 = vsel %vm602_vm8, %v605_v45, %v607_v61  ;;  %v612_v62 = vsel %vm602_vm8, %v609_v11, %v611_v53  ;;  %v615_v30 = vsel %vm603_vm10, %v597_v52, %v614_v27  ;;  %v685_v22 = vsel %vm684_vm6, %v5726_v26, 0 }
  0x8a   : > { %v526_v35 = vadd.s32 536870912, %v525_v19  ;;  %v616_v36 = vsel %vm602_vm8, %v613_v17, %v615_v30  ;;  %v5787_v33 = vmul.u32.u64.low %v5720_v25, %v612_v62  ;;  %v5788_v43 = vmul.u32.u64.high %v5720_v25, %v612_v62, %v5787_v33 }
  0x8b   : > { %v5792_v24 = vmul.u32.u64.low %v5720_v25, %v616_v36  ;;  %v5793_v23 = vmul.u32.u64.high %v5720_v25, %v616_v36, %v5792_v24  ;;  %v681_v21 = vor.u32 8388608, %v5724_v46  ;;  %v780_v27 = vand.u32 2139095040, %v5716_v32 }
  0x8c   : > { %v527_v50 = vshrl.u32 %v526_v35, 30  ;;  %v687_v52 = vand.u32 31, %v685_v22  ;;  %v624_v26 = vmul.u32 %v5720_v25, %v608_v12  ;;  %v627_v31 = vadd.s32 1, %v5788_v43 }
  0x8d   : > { %vm626_vm13 = vc.u32 %v5793_v23, %v5787_v33  ;;  %v5802_v11 = vshll.u32 %v681_v21, 8  ;;  %v781_v46 = vshrl.u32 %v780_v27, 23  ;;  %v8656_v28 = vand.u32 2147483647, %v5590_v1 }
  0x8e   : > { %v528_v57 = vshll.u32 %v527_v50, 30  ;;  %v688_v45 = vsub.s32 32, %v687_v52  ;;  %v551_v25 = vsub.s32 4, %v527_v50  ;;  %v628_v17 = vsel %vm626_vm13, %v627_v31, %v5788_v43 }
  0x8f   : > { %vm5807_vm14 = vcmp.le.f32.partialorder %v8656_v28, 0.7853982  ;;  %v686_v61 = vshrl.u32 %v685_v22, 5  ;;  %v629_v53 = vadd.s32 %v628_v17, %v624_v26  ;;  %v8659_v62 = vmov 683565275  }
  0x90   : > { %v5811_v12 = vsub.s32 %v525_v19, %v528_v57  ;;  %v690_v30 = vshll.u32 %v8659_v62, %v687_v52  ;;  %v691_v35 = vshrl.u32 %v8651_v13, %v688_v45  ;;  %v693_v36 = vshll.u32 %v8651_v13, %v687_v52 }
  0x91   : > { %v694_v21 = vshrl.u32 %v8652_v54, %v688_v45  ;;  %v696_v27 = vshll.u32 %v8652_v54, %v687_v52  ;;  %v697_v19 = vshrl.u32 %v8653_v16, %v688_v45  ;;  %v521_v57 = vadd.s32 %v5758_v58, %v5755_v20 }
  0x92   : > { %v531_v24 = vsub.s32 0, %v5811_v12  ;;  %v630_v43 = vadd.s32 536870912, %v629_v53  ;;  %v699_v22 = vshll.u32 %v8653_v16, %v687_v52  ;;  %v4662_v26 = vadd.s32 4294967169, %v781_v46 }
  0x93   : > { %v552_v28 = vsel %vm467_vm12, %v551_v25, %v527_v50  ;;  %v700_v17 = vshrl.u32 %v8654_v4, %v688_v45  ;;  %vm708_vm15 = vcmp.lt.s32.totalorder %v686_v61, 4  ;;  %v689_v9 = vshrl.u32 %v8659_v62, %v688_v45 }
  0x94   : > { %v4651_v31 = vmin.u32 %v531_v24, %v5811_v12  ;;  %v5828_v44 = vshrl.u32 %v630_v43, 30  ;;  %v702_v8 = vshll.u32 %v8654_v4, %v687_v52  ;;  %v703_v20 = vshrl.u32 %v8655_v49, %v688_v45 }
  0x95   : > { %v692_v5 = vor.u32 %v691_v35, %v690_v30  ;;  %v695_v3 = vor.u32 %v694_v21, %v693_v36  ;;  %v698_v46 = vor.u32 %v697_v19, %v696_v27  ;;  %v701_v0 = vor.u32 %v700_v17, %v699_v22 }
  0x96   : > { %v533_v58 = vclz %v4651_v31  ;;  %v632_v24 = vshll.u32 %v5828_v44, 30  ;;  %vm705_vm0 = vcmp.lt.s32.totalorder %v686_v61, 1  ;;  %vm707_vm1 = vcmp.lt.s32.totalorder %v686_v61, 3 }
  0x97   : > { %v704_v25 = vor.u32 %v703_v20, %v702_v8  ;;  %v710_v43 = vsel %vm708_vm15, %v698_v46, 2102212464  ;;  %v787_v63 = vadd.s32 1, %v4662_v26  ;;  %v554_v60 = vsel %vm5807_vm14, 0, %v552_v28 }
  0x98   : > { %v4652_v50 = vadd.s32 4294967294, %v533_v58  ;;  %v5837_v52 = vsub.s32 %v629_v53, %v632_v24  ;;  %vm706_vm2 = vcmp.lt.s32.totalorder %v686_v61, 2  ;;  %v714_v45 = vsel %vm708_vm15, %v701_v0, 920167782 }
  0x99   : > { %v709_v30 = vsel %vm705_vm0, %v689_v9, %v692_v5  ;;  %v713_v35 = vsel %vm705_vm0, %v692_v5, %v695_v3  ;;  %v715_v36 = vsel %vm707_vm1, %v698_v46, %v714_v45  ;;  %v711_v27 = vsel %vm707_vm1, %v695_v3, %v710_v43 }
  0x9a   : > { %vm4653_vm3 = vcmp.lt.s32.totalorder %v4652_v50, 0  ;;  %v635_v8 = vsub.s32 0, %v5837_v52  ;;  %v717_v19 = vsel %vm705_vm0, %v695_v3, %v698_v46  ;;  %v718_v31 = vsel %vm708_vm15, %v704_v25, 1326507024 }
  0x9b   : > { %v536_v21 = vsel %vm4653_vm3, 0, %v4652_v50  ;;  %vm571_vm4 = vcmp.lt.s32.totalorder %v5593_v34, 0  ;;  %v716_v5 = vsel %vm706_vm2, %v713_v35, %v715_v36  ;;  %v719_v28 = vsel %vm707_vm1, %v701_v0, %v718_v31 }
  0x9c   : > { %v537_v22 = vsub.s32 32, %v536_v21  ;;  %v538_v53 = vshll.u32 %v5811_v12, %v536_v21  ;;  %v541_v26 = vsub.s32 4294967266, %v536_v21  ;;  %v4655_v9 = vmin.u32 %v635_v8, %v5837_v52 }
  0x9d   : > { %v720_v58 = vsel %vm706_vm2, %v717_v19, %v719_v28  ;;  %vm788_vm5 = vcmp.gt.s32.totalorder %v787_v63, 0  ;;  %v558_v3 = vadd.s32 3, %v554_v60  ;;  %v712_v12 = vsel %vm706_vm2, %v709_v30, %v711_v27 }
  0x9e   : > { %v539_v17 = vshrl.u32 %v521_v57, %v537_v22  ;;  %v542_v20 = vadd.s32 127, %v541_v26  ;;  %v637_v46 = vclz %v4655_v9  ;;  %v8660_v24 = vand.u32 2147483647, %v5716_v32 }
  0x9f   : > { %v5859_v45 = vmul.u32.u64.low %v5802_v11, %v720_v58  ;;  %v5860_v35 = vmul.u32.u64.high %v5802_v11, %v720_v58, %v5859_v45  ;;  %v5863_v57 = vmul.u32.u64.low %v5802_v11, %v716_v5  ;;  %v5864_v36 = vmul.u32.u64.high %v5802_v11, %v716_v5, %v5863_v57 }
  0xa0   : > { %v5856_v50 = vand.u32 8388607, %v8660_v24  ;;  %v540_v25 = vor.u32 %v539_v17, %v538_v53  ;;  %v543_v43 = vshll.u32 %v542_v20, 23  ;;  %v4656_v0 = vadd.s32 4294967294, %v637_v46 }
  0xa1   : > { %v789_v60 = vsel %vm788_vm5, %v787_v63, 0  ;;  %v655_v30 = vsub.s32 4, %v5828_v44  ;;  %v5868_v27 = vand.u32 3, %v558_v3  ;;  %v625_v19 = vadd.s32 %v5787_v33, %v5793_v23 }
  0xa2   : > { %v544_v21 = vor.u32 4788187, %v543_v43  ;;  %v547_v61 = vcvt.s32.f32 %v540_v25  ;;  %v791_v8 = vand.u32 31, %v789_v60  ;;  %vm4657_vm6 = vcmp.lt.s32.totalorder %v4656_v0, 0 }
  0xa3   : > { %v785_v22 = vor.u32 8388608, %v5856_v50  ;;  %v640_v26 = vsel %vm4657_vm6, 0, %v4656_v0  ;;  %v728_v31 = vmul.u32 %v5802_v11, %v712_v12  ;;  %vm730_vm7 = vc.u32 %v5860_v35, %v5863_v57 }
  0xa4   : > { %v545_v53 = vand.u32 2147483647, %v544_v21  ;;  %v8661_v63 = vand.u32 2147483647, %v5593_v34  ;;  %v641_v5 = vsub.s32 32, %v640_v26  ;;  %v642_v28 = vshll.u32 %v5837_v52, %v640_v26 }
  0xa5   : > { %v645_v33 = vsub.s32 4294967266, %v640_v26  ;;  %v731_v23 = vadd.s32 1, %v5864_v36  ;;  %v656_v11 = vsel %vm571_vm4, %v655_v30, %v5828_v44  ;;  %v5887_v20 = vshrl.u32 %v789_v60, 5 }
  0xa6   : > { %vm5878_vm8 = vcmp.le.f32.partialorder %v8661_v63, 0.7853982  ;;  %v548_v17 = vmul.f32 %v547_v61, %v545_v53  ;;  %v792_v58 = vsub.s32 32, %v791_v8  ;;  %v643_v3 = vshrl.u32 %v625_v19, %v641_v5 }
  0xa7   : > { %v646_v46 = vadd.s32 127, %v645_v33  ;;  %v732_v12 = vsel %vm730_vm7, %v731_v23, %v5864_v36  ;;  %v794_v24 = vshll.u32 %v8659_v62, %v791_v8  ;;  %v797_v43 = vshll.u32 %v8651_v13, %v791_v8 }
  0xa8   : > { %v549_v50 = vxor.u32 2147483648, %v548_v17  ;;  %v733_v25 = vadd.s32 %v732_v12, %v728_v31  ;;  %v795_v52 = vshrl.u32 %v8651_v13, %v792_v58  ;;  %v644_v45 = vor.u32 %v643_v3, %v642_v28 }
  0xa9   : > { %v647_v0 = vshll.u32 %v646_v46, 23  ;;  %v798_v21 = vshrl.u32 %v8652_v54, %v792_v58  ;;  %v800_v44 = vshll.u32 %v8652_v54, %v791_v8  ;;  %v801_v36 = vshrl.u32 %v8653_v16, %v792_v58 }
  0xaa   : > { %v550_v60 = vsel %vm467_vm12, %v549_v50, %v548_v17  ;;  %v734_v61 = vadd.s32 536870912, %v733_v25  ;;  %v803_v30 = vshll.u32 %v8653_v16, %v791_v8  ;;  %v651_v26 = vcvt.s32.f32 %v644_v45 }
  0xab   : > { %v553_v19 = vsel %vm5807_vm14, %v5590_v1, %v550_v60  ;;  %v648_v53 = vor.u32 4788187, %v647_v0  ;;  %v796_v31 = vor.u32 %v795_v52, %v794_v24  ;;  %v799_v5 = vor.u32 %v798_v21, %v797_v43 }
  0xac   : > { %5028 = vcosq.f32 %v553_v19  ;;  %v735_v63 = vshrl.u32 %v734_v61, 30  ;;  %v804_v28 = vshrl.u32 %v8654_v4, %v792_v58  ;;  %v806_v23 = vshll.u32 %v8654_v4, %v791_v8 }
  0xad   : > { %5030 = vsinq.f32 %v553_v19  ;;  %v649_v33 = vand.u32 2147483647, %v648_v53  ;;  %v807_v17 = vshrl.u32 %v8655_v49, %v792_v58  ;;  %v658_v3 = vsel %vm5878_vm8, 0, %v656_v11 }
  0xae   : > { %v736_v46 = vshll.u32 %v735_v63, 30  ;;  %v805_v29 = vor.u32 %v804_v28, %v803_v30  ;;  %vm809_vm9 = vcmp.lt.s32.totalorder %v5887_v20, 1  ;;  %v793_v24 = vshrl.u32 %v8659_v62, %v792_v58 }
  0xaf   : > { %v652_v12 = vmul.f32 %v651_v26, %v649_v33  ;;  %v802_v50 = vor.u32 %v801_v36, %v800_v44  ;;  %v5909_v52 = vshll.u32 %v785_v22, 8  ;;  %vm675_vm10 = vcmp.lt.s32.totalorder %v5695_v40, 0 }
  0xb0   : > { %v5912_v43 = vsub.s32 %v733_v25, %v736_v46  ;;  %v808_v8 = vor.u32 %v807_v17, %v806_v23  ;;  %vm811_vm11 = vcmp.lt.s32.totalorder %v5887_v20, 3  ;;  %vm812_vm12 = vcmp.lt.s32.totalorder %v5887_v20, 4 }
  0xb1   : > { %v653_v11 = vxor.u32 2147483648, %v652_v12  ;;  %vm810_vm13 = vcmp.lt.s32.totalorder %v5887_v20, 2  ;;  %v814_v45 = vsel %vm812_vm12, %v802_v50, 2102212464  ;;  %v817_v58 = vsel %vm809_vm9, %v796_v31, %v799_v5 }
  0xb2   : > { %v662_v22 = vadd.s32 3, %v658_v3  ;;  %v739_v0 = vsub.s32 0, %v5912_v43  ;;  %v759_v25 = vsub.s32 4, %v735_v63  ;;  %v818_v21 = vsel %vm812_vm12, %v805_v29, 920167782 }
  0xb3   : > { %v654_v44 = vsel %vm571_vm4, %v653_v11, %v652_v12  ;;  %v813_v60 = vsel %vm809_vm9, %v793_v24, %v796_v31  ;;  %v815_v61 = vsel %vm811_vm11, %v799_v5, %v814_v45  ;;  %v819_v36 = vsel %vm811_vm11, %v802_v50, %v818_v21 }
  0xb4   : > { %vm557_vm14 = vweird.f32 %v5590_v1  ;;  %v657_v30 = vsel %vm5878_vm8, %v5593_v34, %v654_v44  ;;  %v4659_v19 = vmin.u32 %v739_v0, %v5912_v43  ;;  %v820_v53 = vsel %vm810_vm13, %v817_v58, %v819_v36 }
  0xb5   : > { %v821_v26 = vsel %vm809_vm9, %v799_v5, %v802_v50  ;;  %5032 = vcosq.f32 %v657_v30  ;;  %v822_v31 = vsel %vm812_vm12, %v808_v8, 1326507024  ;;  %vm560_vm15 = vcmp.lt.s32.totalorder %v5868_v27, 2 }
  0xb6   : > { %v5944_v28 = vmul.u32.u64.low %v5909_v52, %v820_v53  ;;  %v5945_v33 = vmul.u32.u64.high %v5909_v52, %v820_v53, %v5944_v28  ;;  %5034 = vsinq.f32 %v657_v30  ;;  %v8664_v9 = vand.u32 2147483647, %v5695_v40 }
  0xb7   : > { %v741_v5 = vclz %v4659_v19  ;;  %vm561_vm1 = vcmp.eq.s32.totalorder %v5868_v27, 0  ;;  %vm564_vm2 = vcmp.eq.s32.totalorder %v5868_v27, 2  ;;  %v5958_v17 = vand.u32 3, %v662_v22 }
  0xb8   : > { %vm5952_vm0 = vcmp.le.f32.partialorder %v8664_v9, 0.7853982  ;;  %v823_v3 = vsel %vm811_vm11, %v805_v29, %v822_v31  ;;  %v816_v12 = vsel %vm810_vm13, %v813_v60, %v815_v61  ;;  %v884_v50 = vand.u32 2139095040, %v5596_v2 }
  0xb9   : > { %v4660_v46 = vadd.s32 4294967294, %v741_v5  ;;  %v824_v24 = vsel %vm810_vm13, %v821_v26, %v823_v3  ;;  %v5029_v8 = vpop.eup %5028  ;;  %v729_v11 = vadd.s32 %v5863_v57, %v5860_v35  ;;  %v760_v45 = vsel %vm675_vm10, %v759_v25, %v735_v63 }
  0xba   : > { %v5976_v29 = vmul.u32.u64.low %v5909_v52, %v824_v24  ;;  %v5977_v58 = vmul.u32.u64.high %v5909_v52, %v824_v24, %v5976_v29  ;;  %v5031_v22 = vpop.eup %5030  ;;  %v565_v0 = vxor.u32 2147483648, %v5029_v8  ;;  %v835_v20 = vadd.s32 1, %v5945_v33 }
  0xbb   : > { %vm4661_vm3 = vcmp.lt.s32.totalorder %v4660_v46, 0  ;;  %v885_v21 = vshrl.u32 %v884_v50, 23  ;;  %v562_v44 = vxor.u32 2147483648, %v5031_v22  ;;  %v832_v61 = vmul.u32 %v5909_v52, %v816_v12 }
  0xbc   : > { %v744_v60 = vsel %vm4661_vm3, 0, %v4660_v46  ;;  %v881_v36 = vand.u32 2147483647, %v5596_v2  ;;  %v566_v35 = vsel %vm564_vm2, %v565_v0, %v5031_v22  ;;  %v762_v19 = vsel %vm5952_vm0, 0, %v760_v45 }
  0xbd   : > { %v745_v57 = vsub.s32 32, %v744_v60  ;;  %v746_v63 = vshll.u32 %v5912_v43, %v744_v60  ;;  %v749_v25 = vsub.s32 4294967266, %v744_v60  ;;  %v563_v30 = vsel %vm561_vm1, %v5029_v8, %v562_v44 }
  0xbe   : > { %vm834_vm4 = vc.u32 %v5977_v58, %v5944_v28  ;;  %v4666_v52 = vadd.s32 4294967169, %v885_v21  ;;  %v567_v53 = vsel %vm560_vm15, %v563_v30, %v566_v35  ;;  %v766_v24 = vadd.s32 3, %v762_v19 }
  0xbf   : > { %v747_v26 = vshrl.u32 %v729_v11, %v745_v57  ;;  %v750_v31 = vadd.s32 127, %v749_v25  ;;  %v836_v9 = vsel %vm834_vm4, %v835_v20, %v5945_v33  ;;  %v568_v43 = vsel %vm557_vm14, nan, %v567_v53 }
  0xc0   : > { %v837_v5 = vadd.s32 %v836_v9, %v832_v61  ;;  %v891_v3 = vadd.s32 1, %v4666_v52  ;;  %4521 = vst [vmem:[%s5997_s17] sm:$0xff] %v568_v43  ;;  %vm661_vm5 = vweird.f32 %v5593_v34  ;;  %vm668_vm6 = vcmp.eq.s32.totalorder %v5958_v17, 2 }
  0xc1   : > { %v748_v46 = vor.u32 %v747_v26, %v746_v63  ;;  %v751_v12 = vshll.u32 %v750_v31, 23  ;;  %v888_v1 = vand.u32 8388607, %v881_v36  ;;  %vm665_vm8 = vcmp.eq.s32.totalorder %v5958_v17, 0 }
  0xc2   : > { %v838_v27 = vadd.s32 536870912, %v837_v5  ;;  %vm892_vm7 = vcmp.gt.s32.totalorder %v891_v3, 0  ;;  %v5033_v50 = vpop.eup %5032  ;;  %vm664_vm9 = vcmp.lt.s32.totalorder %v5958_v17, 2  ;;  %v6008_v44 = vand.u32 3, %v766_v24 }
  0xc3   : > { %v752_v33 = vor.u32 4788187, %v751_v12  ;;  %v755_v8 = vcvt.s32.f32 %v748_v46  ;;  %v893_v11 = vsel %vm892_vm7, %v891_v3, 0  ;;  %v5035_v45 = vpop.eup %5034  ;;  %v669_v29 = vxor.u32 2147483648, %v5033_v50 }
  0xc4   : > { %v6005_v22 = vshrl.u32 %v838_v27, 30  ;;  %v895_v0 = vand.u32 31, %v893_v11  ;;  %v666_v20 = vxor.u32 2147483648, %v5035_v45  ;;  %v988_v57 = vand.u32 2139095040, %v5599_v6 }
  0xc5   : > { %v753_v21 = vand.u32 2147483647, %v752_v33  ;;  %v670_v60 = vsel %vm668_vm6, %v669_v29, %v5035_v45  ;;  %v889_v30 = vor.u32 8388608, %v888_v1  ;;  %v985_v19 = vand.u32 2147483647, %v5599_v6 }
  0xc6   : > { %v840_v61 = vshll.u32 %v6005_v22, 30  ;;  %v896_v35 = vsub.s32 32, %v895_v0  ;;  %v667_v63 = vsel %vm665_vm8, %v5033_v50, %v666_v20  ;;  %v833_v53 = vadd.s32 %v5944_v28, %v5977_v58 }
  0xc7   : > { %v756_v25 = vmul.f32 %v755_v8, %v753_v21  ;;  %v671_v52 = vsel %vm664_vm9, %v667_v63, %v670_v60  ;;  %v898_v17 = vshll.u32 %v8659_v62, %v895_v0  ;;  %v901_v3 = vshll.u32 %v8651_v13, %v895_v0 }
  0xc8   : > { %v6017_v26 = vsub.s32 %v837_v5, %v840_v61  ;;  %v672_v31 = vsel %vm661_vm5, nan, %v671_v52  ;;  %v899_v43 = vshrl.u32 %v8651_v13, %v896_v35  ;;  %v894_v12 = vshrl.u32 %v893_v11, 5 }
  0xc9   : > { %v757_v9 = vxor.u32 2147483648, %v756_v25  ;;  %v902_v24 = vshrl.u32 %v8652_v54, %v896_v35  ;;  %v989_v27 = vshrl.u32 %v988_v57, 23  ;;  %4522 = vst [vmem:[%s5997_s17 + $0x8] sm:$0xff] %v672_v31  ;;  %v904_v58 = vshll.u32 %v8652_v54, %v895_v0 }
  0xca   : > { %v843_v46 = vsub.s32 0, %v6017_v26  ;;  %v905_v34 = vshrl.u32 %v8653_v16, %v896_v35  ;;  %v907_v5 = vshll.u32 %v8653_v16, %v895_v0  ;;  %v900_v8 = vor.u32 %v899_v43, %v898_v17 }
  0xcb   : > { %v758_v28 = vsel %vm675_vm10, %v757_v9, %v756_v25  ;;  %v6036_v1 = vshll.u32 %v889_v30, 8  ;;  %v903_v11 = vor.u32 %v902_v24, %v901_v3  ;;  %v908_v45 = vshrl.u32 %v8654_v4, %v896_v35 }
  0xcc   : > { %v761_v50 = vsel %vm5952_vm0, %v5695_v40, %v758_v28  ;;  %v4663_v33 = vmin.u32 %v843_v46, %v6017_v26  ;;  %v910_v29 = vshll.u32 %v8654_v4, %v895_v0  ;;  %vm779_vm10 = vcmp.lt.s32.totalorder %v5716_v32, 0 }
  0xcd   : > { %5036 = vcosq.f32 %v761_v50  ;;  %v897_v21 = vshrl.u32 %v8659_v62, %v896_v35  ;;  %v4670_v60 = vadd.s32 4294967169, %v989_v27  ;;  %v906_v23 = vor.u32 %v905_v34, %v904_v58 }
  0xce   : > { %5038 = vsinq.f32 %v761_v50  ;;  %v845_v20 = vclz %v4663_v33  ;;  %v909_v61 = vor.u32 %v908_v45, %v907_v5  ;;  %v911_v57 = vshrl.u32 %v8655_v49, %v896_v35 }
  0xcf   : > { %vm913_vm11 = vcmp.lt.s32.totalorder %v894_v12, 1  ;;  %v863_v25 = vsub.s32 4, %v6005_v22  ;;  %vm915_vm12 = vcmp.lt.s32.totalorder %v894_v12, 3  ;;  %vm916_vm13 = vcmp.lt.s32.totalorder %v894_v12, 4 }
  0xd0   : > { %v4664_v63 = vadd.s32 4294967294, %v845_v20  ;;  %v8667_v30 = vand.u32 2147483647, %v5716_v32  ;;  %v912_v52 = vor.u32 %v911_v57, %v910_v29  ;;  %vm914_vm15 = vcmp.lt.s32.totalorder %v894_v12, 2 }
  0xd1   : > { %v918_v17 = vsel %vm916_vm13, %v906_v23, 2102212464  ;;  %v921_v31 = vsel %vm913_vm11, %v900_v8, %v903_v11  ;;  %v917_v35 = vsel %vm913_vm11, %v897_v21, %v900_v8  ;;  %v922_v43 = vsel %vm916_vm13, %v909_v61, 920167782 }
  0xd2   : > { %vm6046_vm14 = vcmp.le.f32.partialorder %v8667_v30, 0.7853982  ;;  %vm4665_vm0 = vcmp.lt.s32.totalorder %v4664_v63, 0  ;;  %v919_v9 = vsel %vm915_vm12, %v903_v11, %v918_v17  ;;  %v923_v46 = vsel %vm915_vm12, %v906_v23, %v922_v43 }
  0xd3   : > { %v848_v3 = vsel %vm4665_vm0, 0, %v4664_v63  ;;  %v925_v24 = vsel %vm913_vm11, %v903_v11, %v906_v23  ;;  %v926_v27 = vsel %vm916_vm13, %v912_v52, 1326507024  ;;  %v924_v5 = vsel %vm914_vm15, %v921_v31, %v923_v46 }
  0xd4   : > { %v849_v28 = vsub.s32 32, %v848_v3  ;;  %v850_v58 = vshll.u32 %v6017_v26, %v848_v3  ;;  %v853_v34 = vsub.s32 4294967266, %v848_v3  ;;  %vm765_vm1 = vweird.f32 %v5695_v40 }
  0xd5   : > { %v920_v50 = vsel %vm914_vm15, %v917_v35, %v919_v9  ;;  %v927_v33 = vsel %vm915_vm12, %v909_v61, %v926_v27  ;;  %v6061_v8 = vmul.u32.u64.low %v6036_v1, %v924_v5  ;;  %v6062_v45 = vmul.u32.u64.high %v6036_v1, %v924_v5, %v6061_v8 }
  0xd6   : > { %v851_v29 = vshrl.u32 %v833_v53, %v849_v28  ;;  %v854_v11 = vadd.s32 127, %v853_v34  ;;  %v928_v20 = vsel %vm914_vm15, %v925_v24, %v927_v33  ;;  %v995_v21 = vadd.s32 1, %v4670_v60 }
  0xd7   : > { %v864_v26 = vsel %vm779_vm10, %v863_v25, %v6005_v22  ;;  %v6070_v23 = vmul.u32.u64.low %v6036_v1, %v928_v20  ;;  %v6071_v57 = vmul.u32.u64.high %v6036_v1, %v928_v20, %v6070_v23  ;;  %v6075_v61 = vand.u32 8388607, %v985_v19 }
  0xd8   : > { %vm768_vm2 = vcmp.lt.s32.totalorder %v6008_v44, 2  ;;  %v852_v63 = vor.u32 %v851_v29, %v850_v58  ;;  %v855_v53 = vshll.u32 %v854_v11, 23  ;;  %vm996_vm3 = vcmp.gt.s32.totalorder %v995_v21, 0 }
  0xd9   : > { %vm772_vm4 = vcmp.eq.s32.totalorder %v6008_v44, 2  ;;  %v936_v12 = vmul.u32 %v6036_v1, %v920_v50  ;;  %v939_v60 = vadd.s32 1, %v6062_v45  ;;  %v997_v22 = vsel %vm996_vm3, %v995_v21, 0 }
  0xda   : > { %v5037_v25 = vpop.eup %5036  ;;  %v856_v30 = vor.u32 4788187, %v855_v53  ;;  %v859_v52 = vcvt.s32.f32 %v852_v63  ;;  %v866_v17 = vsel %vm6046_vm14, 0, %v864_v26  ;;  %v999_v31 = vand.u32 31, %v997_v22 }
  0xdb   : > { %v5039_v35 = vpop.eup %5038  ;;  %vm769_vm5 = vcmp.eq.s32.totalorder %v6008_v44, 0  ;;  %v773_v9 = vxor.u32 2147483648, %v5037_v25  ;;  %vm938_vm6 = vc.u32 %v6071_v57, %v6061_v8  ;;  %v993_v43 = vor.u32 8388608, %v6075_v61 }
  0xdc   : > { %v770_v1 = vxor.u32 2147483648, %v5039_v35  ;;  %v857_v3 = vand.u32 2147483647, %v856_v30  ;;  %v940_v46 = vsel %vm938_vm6, %v939_v60, %v6062_v45  ;;  %v1000_v24 = vsub.s32 32, %v999_v31 }
  0xdd   : > { %v774_v27 = vsel %vm772_vm4, %v773_v9, %v5039_v35  ;;  %v870_v28 = vadd.s32 3, %v866_v17  ;;  %v941_v58 = vadd.s32 %v940_v46, %v936_v12  ;;  %v1002_v34 = vshll.u32 %v8659_v62, %v999_v31 }
  0xde   : > { %v771_v5 = vsel %vm769_vm5, %v5037_v25, %v770_v1  ;;  %v860_v50 = vmul.f32 %v859_v52, %v857_v3  ;;  %v1003_v33 = vshrl.u32 %v8651_v13, %v1000_v24  ;;  %v1005_v29 = vshll.u32 %v8651_v13, %v999_v31 }
  0xdf   : > { %v775_v11 = vsel %vm768_vm2, %v771_v5, %v774_v27  ;;  %v942_v20 = vadd.s32 536870912, %v941_v58  ;;  %v998_v45 = vshrl.u32 %v997_v22, 5  ;;  %v1006_v21 = vshrl.u32 %v8652_v54, %v1000_v24 }
  0xe0   : > { %v776_v26 = vsel %vm765_vm1, nan, %v775_v11  ;;  %v861_v23 = vxor.u32 2147483648, %v860_v50  ;;  %v1008_v61 = vshll.u32 %v8652_v54, %v999_v31  ;;  %v1009_v63 = vshrl.u32 %v8653_v16, %v1000_v24 }
  0xe1   : > { %v943_v53 = vshrl.u32 %v942_v20, 30  ;;  %v1004_v12 = vor.u32 %v1003_v33, %v1002_v34  ;;  %v1011_v60 = vshll.u32 %v8653_v16, %v999_v31  ;;  %v1012_v25 = vshrl.u32 %v8654_v4, %v1000_v24  ;;  %4523 = vst [vmem:[%s5997_s17 + $0x10] sm:$0xff] %v776_v26 }
  0xe2   : > { %v862_v44 = vsel %vm779_vm10, %v861_v23, %v860_v50  ;;  %v1007_v22 = vor.u32 %v1006_v21, %v1005_v29  ;;  %v1014_v30 = vshll.u32 %v8654_v4, %v999_v31  ;;  %v1015_v40 = vshrl.u32 %v8655_v49, %v1000_v24 }
  0xe3   : > { %v865_v52 = vsel %vm6046_vm14, %v5716_v32, %v862_v44  ;;  %v944_v17 = vshll.u32 %v943_v53, 30  ;;  %v1013_v35 = vor.u32 %v1012_v25, %v1011_v60  ;;  %v1092_v9 = vand.u32 2139095040, %v5602_v48 }
  0xe4   : > { %5040 = vcosq.f32 %v865_v52  ;;  %v1010_v1 = vor.u32 %v1009_v63, %v1008_v61  ;;  %v1016_v3 = vor.u32 %v1015_v40, %v1014_v30  ;;  %vm1017_vm7 = vcmp.lt.s32.totalorder %v998_v45, 1 }
  0xe5   : > { %5042 = vsinq.f32 %v865_v52  ;;  %v6111_v46 = vsub.s32 %v941_v58, %v944_v17  ;;  %v1001_v27 = vshrl.u32 %v8659_v62, %v1000_v24  ;;  %vm1019_vm8 = vcmp.lt.s32.totalorder %v998_v45, 3 }
  0xe6   : > { %vm1018_vm9 = vcmp.lt.s32.totalorder %v998_v45, 2  ;;  %vm1020_vm10 = vcmp.lt.s32.totalorder %v998_v45, 4  ;;  %v1025_v31 = vsel %vm1017_vm7, %v1004_v12, %v1007_v22  ;;  %v1033_v0 = vshll.u32 %v993_v43, 8 }
  0xe7   : > { %v871_v34 = vand.u32 3, %v870_v28  ;;  %v947_v5 = vsub.s32 0, %v6111_v46  ;;  %v1022_v50 = vsel %vm1020_vm10, %v1010_v1, 2102212464  ;;  %v1026_v33 = vsel %vm1020_vm10, %v1013_v35, 920167782 }
  0xe8   : > { %v967_v29 = vsub.s32 4, %v943_v53  ;;  %v1027_v11 = vsel %vm1019_vm8, %v1010_v1, %v1026_v33  ;;  %v1030_v20 = vsel %vm1020_vm10, %v1016_v3, 1326507024  ;;  %v1093_v21 = vshrl.u32 %v1092_v9, 23 }
  0xe9   : > { %v4667_v58 = vmin.u32 %v947_v5, %v6111_v46  ;;  %v1021_v24 = vsel %vm1017_vm7, %v1001_v27, %v1004_v12  ;;  %v1028_v26 = vsel %vm1018_vm9, %v1025_v31, %v1027_v11  ;;  %v1029_v23 = vsel %vm1017_vm7, %v1007_v22, %v1010_v1 }
  0xea   : > { %v1023_v43 = vsel %vm1019_vm8, %v1007_v22, %v1022_v50  ;;  %v1031_v28 = vsel %vm1019_vm8, %v1013_v35, %v1030_v20  ;;  %v6123_v61 = vmul.u32.u64.low %v1033_v0, %v1028_v26  ;;  %v6124_v63 = vmul.u32.u64.high %v1033_v0, %v1028_v26, %v6123_v61 }
  0xeb   : > { %v949_v60 = vclz %v4667_v58  ;;  %vm6129_vm11 = vcmp.le.f32.partialorder %v881_v36, 0.7853982  ;;  %vm883_vm12 = vcmp.lt.s32.totalorder %v5596_v2, 0  ;;  %v1032_v12 = vsel %vm1018_vm9, %v1029_v23, %v1031_v28 }
  0xec   : > { %v4674_v44 = vadd.s32 4294967169, %v1093_v21  ;;  %v1024_v22 = vsel %vm1018_vm9, %v1021_v24, %v1023_v43  ;;  %v6136_v40 = vmul.u32.u64.low %v1033_v0, %v1032_v12  ;;  %v6137_v52 = vmul.u32.u64.high %v1033_v0, %v1032_v12, %v6136_v40 }
  0xed   : > { %v4668_v30 = vadd.s32 4294967294, %v949_v60  ;;  %vm872_vm13 = vcmp.lt.s32.totalorder %v871_v34, 2  ;;  %v968_v17 = vsel %vm883_vm12, %v967_v29, %v943_v53  ;;  %v1089_v36 = vand.u32 2147483647, %v5602_v48 }
  0xee   : > { %v1099_v35 = vadd.s32 1, %v4674_v44  ;;  %vm873_vm14 = vcmp.eq.s32.totalorder %v871_v34, 0  ;;  %v937_v9 = vadd.s32 %v6061_v8, %v6071_v57  ;;  %v1043_v1 = vadd.s32 1, %v6124_v63 }
  0xef   : > { %vm4669_vm15 = vcmp.lt.s32.totalorder %v4668_v30, 0  ;;  %vm876_vm0 = vcmp.eq.s32.totalorder %v871_v34, 2  ;;  %v1040_v3 = vmul.u32 %v1033_v0, %v1024_v22  ;;  %v970_v53 = vsel %vm6129_vm11, 0, %v968_v17 }
  0xf0   : > { %v952_v45 = vsel %vm4669_vm15, 0, %v4668_v30  ;;  %vm1100_vm1 = vcmp.gt.s32.totalorder %v1099_v35, 0  ;;  %vm1042_vm2 = vc.u32 %v6137_v52, %v6123_v61  ;;  %v1096_v8 = vand.u32 8388607, %v1089_v36 }
  0xf1   : > { %v5041_v27 = vpop.eup %5040  ;;  %v953_v31 = vsub.s32 32, %v952_v45  ;;  %v954_v5 = vshll.u32 %v6111_v46, %v952_v45  ;;  %v957_v50 = vsub.s32 4294967266, %v952_v45  ;;  %v1101_v57 = vsel %vm1100_vm1, %v1099_v35, 0 }
  0xf2   : > { %v5043_v33 = vpop.eup %5042  ;;  %v877_v29 = vxor.u32 2147483648, %v5041_v27  ;;  %v1044_v21 = vsel %vm1042_vm2, %v1043_v1, %v6124_v63  ;;  %vm869_vm3 = vweird.f32 %v5716_v32  ;;  %v1103_v24 = vand.u32 31, %v1101_v57 }
  0xf3   : > { %v874_v11 = vxor.u32 2147483648, %v5043_v33  ;;  %v955_v0 = vshrl.u32 %v937_v9, %v953_v31  ;;  %v958_v20 = vadd.s32 127, %v957_v50  ;;  %v1045_v58 = vadd.s32 %v1044_v21, %v1040_v3 }
  0xf4   : > { %v878_v46 = vsel %vm876_vm0, %v877_v29, %v5043_v33  ;;  %v6156_v28 = vadd.s32 3, %v970_v53  ;;  %v1104_v44 = vsub.s32 32, %v1103_v24  ;;  %v1193_v30 = vand.u32 2147483647, %v5605_v37 }
  0xf5   : > { %v875_v26 = vsel %vm873_vm14, %v5041_v27, %v874_v11  ;;  %v956_v23 = vor.u32 %v955_v0, %v954_v5  ;;  %v959_v43 = vshll.u32 %v958_v20, 23  ;;  %v1046_v12 = vadd.s32 536870912, %v1045_v58 }
  0xf6   : > { %v879_v60 = vsel %vm872_vm13, %v875_v26, %v878_v46  ;;  %v1097_v40 = vor.u32 8388608, %v1096_v8  ;;  %v1106_v35 = vshll.u32 %v8659_v62, %v1103_v24  ;;  %v1109_v9 = vshll.u32 %v8651_v13, %v1103_v24 }
  0xf7   : > { %v880_v63 = vsel %vm869_vm3, nan, %v879_v60  ;;  %v960_v22 = vor.u32 4788187, %v959_v43  ;;  %v963_v32 = vcvt.s32.f32 %v956_v23  ;;  %v6160_v17 = vshrl.u32 %v1046_v12, 30 }
  0xf8   : > { %v1196_v1 = vand.u32 2139095040, %v5605_v37  ;;  %4524 = vst [vmem:[%s5997_s17 + $0x18] sm:$0xff] %v880_v63  ;;  %v1107_v34 = vshrl.u32 %v8651_v13, %v1104_v44  ;;  %v1110_v3 = vshrl.u32 %v8652_v54, %v1104_v44  ;;  %v1115_v27 = vshll.u32 %v8653_v16, %v1103_v24 }
  0xf9   : > { %v961_v45 = vand.u32 2147483647, %v960_v22  ;;  %v1048_v31 = vshll.u32 %v6160_v17, 30  ;;  %v1102_v5 = vshrl.u32 %v1101_v57, 5  ;;  %v1112_v50 = vshll.u32 %v8652_v54, %v1103_v24 }
  0xfa   : > { %v1113_v53 = vshrl.u32 %v8653_v16, %v1104_v44  ;;  %v1116_v29 = vshrl.u32 %v8654_v4, %v1104_v44  ;;  %v1118_v8 = vshll.u32 %v8654_v4, %v1103_v24  ;;  %v6174_v11 = vshll.u32 %v1097_v40, 8 }
  0xfb   : > { %v964_v33 = vmul.f32 %v963_v32, %v961_v45  ;;  %v6176_v0 = vsub.s32 %v1045_v58, %v1048_v31  ;;  %v1105_v20 = vshrl.u32 %v8659_v62, %v1104_v44  ;;  %v1119_v21 = vshrl.u32 %v8655_v49, %v1104_v44 }
  0xfc   : > { %v1197_v46 = vshrl.u32 %v1196_v1, 23  ;;  %v1108_v57 = vor.u32 %v1107_v34, %v1106_v35  ;;  %v1111_v23 = vor.u32 %v1110_v3, %v1109_v9  ;;  %v1117_v43 = vor.u32 %v1116_v29, %v1115_v27 }
  0xfd   : > { %v965_v26 = vxor.u32 2147483648, %v964_v33  ;;  %v1051_v60 = vsub.s32 0, %v6176_v0  ;;  %v1114_v12 = vor.u32 %v1113_v53, %v1112_v50  ;;  %vm1121_vm4 = vcmp.lt.s32.totalorder %v1102_v5, 1 }
  0xfe   : > { %vm1122_vm5 = vcmp.lt.s32.totalorder %v1102_v5, 2  ;;  %v1120_v63 = vor.u32 %v1119_v21, %v1118_v8  ;;  %vm1123_vm6 = vcmp.lt.s32.totalorder %v1102_v5, 3  ;;  %vm1124_vm7 = vcmp.lt.s32.totalorder %v1102_v5, 4 }
  0xff   : > { %v966_v24 = vsel %vm883_vm12, %v965_v26, %v964_v33  ;;  %v4671_v44 = vmin.u32 %v1051_v60, %v6176_v0  ;;  %v1125_v22 = vsel %vm1121_vm4, %v1105_v20, %v1108_v57  ;;  %v1126_v32 = vsel %vm1124_vm7, %v1114_v12, 2102212464 }
 0x100   : > { %v969_v58 = vsel %vm6129_vm11, %v5596_v2, %v966_v24  ;;  %v1127_v40 = vsel %vm1123_vm6, %v1111_v23, %v1126_v32  ;;  %v1129_v35 = vsel %vm1121_vm4, %v1108_v57, %v1111_v23  ;;  %v1130_v9 = vsel %vm1124_vm7, %v1117_v43, 920167782 }
 0x101   : > { %5044 = vcosq.f32 %v969_v58  ;;  %v1053_v1 = vclz %v4671_v44  ;;  %v1133_v45 = vsel %vm1121_vm4, %v1111_v23, %v1114_v12  ;;  %v4678_v34 = vadd.s32 4294967169, %v1197_v46 }
 0x102   : > { %5046 = vsinq.f32 %v969_v58  ;;  %v1041_v25 = vadd.s32 %v6123_v61, %v6137_v52  ;;  %v1131_v3 = vsel %vm1123_vm6, %v1114_v12, %v1130_v9  ;;  %v1134_v27 = vsel %vm1124_vm7, %v1120_v63, 1326507024 }
 0x103   : > { %v1200_v31 = vand.u32 8388607, %v1193_v30  ;;  %v4672_v50 = vadd.s32 4294967294, %v1053_v1  ;;  %v1128_v53 = vsel %vm1122_vm5, %v1125_v22, %v1127_v40  ;;  %v1132_v33 = vsel %vm1122_vm5, %v1129_v35, %v1131_v3 }
 0x104   : > { %v1135_v29 = vsel %vm1123_vm6, %v1117_v43, %v1134_v27  ;;  %v1071_v8 = vsub.s32 4, %v6160_v17  ;;  %v6202_v21 = vmul.u32.u64.low %v6174_v11, %v1132_v33  ;;  %v6203_v61 = vmul.u32.u64.high %v6174_v11, %v1132_v33, %v6202_v21 }
 0x105   : > { %v1136_v20 = vsel %vm1122_vm5, %v1133_v45, %v1135_v29  ;;  %vm4673_vm8 = vcmp.lt.s32.totalorder %v4672_v50, 0  ;;  %v1203_v26 = vadd.s32 1, %v4678_v34  ;;  %v975_v57 = vand.u32 3, %v6156_v28 }
 0x106   : > { %v6207_v52 = vmul.u32.u64.low %v6174_v11, %v1136_v20  ;;  %v6208_v46 = vmul.u32.u64.high %v6174_v11, %v1136_v20, %v6207_v52  ;;  %vm987_vm9 = vcmp.lt.s32.totalorder %v5599_v6, 0  ;;  %v1056_v23 = vsel %vm4673_vm8, 0, %v4672_v50 }
 0x107   : > { %v1144_v43 = vmul.u32 %v6174_v11, %v1128_v53  ;;  %v1057_v5 = vsub.s32 32, %v1056_v23  ;;  %v1058_v60 = vshll.u32 %v6176_v0, %v1056_v23  ;;  %v1061_v12 = vsub.s32 4294967266, %v1056_v23 }
 0x108   : > { %vm1204_vm10 = vcmp.gt.s32.totalorder %v1203_v26, 0  ;;  %vm973_vm11 = vweird.f32 %v5596_v2  ;;  %vm6217_vm12 = vcmp.le.f32.partialorder %v985_v19, 0.7853982  ;;  %v1147_v28 = vadd.s32 1, %v6203_v61 }
 0x109   : > { %v1201_v63 = vor.u32 8388608, %v1200_v31  ;;  %v1205_v58 = vsel %vm1204_vm10, %v1203_v26, 0  ;;  %v1059_v44 = vshrl.u32 %v1041_v25, %v1057_v5  ;;  %v1062_v22 = vadd.s32 127, %v1061_v12 }
 0x10a   : > { %v6225_v11 = vsel %vm987_vm9, %v1071_v8, %v6160_v17  ;;  %vm1146_vm13 = vc.u32 %v6208_v46, %v6202_v21  ;;  %vm976_vm14 = vcmp.lt.s32.totalorder %v975_v57, 2  ;;  %vm977_vm15 = vcmp.eq.s32.totalorder %v975_v57, 0 }
 0x10b   : > { %v1148_v19 = vsel %vm1146_vm13, %v1147_v28, %v6203_v61  ;;  %v1207_v0 = vand.u32 31, %v1205_v58  ;;  %vm980_vm0 = vcmp.eq.s32.totalorder %v975_v57, 2  ;;  %v1060_v32 = vor.u32 %v1059_v44, %v1058_v60 }
 0x10c   : > { %v1063_v40 = vshll.u32 %v1062_v22, 23  ;;  %v1149_v35 = vadd.s32 %v1148_v19, %v1144_v43  ;;  %v1074_v9 = vsel %vm6217_vm12, 0, %v6225_v11  ;;  %v6233_v45 = vshll.u32 %v1201_v63, 8 }
 0x10d   : > { %v1208_v1 = vsub.s32 32, %v1207_v0  ;;  %v1300_v17 = vand.u32 2139095040, %v5608_v38  ;;  %v1067_v3 = vcvt.s32.f32 %v1060_v32  ;;  %v1210_v31 = vshll.u32 %v8659_v62, %v1207_v0 }
 0x10e   : > { %v5045_v34 = vpop.eup %5044  ;;  %v1064_v25 = vor.u32 4788187, %v1063_v40  ;;  %v1150_v27 = vadd.s32 536870912, %v1149_v35  ;;  %v1213_v33 = vshll.u32 %v8651_v13, %v1207_v0  ;;  %v1216_v29 = vshll.u32 %v8652_v54, %v1207_v0 }
 0x10f   : > { %v5047_v50 = vpop.eup %5046  ;;  %v981_v53 = vxor.u32 2147483648, %v5045_v34  ;;  %v1219_v8 = vshll.u32 %v8653_v16, %v1207_v0  ;;  %v1211_v26 = vshrl.u32 %v8651_v13, %v1208_v1  ;;  %v1214_v43 = vshrl.u32 %v8652_v54, %v1208_v1 }
 0x110   : > { %v978_v20 = vxor.u32 2147483648, %v5047_v50  ;;  %v1065_v61 = vand.u32 2147483647, %v1064_v25  ;;  %v1151_v52 = vshrl.u32 %v1150_v27, 30  ;;  %v1217_v5 = vshrl.u32 %v8653_v16, %v1208_v1 }
 0x111   : > { %v982_v23 = vsel %vm980_vm0, %v981_v53, %v5047_v50  ;;  %v1220_v60 = vshrl.u32 %v8654_v4, %v1208_v1  ;;  %v1206_v44 = vshrl.u32 %v1205_v58, 5  ;;  %v1209_v11 = vshrl.u32 %v8659_v62, %v1208_v1 }
 0x112   : > { %v979_v12 = vsel %vm977_vm15, %v5045_v34, %v978_v20  ;;  %v1068_v28 = vmul.f32 %v1067_v3, %v1065_v61  ;;  %v1152_v63 = vshll.u32 %v1151_v52, 30  ;;  %v1222_v19 = vshll.u32 %v8654_v4, %v1207_v0 }
 0x113   : > { %v983_v22 = vsel %vm976_vm14, %v979_v12, %v982_v23  ;;  %v1301_v32 = vshrl.u32 %v1300_v17, 23  ;;  %v1212_v50 = vor.u32 %v1211_v26, %v1210_v31  ;;  %v1215_v53 = vor.u32 %v1214_v43, %v1213_v33 }
 0x114   : > { %v984_v40 = vsel %vm973_vm11, nan, %v983_v22  ;;  %v1069_v25 = vxor.u32 2147483648, %v1068_v28  ;;  %v6251_v27 = vsub.s32 %v1149_v35, %v1152_v63  ;;  %v1218_v34 = vor.u32 %v1217_v5, %v1216_v29 }
 0x115   : > { %v1221_v20 = vor.u32 %v1220_v60, %v1219_v8  ;;  %v1223_v3 = vshrl.u32 %v8655_v49, %v1208_v1  ;;  %4525 = vst [vmem:[%s5997_s17 + $0x20] sm:$0xff] %v984_v40  ;;  %vm1225_vm1 = vcmp.lt.s32.totalorder %v1206_v44, 1  ;;  %vm1226_vm2 = vcmp.lt.s32.totalorder %v1206_v44, 2 }
 0x116   : > { %v1070_v57 = vsel %vm987_vm9, %v1069_v25, %v1068_v28  ;;  %v1155_v58 = vsub.s32 0, %v6251_v27  ;;  %vm1227_vm3 = vcmp.lt.s32.totalorder %v1206_v44, 3  ;;  %vm1228_vm4 = vcmp.lt.s32.totalorder %v1206_v44, 4 }
 0x117   : > { %v1073_v2 = vsel %vm6217_vm12, %v5599_v6, %v1070_v57  ;;  %v1224_v0 = vor.u32 %v1223_v3, %v1222_v19  ;;  %v1229_v1 = vsel %vm1225_vm1, %v1209_v11, %v1212_v50  ;;  %v1230_v17 = vsel %vm1228_vm4, %v1218_v34, 2102212464 }
 0x118   : > { %5048 = vcosq.f32 %v1073_v2  ;;  %v4675_v35 = vmin.u32 %v1155_v58, %v6251_v27  ;;  %v1231_v31 = vsel %vm1227_vm3, %v1215_v53, %v1230_v17  ;;  %v1233_v33 = vsel %vm1225_vm1, %v1212_v50, %v1215_v53 }
 0x119   : > { %5050 = vsinq.f32 %v1073_v2  ;;  %v1234_v29 = vsel %vm1228_vm4, %v1221_v20, 920167782  ;;  %v1078_v8 = vadd.s32 3, %v1074_v9  ;;  %vm1091_vm5 = vcmp.lt.s32.totalorder %v5602_v48, 0 }
 0x11a   : > { %v1157_v24 = vclz %v4675_v35  ;;  %v1297_v61 = vand.u32 2147483647, %v5608_v38  ;;  %v1175_v26 = vsub.s32 4, %v1151_v52  ;;  %v1235_v23 = vsel %vm1227_vm3, %v1218_v34, %v1234_v29 }
 0x11b   : > { %v1237_v43 = vsel %vm1225_vm1, %v1215_v53, %v1218_v34  ;;  %v1238_v5 = vsel %vm1228_vm4, %v1224_v0, 1326507024  ;;  %v1232_v12 = vsel %vm1226_vm2, %v1229_v1, %v1231_v31  ;;  %v1236_v28 = vsel %vm1226_vm2, %v1233_v33, %v1235_v23 }
 0x11c   : > { %v4676_v60 = vadd.s32 4294967294, %v1157_v24  ;;  %v1239_v63 = vsel %vm1227_vm3, %v1221_v20, %v1238_v5  ;;  %v6277_v22 = vmul.u32.u64.low %v6233_v45, %v1236_v28  ;;  %v6278_v11 = vmul.u32.u64.high %v6233_v45, %v1236_v28, %v6277_v22 }
 0x11d   : > { %v1240_v9 = vsel %vm1226_vm2, %v1237_v43, %v1239_v63  ;;  %v4682_v19 = vadd.s32 4294967169, %v1301_v32  ;;  %v1145_v40 = vadd.s32 %v6202_v21, %v6208_v46  ;;  %v1176_v34 = vsel %vm1091_vm5, %v1175_v26, %v1151_v52 }
 0x11e   : > { %vm4677_vm6 = vcmp.lt.s32.totalorder %v4676_v60, 0  ;;  %v6283_v25 = vmul.u32.u64.low %v6233_v45, %v1240_v9  ;;  %v6284_v50 = vmul.u32.u64.high %v6233_v45, %v1240_v9, %v6283_v25  ;;  %v1304_v44 = vand.u32 8388607, %v1297_v61 }
 0x11f   : > { %v1160_v53 = vsel %vm4677_vm6, 0, %v4676_v60  ;;  %v1307_v20 = vadd.s32 1, %v4682_v19  ;;  %v1248_v58 = vmul.u32 %v6233_v45, %v1232_v12  ;;  %v1079_v21 = vand.u32 3, %v1078_v8 }
 0x120   : > { %v1161_v3 = vsub.s32 32, %v1160_v53  ;;  %v1162_v57 = vshll.u32 %v6251_v27, %v1160_v53  ;;  %v1165_v32 = vsub.s32 4294967266, %v1160_v53  ;;  %v1251_v46 = vadd.s32 1, %v6278_v11 }
 0x121   : > { %vm1308_vm7 = vcmp.gt.s32.totalorder %v1307_v20, 0  ;;  %vm6295_vm8 = vcmp.le.f32.partialorder %v1089_v36, 0.7853982  ;;  %vm1250_vm9 = vc.u32 %v6284_v50, %v6277_v22  ;;  %vm1077_vm10 = vweird.f32 %v5599_v6 }
 0x122   : > { %v1163_v52 = vshrl.u32 %v1145_v40, %v1161_v3  ;;  %v1166_v0 = vadd.s32 127, %v1165_v32  ;;  %v1178_v27 = vsel %vm6295_vm8, 0, %v1176_v34  ;;  %v1252_v45 = vsel %vm1250_vm9, %v1251_v46, %v6278_v11 }
 0x123   : > { %v1309_v35 = vsel %vm1308_vm7, %v1307_v20, 0  ;;  %v1253_v31 = vadd.s32 %v1252_v45, %v1248_v58  ;;  %v1305_v33 = vor.u32 8388608, %v1304_v44  ;;  %vm1080_vm11 = vcmp.lt.s32.totalorder %v1079_v21, 2 }
 0x124   : > { %v1164_v1 = vor.u32 %v1163_v52, %v1162_v57  ;;  %v1167_v17 = vshll.u32 %v1166_v0, 23  ;;  %vm1081_vm12 = vcmp.eq.s32.totalorder %v1079_v21, 0  ;;  %vm1084_vm13 = vcmp.eq.s32.totalorder %v1079_v21, 2 }
 0x125   : > { %v5049_v36 = vpop.eup %5048  ;;  %v1311_v29 = vand.u32 31, %v1309_v35  ;;  %v1254_v43 = vadd.s32 536870912, %v1253_v31  ;;  %v6304_v60 = vadd.s32 3, %v1178_v27  ;;  %v1401_v28 = vand.u32 2147483647, %v5611_v7 }
 0x126   : > { %v5051_v8 = vpop.eup %5050  ;;  %v1085_v24 = vxor.u32 2147483648, %v5049_v36  ;;  %v1168_v26 = vor.u32 4788187, %v1167_v17  ;;  %v1171_v23 = vcvt.s32.f32 %v1164_v1  ;;  %v6309_v19 = vshll.u32 %v1305_v33, 8 }
 0x127   : > { %v1082_v5 = vxor.u32 2147483648, %v5051_v8  ;;  %v1312_v12 = vsub.s32 32, %v1311_v29  ;;  %v6307_v11 = vshrl.u32 %v1254_v43, 30  ;;  %v6313_v25 = vadd.s32 %v6277_v22, %v6284_v50 }
 0x128   : > { %v1086_v63 = vsel %vm1084_vm13, %v1085_v24, %v5051_v8  ;;  %v1169_v9 = vand.u32 2147483647, %v1168_v26  ;;  %v1314_v53 = vshll.u32 %v8659_v62, %v1311_v29  ;;  %v1317_v34 = vshll.u32 %v8651_v13, %v1311_v29 }
 0x129   : > { %v1083_v40 = vsel %vm1081_vm12, %v5049_v36, %v1082_v5  ;;  %v1256_v3 = vshll.u32 %v6307_v11, 30  ;;  %v1315_v57 = vshrl.u32 %v8651_v13, %v1312_v12  ;;  %v1318_v58 = vshrl.u32 %v8652_v54, %v1312_v12 }
 0x12a   : > { %v1087_v44 = vsel %vm1080_vm11, %v1083_v40, %v1086_v63  ;;  %v1172_v20 = vmul.f32 %v1171_v23, %v1169_v9  ;;  %v1320_v46 = vshll.u32 %v8652_v54, %v1311_v29  ;;  %v1321_v22 = vshrl.u32 %v8653_v16, %v1312_v12 }
 0x12b   : > { %v1088_v32 = vsel %vm1077_vm10, nan, %v1087_v44  ;;  %v6325_v52 = vsub.s32 %v1253_v31, %v1256_v3  ;;  %v1310_v0 = vshrl.u32 %v1309_v35, 5  ;;  %v1323_v21 = vshll.u32 %v8653_v16, %v1311_v29 }
 0x12c   : > { %v1173_v50 = vxor.u32 2147483648, %v1172_v20  ;;  %4526 = vst [vmem:[%s5997_s17 + $0x28] sm:$0xff] %v1088_v32  ;;  %v1313_v27 = vshrl.u32 %v8659_v62, %v1312_v12  ;;  %v1324_v45 = vshrl.u32 %v8654_v4, %v1312_v12  ;;  %v1326_v6 = vshll.u32 %v8654_v4, %v1311_v29 }
 0x12d   : > { %v1404_v1 = vand.u32 2139095040, %v5611_v7  ;;  %v1259_v33 = vsub.s32 0, %v6325_v52  ;;  %v1316_v36 = vor.u32 %v1315_v57, %v1314_v53  ;;  %v1327_v31 = vshrl.u32 %v8655_v49, %v1312_v12 }
 0x12e   : > { %v1174_v17 = vsel %vm1091_vm5, %v1173_v50, %v1172_v20  ;;  %v1319_v8 = vor.u32 %v1318_v58, %v1317_v34  ;;  %v1322_v24 = vor.u32 %v1321_v22, %v1320_v46  ;;  %v1325_v26 = vor.u32 %v1324_v45, %v1323_v21 }
 0x12f   : > { %v1177_v35 = vsel %vm6295_vm8, %v5602_v48, %v1174_v17  ;;  %v4679_v29 = vmin.u32 %v1259_v33, %v6325_v52  ;;  %v1328_v23 = vor.u32 %v1327_v31, %v1326_v6  ;;  %vm1329_vm14 = vcmp.lt.s32.totalorder %v1310_v0, 1 }
 0x130   : > { %5052 = vcosq.f32 %v1177_v35  ;;  %vm1331_vm15 = vcmp.lt.s32.totalorder %v1310_v0, 3  ;;  %vm1332_vm0 = vcmp.lt.s32.totalorder %v1310_v0, 4  ;;  %v1405_v43 = vshrl.u32 %v1404_v1, 23 }
 0x131   : > { %5054 = vsinq.f32 %v1177_v35  ;;  %v1261_v5 = vclz %v4679_v29  ;;  %vm1330_vm1 = vcmp.lt.s32.totalorder %v1310_v0, 2  ;;  %v1333_v63 = vsel %vm1329_vm14, %v1313_v27, %v1316_v36 }
 0x132   : > { %v1408_v12 = vand.u32 8388607, %v1401_v28  ;;  %v1334_v2 = vsel %vm1332_vm0, %v1322_v24, 2102212464  ;;  %v1337_v9 = vsel %vm1329_vm14, %v1316_v36, %v1319_v8  ;;  %v1338_v40 = vsel %vm1332_vm0, %v1325_v26, 920167782 }
 0x133   : > { %v1341_v53 = vsel %vm1329_vm14, %v1319_v8, %v1322_v24  ;;  %v4680_v34 = vadd.s32 4294967294, %v1261_v5  ;;  %v1335_v44 = vsel %vm1331_vm15, %v1319_v8, %v1334_v2  ;;  %v1339_v20 = vsel %vm1331_vm15, %v1322_v24, %v1338_v40 }
 0x134   : > { %v1342_v3 = vsel %vm1332_vm0, %v1328_v23, 1326507024  ;;  %v1336_v57 = vsel %vm1330_vm1, %v1333_v63, %v1335_v44  ;;  %v1340_v32 = vsel %vm1330_vm1, %v1337_v9, %v1339_v20  ;;  %v4686_v46 = vadd.s32 4294967169, %v1405_v43 }
 0x135   : > { %v1343_v58 = vsel %vm1331_vm15, %v1325_v26, %v1342_v3  ;;  %vm4681_vm2 = vcmp.lt.s32.totalorder %v4680_v34, 0  ;;  %v6350_v50 = vmul.u32.u64.low %v6309_v19, %v1340_v32  ;;  %v6351_v21 = vmul.u32.u64.high %v6309_v19, %v1340_v32, %v6350_v50 }
 0x136   : > { %v1344_v22 = vsel %vm1330_vm1, %v1341_v53, %v1343_v58  ;;  %v1264_v27 = vsel %vm4681_vm2, 0, %v4680_v34  ;;  %v1279_v45 = vsub.s32 4, %v6307_v11  ;;  %v1411_v31 = vadd.s32 1, %v4686_v46 }
 0x137   : > { %v6356_v6 = vmul.u32.u64.low %v6309_v19, %v1344_v22  ;;  %v6357_v1 = vmul.u32.u64.high %v6309_v19, %v1344_v22, %v6356_v6  ;;  %v1265_v17 = vsub.s32 32, %v1264_v27  ;;  %v1266_v33 = vshll.u32 %v6325_v52, %v1264_v27 }
 0x138   : > { %v1269_v36 = vsub.s32 4294967266, %v1264_v27  ;;  %vm1181_vm3 = vweird.f32 %v5602_v48  ;;  %v1183_v0 = vand.u32 3, %v6304_v60  ;;  %vm1195_vm4 = vcmp.lt.s32.totalorder %v5605_v37, 0 }
 0x139   : > { %v1352_v35 = vmul.u32 %v6309_v19, %v1336_v57  ;;  %v1267_v8 = vshrl.u32 %v6313_v25, %v1265_v17  ;;  %v1355_v26 = vadd.s32 1, %v6351_v21  ;;  %vm1412_vm5 = vcmp.gt.s32.totalorder %v1411_v31, 0 }
 0x13a   : > { %v1270_v24 = vadd.s32 127, %v1269_v36  ;;  %vm6368_vm6 = vcmp.le.f32.partialorder %v1193_v30, 0.7853982  ;;  %vm1354_vm7 = vc.u32 %v6357_v1, %v6350_v50  ;;  %v1409_v60 = vor.u32 8388608, %v1408_v12 }
 0x13b   : > { %v1413_v29 = vsel %vm1412_vm5, %v1411_v31, 0  ;;  %v1268_v23 = vor.u32 %v1267_v8, %v1266_v33  ;;  %v6377_v19 = vsel %vm1195_vm4, %v1279_v45, %v6307_v11  ;;  %v1356_v25 = vsel %vm1354_vm7, %v1355_v26, %v6351_v21 }
 0x13c   : > { %v1271_v43 = vshll.u32 %v1270_v24, 23  ;;  %vm1184_vm8 = vcmp.lt.s32.totalorder %v1183_v0, 2  ;;  %vm1188_vm9 = vcmp.eq.s32.totalorder %v1183_v0, 2  ;;  %v1357_v30 = vadd.s32 %v1356_v25, %v1352_v35 }
 0x13d   : > { %v5053_v5 = vpop.eup %5052  ;;  %v1415_v63 = vand.u32 31, %v1413_v29  ;;  %vm1185_vm10 = vcmp.eq.s32.totalorder %v1183_v0, 0  ;;  %v1275_v12 = vcvt.s32.f32 %v1268_v23  ;;  %v1282_v34 = vsel %vm6368_vm6, 0, %v6377_v19 }
 0x13e   : > { %v5055_v2 = vpop.eup %5054  ;;  %v1189_v9 = vxor.u32 2147483648, %v5053_v5  ;;  %v1272_v40 = vor.u32 4788187, %v1271_v43  ;;  %v1358_v44 = vadd.s32 536870912, %v1357_v30  ;;  %v1414_v57 = vshrl.u32 %v1413_v29, 5 }
 0x13f   : > { %v1186_v53 = vxor.u32 2147483648, %v5055_v2  ;;  %v1416_v11 = vsub.s32 32, %v1415_v63  ;;  %v6383_v32 = vshll.u32 %v1409_v60, 8  ;;  %v1418_v22 = vshll.u32 %v8659_v62, %v1415_v63 }
 0x140   : > { %v1190_v20 = vsel %vm1188_vm9, %v1189_v9, %v5055_v2  ;;  %v1273_v3 = vand.u32 2147483647, %v1272_v40  ;;  %v1359_v46 = vshrl.u32 %v1358_v44, 30  ;;  %v1421_v21 = vshll.u32 %v8651_v13, %v1415_v63 }
 0x141   : > { %v1187_v58 = vsel %vm1185_vm10, %v5053_v5, %v1186_v53  ;;  %v1419_v6 = vshrl.u32 %v8651_v13, %v1416_v11  ;;  %v1422_v17 = vshrl.u32 %v8652_v54, %v1416_v11  ;;  %v1424_v31 = vshll.u32 %v8652_v54, %v1415_v63 }
 0x142   : > { %v1191_v27 = vsel %vm1184_vm8, %v1187_v58, %v1190_v20  ;;  %v1276_v45 = vmul.f32 %v1275_v12, %v1273_v3  ;;  %v1360_v36 = vshll.u32 %v1359_v46, 30  ;;  %v1425_v35 = vshrl.u32 %v8653_v16, %v1416_v11 }
 0x143   : > { %v1192_v33 = vsel %vm1181_vm3, nan, %v1191_v27  ;;  %vm1299_vm11 = vcmp.lt.s32.totalorder %v5608_v38, 0  ;;  %v1427_v24 = vshll.u32 %v8653_v16, %v1415_v63  ;;  %vm1433_vm12 = vcmp.lt.s32.totalorder %v1414_v57, 1 }
 0x144   : > { %v1277_v8 = vxor.u32 2147483648, %v1276_v45  ;;  %v1508_v0 = vand.u32 2139095040, %v5614_v39  ;;  %4527 = vst [vmem:[%s5997_s17 + $0x30] sm:$0xff] %v1192_v33  ;;  %v6398_v26 = vsub.s32 %v1357_v30, %v1360_v36  ;;  %v1417_v60 = vshrl.u32 %v8659_v62, %v1416_v11 }
 0x145   : > { %v1428_v48 = vshrl.u32 %v8654_v4, %v1416_v11  ;;  %v1430_v29 = vshll.u32 %v8654_v4, %v1415_v63  ;;  %v1420_v43 = vor.u32 %v1419_v6, %v1418_v22  ;;  %v1423_v19 = vor.u32 %v1422_v17, %v1421_v21 }
 0x146   : > { %v1278_v23 = vsel %vm1195_vm4, %v1277_v8, %v1276_v45  ;;  %v1431_v25 = vshrl.u32 %v8655_v49, %v1416_v11  ;;  %vm6411_vm13 = vcmp.le.f32.partialorder %v1297_v61, 0.7853982  ;;  %v1363_v2 = vsub.s32 0, %v6398_v26 }
 0x147   : > { %v1281_v5 = vsel %vm6368_vm6, %v5605_v37, %v1278_v23  ;;  %v1426_v63 = vor.u32 %v1425_v35, %v1424_v31  ;;  %v1429_v9 = vor.u32 %v1428_v48, %v1427_v24  ;;  %vm1436_vm14 = vcmp.lt.s32.totalorder %v1414_v57, 4 }
 0x148   : > { %5056 = vcosq.f32 %v1281_v5  ;;  %v1432_v40 = vor.u32 %v1431_v25, %v1430_v29  ;;  %v1509_v12 = vshrl.u32 %v1508_v0, 23  ;;  %v4683_v53 = vmin.u32 %v1363_v2, %v6398_v26 }
 0x149   : > { %5058 = vsinq.f32 %v1281_v5  ;;  %v1383_v44 = vsub.s32 4, %v1359_v46  ;;  %vm1435_vm15 = vcmp.lt.s32.totalorder %v1414_v57, 3  ;;  %vm1434_vm0 = vcmp.lt.s32.totalorder %v1414_v57, 2 }
 0x14a   : > { %v1438_v52 = vsel %vm1436_vm14, %v1426_v63, 2102212464  ;;  %v1441_v61 = vsel %vm1433_vm12, %v1420_v43, %v1423_v19  ;;  %v1442_v11 = vsel %vm1436_vm14, %v1429_v9, 920167782  ;;  %v1286_v20 = vadd.s32 3, %v1282_v34 }
 0x14b   : > { %v1365_v3 = vclz %v4683_v53  ;;  %v1437_v58 = vsel %vm1433_vm12, %v1417_v60, %v1420_v43  ;;  %v1445_v22 = vsel %vm1433_vm12, %v1423_v19, %v1426_v63  ;;  %v1439_v21 = vsel %vm1435_vm15, %v1423_v19, %v1438_v52 }
 0x14c   : > { %v1443_v27 = vsel %vm1435_vm15, %v1426_v63, %v1442_v11  ;;  %v1446_v45 = vsel %vm1436_vm14, %v1432_v40, 1326507024  ;;  %v4690_v6 = vadd.s32 4294967169, %v1509_v12  ;;  %v1384_v33 = vsel %vm1299_vm11, %v1383_v44, %v1359_v46 }
 0x14d   : > { %v4684_v17 = vadd.s32 4294967294, %v1365_v3  ;;  %v1444_v36 = vsel %vm1434_vm0, %v1441_v61, %v1443_v27  ;;  %v1447_v34 = vsel %vm1435_vm15, %v1429_v9, %v1446_v45  ;;  %v1440_v31 = vsel %vm1434_vm0, %v1437_v58, %v1439_v21 }
 0x14e   : > { %v1448_v35 = vsel %vm1434_vm0, %v1445_v22, %v1447_v34  ;;  %v6432_v8 = vmul.u32.u64.low %v6383_v32, %v1444_v36  ;;  %v6433_v24 = vmul.u32.u64.high %v6383_v32, %v1444_v36, %v6432_v8  ;;  %v1353_v0 = vadd.s32 %v6350_v50, %v6357_v1 }
 0x14f   : > { %vm4685_vm1 = vcmp.lt.s32.totalorder %v4684_v17, 0  ;;  %v6439_v60 = vmul.u32.u64.low %v6383_v32, %v1448_v35  ;;  %v6440_v46 = vmul.u32.u64.high %v6383_v32, %v1448_v35, %v6439_v60  ;;  %v1287_v48 = vand.u32 3, %v1286_v20 }
 0x150   : > { %v1368_v29 = vsel %vm4685_vm1, 0, %v4684_v17  ;;  %v1386_v23 = vsel %vm6411_vm13, 0, %v1384_v33  ;;  %v1515_v57 = vadd.s32 1, %v4690_v6  ;;  %v1456_v5 = vmul.u32 %v6383_v32, %v1440_v31 }
 0x151   : > { %v1369_v43 = vsub.s32 32, %v1368_v29  ;;  %v1370_v19 = vshll.u32 %v6398_v26, %v1368_v29  ;;  %v1373_v25 = vsub.s32 4294967266, %v1368_v29  ;;  %v1459_v2 = vadd.s32 1, %v6433_v24 }
 0x152   : > { %vm1516_vm2 = vcmp.gt.s32.totalorder %v1515_v57, 0  ;;  %vm1285_vm3 = vweird.f32 %v5605_v37  ;;  %vm1458_vm4 = vc.u32 %v6440_v46, %v6432_v8  ;;  %v1390_v63 = vadd.s32 3, %v1386_v23 }
 0x153   : > { %v1371_v50 = vshrl.u32 %v1353_v0, %v1369_v43  ;;  %v1374_v1 = vadd.s32 127, %v1373_v25  ;;  %v1460_v9 = vsel %vm1458_vm4, %v1459_v2, %v6433_v24  ;;  %v1505_v40 = vand.u32 2147483647, %v5614_v39 }
 0x154   : > { %v1517_v12 = vsel %vm1516_vm2, %v1515_v57, 0  ;;  %vm1292_vm5 = vcmp.eq.s32.totalorder %v1287_v48, 2  ;;  %v1461_v44 = vadd.s32 %v1460_v9, %v1456_v5  ;;  %vm1288_vm6 = vcmp.lt.s32.totalorder %v1287_v48, 2 }
 0x155   : > { %v5057_v26 = vpop.eup %5056  ;;  %v1372_v53 = vor.u32 %v1371_v50, %v1370_v19  ;;  %v1375_v32 = vshll.u32 %v1374_v1, 23  ;;  %vm1289_vm7 = vcmp.eq.s32.totalorder %v1287_v48, 0  ;;  %v1519_v11 = vand.u32 31, %v1517_v12 }
 0x156   : > { %v5059_v52 = vpop.eup %5058  ;;  %v1293_v61 = vxor.u32 2147483648, %v5057_v26  ;;  %v1462_v22 = vadd.s32 536870912, %v1461_v44  ;;  %v6452_v27 = vand.u32 3, %v1390_v63  ;;  %v1512_v45 = vand.u32 8388607, %v1505_v40 }
 0x157   : > { %v1290_v20 = vxor.u32 2147483648, %v5059_v52  ;;  %v1376_v3 = vor.u32 4788187, %v1375_v32  ;;  %v1379_v58 = vcvt.s32.f32 %v1372_v53  ;;  %v1520_v6 = vsub.s32 32, %v1519_v11 }
 0x158   : > { %v1294_v21 = vsel %vm1292_vm5, %v1293_v61, %v5059_v52  ;;  %v6456_v36 = vshrl.u32 %v1462_v22, 30  ;;  %v1522_v34 = vshll.u32 %v8659_v62, %v1519_v11  ;;  %v1525_v24 = vshll.u32 %v8651_v13, %v1519_v11 }
 0x159   : > { %v1291_v17 = vsel %vm1289_vm7, %v5057_v26, %v1290_v20  ;;  %v1377_v33 = vand.u32 2147483647, %v1376_v3  ;;  %v1523_v35 = vshrl.u32 %v8651_v13, %v1520_v6  ;;  %v1528_v0 = vshll.u32 %v8652_v54, %v1519_v11 }
 0x15a   : > { %v1295_v31 = vsel %vm1288_vm6, %v1291_v17, %v1294_v21  ;;  %v1464_v23 = vshll.u32 %v6456_v36, 30  ;;  %v1526_v57 = vshrl.u32 %v8652_v54, %v1520_v6  ;;  %v1513_v43 = vor.u32 8388608, %v1512_v45 }
 0x15b   : > { %v1296_v60 = vsel %vm1285_vm3, nan, %v1295_v31  ;;  %v1380_v29 = vmul.f32 %v1379_v58, %v1377_v33  ;;  %v1518_v19 = vshrl.u32 %v1517_v12, 5  ;;  %v1529_v25 = vshrl.u32 %v8653_v16, %v1520_v6 }
 0x15c   : > { %v1531_v48 = vshll.u32 %v8653_v16, %v1519_v11  ;;  %4528 = vst [vmem:[%s5997_s17 + $0x38] sm:$0xff] %v1296_v60  ;;  %v6470_v2 = vsub.s32 %v1461_v44, %v1464_v23  ;;  %v1532_v50 = vshrl.u32 %v8654_v4, %v1520_v6  ;;  %v1612_v37 = vand.u32 2139095040, %v5617_v41 }
 0x15d   : > { %v1381_v5 = vxor.u32 2147483648, %v1380_v29  ;;  %v1521_v1 = vshrl.u32 %v8659_v62, %v1520_v6  ;;  %v1524_v63 = vor.u32 %v1523_v35, %v1522_v34  ;;  %v1534_v9 = vshll.u32 %v8654_v4, %v1519_v11 }
 0x15e   : > { %v1535_v26 = vshrl.u32 %v8655_v49, %v1520_v6  ;;  %v1467_v53 = vsub.s32 0, %v6470_v2  ;;  %v1527_v32 = vor.u32 %v1526_v57, %v1525_v24  ;;  %v1530_v52 = vor.u32 %v1529_v25, %v1528_v0 }
 0x15f   : > { %v1382_v12 = vsel %vm1299_vm11, %v1381_v5, %v1380_v29  ;;  %v1533_v61 = vor.u32 %v1532_v50, %v1531_v48  ;;  %vm1537_vm8 = vcmp.lt.s32.totalorder %v1518_v19, 1  ;;  %v1553_v11 = vshll.u32 %v1513_v43, 8 }
 0x160   : > { %v1385_v44 = vsel %vm6411_vm13, %v5608_v38, %v1382_v12  ;;  %v1536_v20 = vor.u32 %v1535_v26, %v1534_v9  ;;  %v4687_v3 = vmin.u32 %v1467_v53, %v6470_v2  ;;  %v1609_v58 = vand.u32 2147483647, %v5617_v41 }
 0x161   : > { %5060 = vcosq.f32 %v1385_v44  ;;  %vm1539_vm9 = vcmp.lt.s32.totalorder %v1518_v19, 3  ;;  %vm1540_vm10 = vcmp.lt.s32.totalorder %v1518_v19, 4  ;;  %v1613_v22 = vshrl.u32 %v1612_v37, 23 }
 0x162   : > { %5062 = vsinq.f32 %v1385_v44  ;;  %v1469_v21 = vclz %v4687_v3  ;;  %vm1538_vm11 = vcmp.lt.s32.totalorder %v1518_v19, 2  ;;  %v1541_v45 = vsel %vm1537_vm8, %v1521_v1, %v1524_v63 }
 0x163   : > { %v1545_v6 = vsel %vm1537_vm8, %v1524_v63, %v1527_v32  ;;  %v1542_v17 = vsel %vm1540_vm10, %v1530_v52, 2102212464  ;;  %v1546_v30 = vsel %vm1540_vm10, %v1533_v61, 920167782  ;;  %v1549_v33 = vsel %vm1537_vm8, %v1527_v32, %v1530_v52 }
 0x164   : > { %v1550_v34 = vsel %vm1540_vm10, %v1536_v20, 1326507024  ;;  %v4688_v31 = vadd.s32 4294967294, %v1469_v21  ;;  %v1543_v35 = vsel %vm1539_vm9, %v1527_v32, %v1542_v17  ;;  %v1547_v24 = vsel %vm1539_vm9, %v1530_v52, %v1546_v30 }
 0x165   : > { %v1551_v0 = vsel %vm1539_vm9, %v1533_v61, %v1550_v34  ;;  %v1457_v60 = vadd.s32 %v6432_v8, %v6440_v46  ;;  %v1548_v29 = vsel %vm1538_vm11, %v1545_v6, %v1547_v24  ;;  %v4694_v57 = vadd.s32 4294967169, %v1613_v22 }
 0x166   : > { %v1552_v23 = vsel %vm1538_vm11, %v1549_v33, %v1551_v0  ;;  %vm4689_vm12 = vcmp.lt.s32.totalorder %v4688_v31, 0  ;;  %v1544_v43 = vsel %vm1538_vm11, %v1541_v45, %v1543_v35  ;;  %v1487_v9 = vsub.s32 4, %v6456_v36 }
 0x167   : > { %v6490_v25 = vmul.u32.u64.low %v1553_v11, %v1552_v23  ;;  %v6491_v48 = vmul.u32.u64.high %v1553_v11, %v1552_v23, %v6490_v25  ;;  %v1472_v5 = vsel %vm4689_vm12, 0, %v4688_v31  ;;  %v1619_v1 = vadd.s32 1, %v4694_v57 }
 0x168   : > { %v6493_v50 = vmul.u32.u64.low %v1553_v11, %v1548_v29  ;;  %v6494_v37 = vmul.u32.u64.high %v1553_v11, %v1548_v29, %v6493_v50  ;;  %v1473_v63 = vsub.s32 32, %v1472_v5  ;;  %v1474_v8 = vshll.u32 %v6470_v2, %v1472_v5 }
 0x169   : > { %v1477_v46 = vsub.s32 4294967266, %v1472_v5  ;;  %vm1389_vm13 = vweird.f32 %v5608_v38  ;;  %vm6502_vm14 = vcmp.le.f32.partialorder %v1401_v28, 0.7853982  ;;  %v1616_v26 = vand.u32 8388607, %v1609_v58 }
 0x16a   : > { %vm1620_vm15 = vcmp.gt.s32.totalorder %v1619_v1, 0  ;;  %v1475_v12 = vshrl.u32 %v1457_v60, %v1473_v63  ;;  %v1560_v32 = vmul.u32 %v1553_v11, %v1544_v43  ;;  %vm1562_vm0 = vc.u32 %v6491_v48, %v6493_v50 }
 0x16b   : > { %v1478_v53 = vadd.s32 127, %v1477_v46  ;;  %vm1392_vm1 = vcmp.lt.s32.totalorder %v6452_v27, 2  ;;  %vm1403_vm2 = vcmp.lt.s32.totalorder %v5611_v7, 0  ;;  %v1563_v2 = vadd.s32 1, %v6494_v37 }
 0x16c   : > { %v1621_v28 = vsel %vm1620_vm15, %v1619_v1, 0  ;;  %v1476_v52 = vor.u32 %v1475_v12, %v1474_v8  ;;  %v6516_v61 = vsel %vm1403_vm2, %v1487_v9, %v6456_v36  ;;  %vm1393_vm3 = vcmp.eq.s32.totalorder %v6452_v27, 0 }
 0x16d   : > { %v1479_v44 = vshll.u32 %v1478_v53, 23  ;;  %v1623_v20 = vand.u32 31, %v1621_v28  ;;  %vm1396_vm4 = vcmp.eq.s32.totalorder %v6452_v27, 2  ;;  %v1564_v11 = vsel %vm1562_vm0, %v1563_v2, %v6494_v37 }
 0x16e   : > { %v5061_v3 = vpop.eup %5060  ;;  %v1617_v22 = vor.u32 8388608, %v1616_v26  ;;  %v1483_v17 = vcvt.s32.f32 %v1476_v52  ;;  %v1565_v30 = vadd.s32 %v1564_v11, %v1560_v32  ;;  %v1490_v36 = vsel %vm6502_vm14, 0, %v6516_v61 }
 0x16f   : > { %v5063_v21 = vpop.eup %5062  ;;  %v1397_v45 = vxor.u32 2147483648, %v5061_v3  ;;  %v1480_v6 = vor.u32 4788187, %v1479_v44  ;;  %v1624_v34 = vsub.s32 32, %v1623_v20  ;;  %v1626_v31 = vshll.u32 %v8659_v62, %v1623_v20 }
 0x170   : > { %v1394_v33 = vxor.u32 2147483648, %v5063_v21  ;;  %v1566_v0 = vadd.s32 536870912, %v1565_v30  ;;  %v1629_v60 = vshll.u32 %v8651_v13, %v1623_v20  ;;  %v1632_v43 = vshll.u32 %v8652_v54, %v1623_v20 }
 0x171   : > { %v1398_v35 = vsel %vm1396_vm4, %v1397_v45, %v5063_v21  ;;  %v1481_v24 = vand.u32 2147483647, %v1480_v6  ;;  %v1627_v23 = vshrl.u32 %v8651_v13, %v1624_v34  ;;  %v1630_v57 = vshrl.u32 %v8652_v54, %v1624_v34 }
 0x172   : > { %v1395_v29 = vsel %vm1393_vm3, %v5061_v3, %v1394_v33  ;;  %v1567_v37 = vshrl.u32 %v1566_v0, 30  ;;  %v1633_v1 = vshrl.u32 %v8653_v16, %v1624_v34  ;;  %v1622_v8 = vshrl.u32 %v1621_v28, 5 }
 0x173   : > { %v1399_v25 = vsel %vm1392_vm1, %v1395_v29, %v1398_v35  ;;  %v1484_v5 = vmul.f32 %v1483_v17, %v1481_v24  ;;  %v1635_v46 = vshll.u32 %v8653_v16, %v1623_v20  ;;  %v6537_v9 = vshll.u32 %v1617_v22, 8 }
 0x174   : > { %v1400_v63 = vsel %vm1389_vm13, nan, %v1399_v25  ;;  %v1568_v12 = vshll.u32 %v1567_v37, 30  ;;  %v1625_v53 = vshrl.u32 %v8659_v62, %v1624_v34  ;;  %v1716_v32 = vand.u32 2139095040, %v5620_v42 }
 0x175   : > { %v1485_v26 = vxor.u32 2147483648, %v1484_v5  ;;  %4529 = vst [vmem:[%s5997_s17 + $0x40] sm:$0xff] %v1400_v63  ;;  %v1628_v27 = vor.u32 %v1627_v23, %v1626_v31  ;;  %v1636_v2 = vshrl.u32 %v8654_v4, %v1624_v34  ;;  %v1638_v52 = vshll.u32 %v8654_v4, %v1623_v20 }
 0x176   : > { %v1639_v38 = vshrl.u32 %v8655_v49, %v1624_v34  ;;  %v6547_v44 = vsub.s32 %v1565_v30, %v1568_v12  ;;  %v1631_v61 = vor.u32 %v1630_v57, %v1629_v60  ;;  %v1634_v3 = vor.u32 %v1633_v1, %v1632_v43 }
 0x177   : > { %v1486_v28 = vsel %vm1403_vm2, %v1485_v26, %v1484_v5  ;;  %v1637_v22 = vor.u32 %v1636_v2, %v1635_v46  ;;  %vm1641_vm5 = vcmp.lt.s32.totalorder %v1622_v8, 1  ;;  %vm1643_vm6 = vcmp.lt.s32.totalorder %v1622_v8, 3 }
 0x178   : > { %v1489_v11 = vsel %vm6502_vm14, %v5611_v7, %v1486_v28  ;;  %v1640_v21 = vor.u32 %v1639_v38, %v1638_v52  ;;  %v1571_v45 = vsub.s32 0, %v6547_v44  ;;  %v1717_v20 = vshrl.u32 %v1716_v32, 23 }
 0x179   : > { %5064 = vcosq.f32 %v1489_v11  ;;  %vm1642_vm7 = vcmp.lt.s32.totalorder %v1622_v8, 2  ;;  %vm1644_vm8 = vcmp.lt.s32.totalorder %v1622_v8, 4  ;;  %v1645_v6 = vsel %vm1641_vm5, %v1625_v53, %v1628_v27 }
 0x17a   : > { %5066 = vsinq.f32 %v1489_v11  ;;  %v4691_v17 = vmin.u32 %v1571_v45, %v6547_v44  ;;  %v1646_v30 = vsel %vm1644_vm8, %v1634_v3, 2102212464  ;;  %v1649_v33 = vsel %vm1641_vm5, %v1628_v27, %v1631_v61 }
 0x17b   : > { %v1650_v34 = vsel %vm1644_vm8, %v1637_v22, 920167782  ;;  %v1647_v19 = vsel %vm1643_vm6, %v1631_v61, %v1646_v30  ;;  %v1653_v35 = vsel %vm1641_vm5, %v1631_v61, %v1634_v3  ;;  %v1654_v24 = vsel %vm1644_vm8, %v1640_v21, 1326507024 }
 0x17c   : > { %v1651_v31 = vsel %vm1643_vm6, %v1634_v3, %v1650_v34  ;;  %v1494_v0 = vadd.s32 3, %v1490_v36  ;;  %v1573_v60 = vclz %v4691_v17  ;;  %v1591_v29 = vsub.s32 4, %v1567_v37 }
 0x17d   : > { %v1648_v23 = vsel %vm1642_vm7, %v1645_v6, %v1647_v19  ;;  %v1652_v57 = vsel %vm1642_vm7, %v1649_v33, %v1651_v31  ;;  %v1655_v43 = vsel %vm1643_vm6, %v1637_v22, %v1654_v24  ;;  %v4698_v25 = vadd.s32 4294967169, %v1717_v20 }
 0x17e   : > { %v4692_v5 = vadd.s32 4294967294, %v1573_v60  ;;  %v1656_v1 = vsel %vm1642_vm7, %v1653_v35, %v1655_v43  ;;  %v6561_v63 = vmul.u32.u64.low %v6537_v9, %v1652_v57  ;;  %v6562_v46 = vmul.u32.u64.high %v6537_v9, %v1652_v57, %v6561_v63 }
 0x17f   : > { %vm1507_vm9 = vcmp.lt.s32.totalorder %v5614_v39, 0  ;;  %v6567_v36 = vmul.u32.u64.low %v6537_v9, %v1656_v1  ;;  %v6568_v26 = vmul.u32.u64.high %v6537_v9, %v1656_v1, %v6567_v36  ;;  %v1713_v12 = vand.u32 2147483647, %v5620_v42 }
 0x180   : > { %vm1493_vm10 = vweird.f32 %v5611_v7  ;;  %v1561_v53 = vadd.s32 %v6493_v50, %v6491_v48  ;;  %vm4693_vm11 = vcmp.lt.s32.totalorder %v4692_v5, 0  ;;  %v1592_v8 = vsel %vm1507_vm9, %v1591_v29, %v1567_v37 }
 0x181   : > { %v1723_v32 = vadd.s32 1, %v4698_v25  ;;  %v1495_v27 = vand.u32 3, %v1494_v0  ;;  %vm6578_vm12 = vcmp.le.f32.partialorder %v1505_v40, 0.7853982  ;;  %v1576_v52 = vsel %vm4693_vm11, 0, %v4692_v5 }
 0x182   : > { %v1664_v38 = vmul.u32 %v6537_v9, %v1648_v23  ;;  %v1577_v28 = vsub.s32 32, %v1576_v52  ;;  %v1578_v61 = vshll.u32 %v6547_v44, %v1576_v52  ;;  %v1581_v3 = vsub.s32 4294967266, %v1576_v52 }
 0x183   : > { %v1667_v48 = vadd.s32 1, %v6562_v46  ;;  %v1594_v50 = vsel %vm6578_vm12, 0, %v1592_v8  ;;  %vm1666_vm13 = vc.u32 %v6568_v26, %v6561_v63  ;;  %v1720_v40 = vand.u32 8388607, %v1713_v12 }
 0x184   : > { %vm1724_vm14 = vcmp.gt.s32.totalorder %v1723_v32, 0  ;;  %v1579_v37 = vshrl.u32 %v1561_v53, %v1577_v28  ;;  %v1582_v11 = vadd.s32 127, %v1581_v3  ;;  %vm1496_vm15 = vcmp.lt.s32.totalorder %v1495_v27, 2 }
 0x185   : > { %v1668_v9 = vsel %vm1666_vm13, %v1667_v48, %v6562_v46  ;;  %v1725_v22 = vsel %vm1724_vm14, %v1723_v32, 0  ;;  %vm1500_vm0 = vcmp.eq.s32.totalorder %v1495_v27, 2  ;;  %vm1497_vm1 = vcmp.eq.s32.totalorder %v1495_v27, 0 }
 0x186   : > { %v5065_v21 = vpop.eup %5064  ;;  %v1669_v44 = vadd.s32 %v1668_v9, %v1664_v38  ;;  %v1727_v45 = vand.u32 31, %v1725_v22  ;;  %v1580_v17 = vor.u32 %v1579_v37, %v1578_v61  ;;  %v1583_v30 = vshll.u32 %v1582_v11, 23 }
 0x187   : > { %v5067_v20 = vpop.eup %5066  ;;  %v1501_v6 = vxor.u32 2147483648, %v5065_v21  ;;  %v6592_v34 = vadd.s32 3, %v1594_v50  ;;  %v1721_v60 = vor.u32 8388608, %v1720_v40  ;;  %v1726_v57 = vshrl.u32 %v1725_v22, 5 }
 0x188   : > { %v1498_v33 = vxor.u32 2147483648, %v5067_v20  ;;  %v1670_v19 = vadd.s32 536870912, %v1669_v44  ;;  %v1728_v31 = vsub.s32 32, %v1727_v45  ;;  %v1584_v24 = vor.u32 4788187, %v1583_v30 }
 0x189   : > { %v1502_v35 = vsel %vm1500_vm0, %v1501_v6, %v5067_v20  ;;  %v1587_v0 = vcvt.s32.f32 %v1580_v17  ;;  %v1820_v43 = vand.u32 2139095040, %v5623_v10  ;;  %v1730_v1 = vshll.u32 %v8659_v62, %v1727_v45 }
 0x18a   : > { %v1499_v29 = vsel %vm1497_vm1, %v5065_v21, %v1498_v33  ;;  %v6594_v23 = vshrl.u32 %v1670_v19, 30  ;;  %v1585_v5 = vand.u32 2147483647, %v1584_v24  ;;  %v1733_v46 = vshll.u32 %v8651_v13, %v1727_v45 }
 0x18b   : > { %v1503_v25 = vsel %vm1496_vm15, %v1499_v29, %v1502_v35  ;;  %v1731_v8 = vshrl.u32 %v8651_v13, %v1728_v31  ;;  %v1734_v32 = vshrl.u32 %v8652_v54, %v1728_v31  ;;  %v1736_v38 = vshll.u32 %v8652_v54, %v1727_v45 }
 0x18c   : > { %v1504_v36 = vsel %vm1493_vm10, nan, %v1503_v25  ;;  %v1672_v53 = vshll.u32 %v6594_v23, 30  ;;  %v1588_v52 = vmul.f32 %v1587_v0, %v1585_v5  ;;  %v1737_v27 = vshrl.u32 %v8653_v16, %v1728_v31 }
 0x18d   : > { %v1739_v28 = vshll.u32 %v8653_v16, %v1727_v45  ;;  %4530 = vst [vmem:[%s5997_s17 + $0x48] sm:$0xff] %v1504_v36  ;;  %v1740_v3 = vshrl.u32 %v8654_v4, %v1728_v31  ;;  %v1742_v7 = vshll.u32 %v8654_v4, %v1727_v45  ;;  %v1817_v48 = vand.u32 2147483647, %v5623_v10 }
 0x18e   : > { %v6609_v61 = vsub.s32 %v1669_v44, %v1672_v53  ;;  %v1589_v50 = vxor.u32 2147483648, %v1588_v52  ;;  %v1743_v40 = vshrl.u32 %v8655_v49, %v1728_v31  ;;  %v6615_v37 = vshll.u32 %v1721_v60, 8 }
 0x18f   : > { %v1821_v11 = vshrl.u32 %v1820_v43, 23  ;;  %v1729_v22 = vshrl.u32 %v8659_v62, %v1728_v31  ;;  %v1732_v21 = vor.u32 %v1731_v8, %v1730_v1  ;;  %v1735_v20 = vor.u32 %v1734_v32, %v1733_v46 }
 0x190   : > { %v1675_v9 = vsub.s32 0, %v6609_v61  ;;  %v1590_v44 = vsel %vm1507_vm9, %v1589_v50, %v1588_v52  ;;  %v1738_v6 = vor.u32 %v1737_v27, %v1736_v38  ;;  %v1741_v17 = vor.u32 %v1740_v3, %v1739_v28 }
 0x191   : > { %vm1745_vm2 = vcmp.lt.s32.totalorder %v1726_v57, 1  ;;  %v1593_v45 = vsel %vm6578_vm12, %v5614_v39, %v1590_v44  ;;  %v1744_v33 = vor.u32 %v1743_v40, %v1742_v7  ;;  %vm1748_vm3 = vcmp.lt.s32.totalorder %v1726_v57, 4 }
 0x192   : > { %v4695_v30 = vmin.u32 %v1675_v9, %v6609_v61  ;;  %5068 = vcosq.f32 %v1593_v45  ;;  %vm1746_vm4 = vcmp.lt.s32.totalorder %v1726_v57, 2  ;;  %vm1747_vm5 = vcmp.lt.s32.totalorder %v1726_v57, 3 }
 0x193   : > { %v1750_v19 = vsel %vm1748_vm3, %v1738_v6, 2102212464  ;;  %5070 = vsinq.f32 %v1593_v45  ;;  %v1749_v35 = vsel %vm1745_vm2, %v1729_v22, %v1732_v21  ;;  %v1753_v24 = vsel %vm1745_vm2, %v1732_v21, %v1735_v20 }
 0x194   : > { %v1677_v31 = vclz %v4695_v30  ;;  %v1665_v0 = vadd.s32 %v6561_v63, %v6568_v26  ;;  %v1751_v2 = vsel %vm1747_vm5, %v1735_v20, %v1750_v19  ;;  %v1754_v60 = vsel %vm1748_vm3, %v1741_v17, 920167782 }
 0x195   : > { %v1757_v29 = vsel %vm1745_vm2, %v1735_v20, %v1738_v6  ;;  %v1755_v25 = vsel %vm1747_vm5, %v1738_v6, %v1754_v60  ;;  %v1758_v5 = vsel %vm1748_vm3, %v1744_v33, 1326507024  ;;  %v1824_v1 = vand.u32 8388607, %v1817_v48 }
 0x196   : > { %v4696_v43 = vadd.s32 4294967294, %v1677_v31  ;;  %v1752_v46 = vsel %vm1746_vm4, %v1749_v35, %v1751_v2  ;;  %v1756_v36 = vsel %vm1746_vm4, %v1753_v24, %v1755_v25  ;;  %v1759_v53 = vsel %vm1747_vm5, %v1741_v17, %v1758_v5 }
 0x197   : > { %v4702_v8 = vadd.s32 4294967169, %v1821_v11  ;;  %v1760_v63 = vsel %vm1746_vm4, %v1757_v29, %v1759_v53  ;;  %v6639_v26 = vmul.u32.u64.low %v6615_v37, %v1756_v36  ;;  %v6640_v32 = vmul.u32.u64.high %v6615_v37, %v1756_v36, %v6639_v26 }
 0x198   : > { %vm4697_vm6 = vcmp.lt.s32.totalorder %v4696_v43, 0  ;;  %v1695_v38 = vsub.s32 4, %v6594_v23  ;;  %v6645_v27 = vmul.u32.u64.low %v6615_v37, %v1760_v63  ;;  %v6646_v28 = vmul.u32.u64.high %v6615_v37, %v1760_v63, %v6645_v27 }
 0x199   : > { %v1680_v52 = vsel %vm4697_vm6, 0, %v4696_v43  ;;  %v1827_v40 = vadd.s32 1, %v4702_v8  ;;  %vm1597_vm7 = vweird.f32 %v5614_v39  ;;  %v1599_v57 = vand.u32 3, %v6592_v34 }
 0x19a   : > { %v1681_v3 = vsub.s32 32, %v1680_v52  ;;  %v1682_v7 = vshll.u32 %v6609_v61, %v1680_v52  ;;  %v1685_v50 = vsub.s32 4294967266, %v1680_v52  ;;  %vm1611_vm8 = vcmp.lt.s32.totalorder %v5617_v41, 0 }
 0x19b   : > { %v1768_v11 = vmul.u32 %v6615_v37, %v1752_v46  ;;  %v1771_v21 = vadd.s32 1, %v6640_v32  ;;  %vm1828_vm9 = vcmp.gt.s32.totalorder %v1827_v40, 0  ;;  %v6657_v20 = vsel %vm1611_vm8, %v1695_v38, %v6594_v23 }
 0x19c   : > { %v1683_v9 = vshrl.u32 %v1665_v0, %v1681_v3  ;;  %v1686_v22 = vadd.s32 127, %v1685_v50  ;;  %vm1770_vm10 = vc.u32 %v6646_v28, %v6639_v26  ;;  %v1825_v61 = vor.u32 8388608, %v1824_v1 }
 0x19d   : > { %v1829_v44 = vsel %vm1828_vm9, %v1827_v40, 0  ;;  %vm6663_vm11 = vcmp.le.f32.partialorder %v1609_v58, 0.7853982  ;;  %v1772_v17 = vsel %vm1770_vm10, %v1771_v21, %v6640_v32  ;;  %vm1600_vm12 = vcmp.lt.s32.totalorder %v1599_v57, 2 }
 0x19e   : > { %v1684_v37 = vor.u32 %v1683_v9, %v1682_v7  ;;  %v1687_v6 = vshll.u32 %v1686_v22, 23  ;;  %vm1601_vm13 = vcmp.eq.s32.totalorder %v1599_v57, 0  ;;  %v1773_v45 = vadd.s32 %v1772_v17, %v1768_v11 }
 0x19f   : > { %v1831_v23 = vand.u32 31, %v1829_v44  ;;  %v5069_v30 = vpop.eup %5068  ;;  %vm1604_vm14 = vcmp.eq.s32.totalorder %v1599_v57, 2  ;;  %v1698_v31 = vsel %vm6663_vm11, 0, %v6657_v20  ;;  %v6671_v2 = vshll.u32 %v1825_v61, 8 }
 0x1a0   : > { %v1688_v33 = vor.u32 4788187, %v1687_v6  ;;  %v1691_v19 = vcvt.s32.f32 %v1684_v37  ;;  %v5071_v58 = vpop.eup %5070  ;;  %v1605_v35 = vxor.u32 2147483648, %v5069_v30  ;;  %v1774_v24 = vadd.s32 536870912, %v1773_v45 }
 0x1a1   : > { %v1832_v0 = vsub.s32 32, %v1831_v23  ;;  %v1602_v60 = vxor.u32 2147483648, %v5071_v58  ;;  %v1830_v43 = vshrl.u32 %v1829_v44, 5  ;;  %v1924_v25 = vand.u32 2139095040, %v5626_v14 }
 0x1a2   : > { %v1689_v29 = vand.u32 2147483647, %v1688_v33  ;;  %v1606_v5 = vsel %vm1604_vm14, %v1605_v35, %v5071_v58  ;;  %v1775_v1 = vshrl.u32 %v1774_v24, 30  ;;  %v1834_v46 = vshll.u32 %v8659_v62, %v1831_v23 }
 0x1a3   : > { %v1835_v36 = vshrl.u32 %v8651_v13, %v1832_v0  ;;  %v1603_v53 = vsel %vm1601_vm13, %v5069_v30, %v1602_v60  ;;  %v1837_v63 = vshll.u32 %v8651_v13, %v1831_v23  ;;  %v1838_v32 = vshrl.u32 %v8652_v54, %v1832_v0 }
 0x1a4   : > { %v1692_v8 = vmul.f32 %v1691_v19, %v1689_v29  ;;  %v1607_v52 = vsel %vm1600_vm12, %v1603_v53, %v1606_v5  ;;  %v1776_v38 = vshll.u32 %v1775_v1, 30  ;;  %v1840_v27 = vshll.u32 %v8652_v54, %v1831_v23 }
 0x1a5   : > { %v1841_v3 = vshrl.u32 %v8653_v16, %v1832_v0  ;;  %v1608_v7 = vsel %vm1597_vm7, nan, %v1607_v52  ;;  %vm1715_vm15 = vcmp.lt.s32.totalorder %v5620_v42, 0  ;;  %v1833_v40 = vshrl.u32 %v8659_v62, %v1832_v0 }
 0x1a6   : > { %v1693_v50 = vxor.u32 2147483648, %v1692_v8  ;;  %vm1849_vm0 = vcmp.lt.s32.totalorder %v1830_v43, 1  ;;  %v6686_v11 = vsub.s32 %v1773_v45, %v1776_v38  ;;  %v1836_v9 = vor.u32 %v1835_v36, %v1834_v46  ;;  %4531 = vst [vmem:[%s5997_s17 + $0x50] sm:$0xff] %v1608_v7 }
 0x1a7   : > { %v1843_v57 = vshll.u32 %v8653_v16, %v1831_v23  ;;  %v1844_v22 = vshrl.u32 %v8654_v4, %v1832_v0  ;;  %v1839_v20 = vor.u32 %v1838_v32, %v1837_v63  ;;  %v1846_v39 = vshll.u32 %v8654_v4, %v1831_v23 }
 0x1a8   : > { %v1694_v21 = vsel %vm1611_vm8, %v1693_v50, %v1692_v8  ;;  %v1847_v61 = vshrl.u32 %v8655_v49, %v1832_v0  ;;  %vm6700_vm1 = vcmp.le.f32.partialorder %v1713_v12, 0.7853982  ;;  %v1779_v6 = vsub.s32 0, %v6686_v11 }
 0x1a9   : > { %v1697_v44 = vsel %vm6663_vm11, %v5617_v41, %v1694_v21  ;;  %v1842_v17 = vor.u32 %v1841_v3, %v1840_v27  ;;  %v1845_v45 = vor.u32 %v1844_v22, %v1843_v57  ;;  %vm1852_vm2 = vcmp.lt.s32.totalorder %v1830_v43, 4 }
 0x1aa   : > { %5072 = vcosq.f32 %v1697_v44  ;;  %v1848_v30 = vor.u32 %v1847_v61, %v1846_v39  ;;  %v1925_v23 = vshrl.u32 %v1924_v25, 23  ;;  %v4699_v33 = vmin.u32 %v1779_v6, %v6686_v11 }
 0x1ab   : > { %5074 = vsinq.f32 %v1697_v44  ;;  %v1799_v19 = vsub.s32 4, %v1775_v1  ;;  %vm1851_vm3 = vcmp.lt.s32.totalorder %v1830_v43, 3  ;;  %vm1850_vm4 = vcmp.lt.s32.totalorder %v1830_v43, 2 }
 0x1ac   : > { %v1854_v34 = vsel %vm1852_vm2, %v1842_v17, 2102212464  ;;  %v1857_v12 = vsel %vm1849_vm0, %v1836_v9, %v1839_v20  ;;  %v1858_v58 = vsel %vm1852_vm2, %v1845_v45, 920167782  ;;  %v1702_v35 = vadd.s32 3, %v1698_v31 }
 0x1ad   : > { %v1781_v24 = vclz %v4699_v33  ;;  %v1853_v0 = vsel %vm1849_vm0, %v1833_v40, %v1836_v9  ;;  %v1861_v60 = vsel %vm1849_vm0, %v1839_v20, %v1842_v17  ;;  %v1855_v29 = vsel %vm1851_vm3, %v1839_v20, %v1854_v34 }
 0x1ae   : > { %v1859_v25 = vsel %vm1851_vm3, %v1842_v17, %v1858_v58  ;;  %v1862_v5 = vsel %vm1852_vm2, %v1848_v30, 1326507024  ;;  %v4706_v46 = vadd.s32 4294967169, %v1925_v23  ;;  %v1800_v53 = vsel %vm1715_vm15, %v1799_v19, %v1775_v1 }
 0x1af   : > { %v4700_v36 = vadd.s32 4294967294, %v1781_v24  ;;  %v1860_v8 = vsel %vm1850_vm4, %v1857_v12, %v1859_v25  ;;  %v1863_v31 = vsel %vm1851_vm3, %v1845_v45, %v1862_v5  ;;  %v1856_v63 = vsel %vm1850_vm4, %v1853_v0, %v1855_v29 }
 0x1b0   : > { %v1864_v32 = vsel %vm1850_vm4, %v1861_v60, %v1863_v31  ;;  %v6721_v52 = vmul.u32.u64.low %v6671_v2, %v1860_v8  ;;  %v6722_v38 = vmul.u32.u64.high %v6671_v2, %v1860_v8, %v6721_v52  ;;  %v1769_v27 = vadd.s32 %v6639_v26, %v6646_v28 }
 0x1b1   : > { %vm4701_vm5 = vcmp.lt.s32.totalorder %v4700_v36, 0  ;;  %v6728_v3 = vmul.u32.u64.low %v6671_v2, %v1864_v32  ;;  %v6729_v1 = vmul.u32.u64.high %v6671_v2, %v1864_v32, %v6728_v3  ;;  %v1703_v7 = vand.u32 3, %v1702_v35 }
 0x1b2   : > { %v1784_v50 = vsel %vm4701_vm5, 0, %v4700_v36  ;;  %v1802_v40 = vsel %vm6700_vm1, 0, %v1800_v53  ;;  %v1931_v43 = vadd.s32 1, %v4706_v46  ;;  %v1872_v21 = vmul.u32 %v6671_v2, %v1856_v63 }
 0x1b3   : > { %v1785_v9 = vsub.s32 32, %v1784_v50  ;;  %v1786_v57 = vshll.u32 %v6686_v11, %v1784_v50  ;;  %v1789_v22 = vsub.s32 4294967266, %v1784_v50  ;;  %v1875_v20 = vadd.s32 1, %v6722_v38 }
 0x1b4   : > { %vm1932_vm6 = vcmp.gt.s32.totalorder %v1931_v43, 0  ;;  %vm1701_vm7 = vweird.f32 %v5617_v41  ;;  %vm1874_vm8 = vc.u32 %v6729_v1, %v6721_v52  ;;  %v1806_v39 = vadd.s32 3, %v1802_v40 }
 0x1b5   : > { %v1787_v26 = vshrl.u32 %v1769_v27, %v1785_v9  ;;  %v1790_v28 = vadd.s32 127, %v1789_v22  ;;  %v1876_v61 = vsel %vm1874_vm8, %v1875_v20, %v6722_v38  ;;  %v1921_v44 = vand.u32 2147483647, %v5626_v14 }
 0x1b6   : > { %v1933_v6 = vsel %vm1932_vm6, %v1931_v43, 0  ;;  %vm1708_vm9 = vcmp.eq.s32.totalorder %v1703_v7, 2  ;;  %v1877_v45 = vadd.s32 %v1876_v61, %v1872_v21  ;;  %vm1704_vm10 = vcmp.lt.s32.totalorder %v1703_v7, 2 }
 0x1b7   : > { %v5073_v11 = vpop.eup %5072  ;;  %v1788_v17 = vor.u32 %v1787_v26, %v1786_v57  ;;  %v1791_v2 = vshll.u32 %v1790_v28, 23  ;;  %vm1705_vm11 = vcmp.eq.s32.totalorder %v1703_v7, 0  ;;  %v1935_v33 = vand.u32 31, %v1933_v6 }
 0x1b8   : > { %v5075_v30 = vpop.eup %5074  ;;  %v1709_v23 = vxor.u32 2147483648, %v5073_v11  ;;  %v1878_v58 = vadd.s32 536870912, %v1877_v45  ;;  %v6741_v24 = vand.u32 3, %v1806_v39  ;;  %v1928_v0 = vand.u32 8388607, %v1921_v44 }
 0x1b9   : > { %v1706_v19 = vxor.u32 2147483648, %v5075_v30  ;;  %v1792_v34 = vor.u32 4788187, %v1791_v2  ;;  %v1795_v12 = vcvt.s32.f32 %v1788_v17  ;;  %v1936_v60 = vsub.s32 32, %v1935_v33 }
 0x1ba   : > { %v1710_v35 = vsel %vm1708_vm9, %v1709_v23, %v5075_v30  ;;  %v6745_v5 = vshrl.u32 %v1878_v58, 30  ;;  %v1938_v46 = vshll.u32 %v8659_v62, %v1935_v33  ;;  %v1941_v8 = vshll.u32 %v8651_v13, %v1935_v33 }
 0x1bb   : > { %v1707_v29 = vsel %vm1705_vm11, %v5073_v11, %v1706_v19  ;;  %v1793_v25 = vand.u32 2147483647, %v1792_v34  ;;  %v1939_v53 = vshrl.u32 %v8651_v13, %v1936_v60  ;;  %v1944_v31 = vshll.u32 %v8652_v54, %v1935_v33 }
 0x1bc   : > { %v1711_v36 = vsel %vm1704_vm10, %v1707_v29, %v1710_v35  ;;  %v1880_v38 = vshll.u32 %v6745_v5, 30  ;;  %v1942_v27 = vshrl.u32 %v8652_v54, %v1936_v60  ;;  %v1929_v3 = vor.u32 8388608, %v1928_v0 }
 0x1bd   : > { %v1712_v63 = vsel %vm1701_vm7, nan, %v1711_v36  ;;  %v1796_v32 = vmul.f32 %v1795_v12, %v1793_v25  ;;  %v1934_v50 = vshrl.u32 %v1933_v6, 5  ;;  %v1945_v40 = vshrl.u32 %v8653_v16, %v1936_v60 }
 0x1be   : > { %v1947_v7 = vshll.u32 %v8653_v16, %v1935_v33  ;;  %4532 = vst [vmem:[%s5997_s17 + $0x58] sm:$0xff] %v1712_v63  ;;  %v6759_v9 = vsub.s32 %v1877_v45, %v1880_v38  ;;  %v1948_v57 = vshrl.u32 %v8654_v4, %v1936_v60  ;;  %v2028_v41 = vand.u32 2139095040, %v5629_v47 }
 0x1bf   : > { %v1797_v43 = vxor.u32 2147483648, %v1796_v32  ;;  %v1937_v22 = vshrl.u32 %v8659_v62, %v1936_v60  ;;  %v1940_v21 = vor.u32 %v1939_v53, %v1938_v46  ;;  %v1950_v20 = vshll.u32 %v8654_v4, %v1935_v33 }
 0x1c0   : > { %v1951_v26 = vshrl.u32 %v8655_v49, %v1936_v60  ;;  %v1883_v39 = vsub.s32 0, %v6759_v9  ;;  %v1943_v61 = vor.u32 %v1942_v27, %v1941_v8  ;;  %v1946_v6 = vor.u32 %v1945_v40, %v1944_v31 }
 0x1c1   : > { %v1798_v28 = vsel %vm1715_vm15, %v1797_v43, %v1796_v32  ;;  %v1949_v17 = vor.u32 %v1948_v57, %v1947_v7  ;;  %vm1953_vm12 = vcmp.lt.s32.totalorder %v1934_v50, 1  ;;  %v1969_v30 = vshll.u32 %v1929_v3, 8 }
 0x1c2   : > { %v1801_v11 = vsel %vm6700_vm1, %v5620_v42, %v1798_v28  ;;  %v1952_v2 = vor.u32 %v1951_v26, %v1950_v20  ;;  %v4703_v45 = vmin.u32 %v1883_v39, %v6759_v9  ;;  %v2025_v23 = vand.u32 2147483647, %v5629_v47 }
 0x1c3   : > { %5076 = vcosq.f32 %v1801_v11  ;;  %vm1955_vm13 = vcmp.lt.s32.totalorder %v1934_v50, 3  ;;  %vm1956_vm14 = vcmp.lt.s32.totalorder %v1934_v50, 4  ;;  %v2029_v33 = vshrl.u32 %v2028_v41, 23 }
 0x1c4   : > { %5078 = vsinq.f32 %v1801_v11  ;;  %v1885_v19 = vclz %v4703_v45  ;;  %vm1954_vm15 = vcmp.lt.s32.totalorder %v1934_v50, 2  ;;  %v1957_v34 = vsel %vm1953_vm12, %v1937_v22, %v1940_v21 }
 0x1c5   : > { %v1961_v12 = vsel %vm1953_vm12, %v1940_v21, %v1943_v61  ;;  %v1958_v58 = vsel %vm1956_vm14, %v1946_v6, 2102212464  ;;  %v1962_v37 = vsel %vm1956_vm14, %v1949_v17, 920167782  ;;  %v1965_v35 = vsel %vm1953_vm12, %v1943_v61, %v1946_v6 }
 0x1c6   : > { %v1966_v0 = vsel %vm1956_vm14, %v1952_v2, 1326507024  ;;  %v4704_v60 = vadd.s32 4294967294, %v1885_v19  ;;  %v1959_v29 = vsel %vm1955_vm13, %v1943_v61, %v1958_v58  ;;  %v1963_v25 = vsel %vm1955_vm13, %v1946_v6, %v1962_v37 }
 0x1c7   : > { %v1967_v46 = vsel %vm1955_vm13, %v1949_v17, %v1966_v0  ;;  %v1873_v36 = vadd.s32 %v6721_v52, %v6729_v1  ;;  %v1964_v53 = vsel %vm1954_vm15, %v1961_v12, %v1963_v25  ;;  %v4710_v31 = vadd.s32 4294967169, %v2029_v33 }
 0x1c8   : > { %v1968_v8 = vsel %vm1954_vm15, %v1965_v35, %v1967_v46  ;;  %vm4705_vm0 = vcmp.lt.s32.totalorder %v4704_v60, 0  ;;  %v1960_v63 = vsel %vm1954_vm15, %v1957_v34, %v1959_v29  ;;  %v1903_v57 = vsub.s32 4, %v6745_v5 }
 0x1c9   : > { %v6779_v32 = vmul.u32.u64.low %v1969_v30, %v1968_v8  ;;  %v6780_v38 = vmul.u32.u64.high %v1969_v30, %v1968_v8, %v6779_v32  ;;  %v1888_v27 = vsel %vm4705_vm0, 0, %v4704_v60  ;;  %v2035_v7 = vadd.s32 1, %v4710_v31 }
 0x1ca   : > { %v6782_v3 = vmul.u32.u64.low %v1969_v30, %v1964_v53  ;;  %v6783_v40 = vmul.u32.u64.high %v1969_v30, %v1964_v53, %v6782_v3  ;;  %v1889_v43 = vsub.s32 32, %v1888_v27  ;;  %v1890_v52 = vshll.u32 %v6759_v9, %v1888_v27 }
 0x1cb   : > { %v1893_v1 = vsub.s32 4294967266, %v1888_v27  ;;  %vm1805_vm1 = vweird.f32 %v5620_v42  ;;  %vm1819_vm2 = vcmp.lt.s32.totalorder %v5623_v10, 0  ;;  %v2032_v50 = vand.u32 8388607, %v2025_v23 }
 0x1cc   : > { %vm2036_vm3 = vcmp.gt.s32.totalorder %v2035_v7, 0  ;;  %v1891_v41 = vshrl.u32 %v1873_v36, %v1889_v43  ;;  %v1976_v21 = vmul.u32 %v1969_v30, %v1960_v63  ;;  %vm1978_vm4 = vc.u32 %v6780_v38, %v6782_v3 }
 0x1cd   : > { %v1894_v22 = vadd.s32 127, %v1893_v1  ;;  %vm1808_vm5 = vcmp.lt.s32.totalorder %v6741_v24, 2  ;;  %vm6797_vm6 = vcmp.le.f32.partialorder %v1817_v48, 0.7853982  ;;  %v1979_v20 = vadd.s32 1, %v6783_v40 }
 0x1ce   : > { %v2037_v26 = vsel %vm2036_vm3, %v2035_v7, 0  ;;  %v1892_v28 = vor.u32 %v1891_v41, %v1890_v52  ;;  %v6805_v61 = vsel %vm1819_vm2, %v1903_v57, %v6745_v5  ;;  %vm1809_vm7 = vcmp.eq.s32.totalorder %v6741_v24, 0 }
 0x1cf   : > { %v1895_v39 = vshll.u32 %v1894_v22, 23  ;;  %v2039_v6 = vand.u32 31, %v2037_v26  ;;  %vm1812_vm8 = vcmp.eq.s32.totalorder %v6741_v24, 2  ;;  %v1980_v48 = vsel %vm1978_vm4, %v1979_v20, %v6783_v40 }
 0x1d0   : > { %v5077_v11 = vpop.eup %5076  ;;  %v2033_v17 = vor.u32 8388608, %v2032_v50  ;;  %v1899_v33 = vcvt.s32.f32 %v1892_v28  ;;  %v1981_v19 = vadd.s32 %v1980_v48, %v1976_v21  ;;  %v1906_v5 = vsel %vm6797_vm6, 0, %v6805_v61 }
 0x1d1   : > { %v5079_v2 = vpop.eup %5078  ;;  %v1813_v45 = vxor.u32 2147483648, %v5077_v11  ;;  %v1896_v30 = vor.u32 4788187, %v1895_v39  ;;  %v2040_v12 = vsub.s32 32, %v2039_v6  ;;  %v2042_v58 = vshll.u32 %v8659_v62, %v2039_v6 }
 0x1d2   : > { %v1810_v34 = vxor.u32 2147483648, %v5079_v2  ;;  %v1982_v0 = vadd.s32 536870912, %v1981_v19  ;;  %v2045_v60 = vshll.u32 %v8651_v13, %v2039_v6  ;;  %v2048_v36 = vshll.u32 %v8652_v54, %v2039_v6 }
 0x1d3   : > { %v1814_v37 = vsel %vm1812_vm8, %v1813_v45, %v5079_v2  ;;  %v1897_v35 = vand.u32 2147483647, %v1896_v30  ;;  %v2043_v25 = vshrl.u32 %v8651_v13, %v2040_v12  ;;  %v2046_v46 = vshrl.u32 %v8652_v54, %v2040_v12 }
 0x1d4   : > { %v1811_v29 = vsel %vm1809_vm7, %v5077_v11, %v1810_v34  ;;  %v1983_v31 = vshrl.u32 %v1982_v0, 30  ;;  %v2049_v63 = vshrl.u32 %v8653_v16, %v2040_v12  ;;  %v2038_v27 = vshrl.u32 %v2037_v26, 5 }
 0x1d5   : > { %v1815_v53 = vsel %vm1808_vm5, %v1811_v29, %v1814_v37  ;;  %v1900_v8 = vmul.f32 %v1899_v33, %v1897_v35  ;;  %v2051_v40 = vshll.u32 %v8653_v16, %v2039_v6  ;;  %v6826_v7 = vshll.u32 %v2033_v17, 8 }
 0x1d6   : > { %v1816_v32 = vsel %vm1805_vm1, nan, %v1815_v53  ;;  %v1984_v52 = vshll.u32 %v1983_v31, 30  ;;  %v2041_v1 = vshrl.u32 %v8659_v62, %v2040_v12  ;;  %v2132_v57 = vand.u32 2139095040, %v5632_v15 }
 0x1d7   : > { %v1901_v43 = vxor.u32 2147483648, %v1900_v8  ;;  %4533 = vst [vmem:[%s5997_s17 + $0x60] sm:$0xff] %v1816_v32  ;;  %v2044_v24 = vor.u32 %v2043_v25, %v2042_v58  ;;  %v2052_v50 = vshrl.u32 %v8654_v4, %v2040_v12  ;;  %v2054_v41 = vshll.u32 %v8654_v4, %v2039_v6 }
 0x1d8   : > { %v2055_v42 = vshrl.u32 %v8655_v49, %v2040_v12  ;;  %v6836_v21 = vsub.s32 %v1981_v19, %v1984_v52  ;;  %v2047_v20 = vor.u32 %v2046_v46, %v2045_v60  ;;  %v2050_v26 = vor.u32 %v2049_v63, %v2048_v36 }
 0x1d9   : > { %v1902_v22 = vsel %vm1819_vm2, %v1901_v43, %v1900_v8  ;;  %v2053_v39 = vor.u32 %v2052_v50, %v2051_v40  ;;  %vm2057_vm9 = vcmp.lt.s32.totalorder %v2038_v27, 1  ;;  %vm2059_vm10 = vcmp.lt.s32.totalorder %v2038_v27, 3 }
 0x1da   : > { %v1905_v28 = vsel %vm6797_vm6, %v5623_v10, %v1902_v22  ;;  %v2056_v61 = vor.u32 %v2055_v42, %v2054_v41  ;;  %v1987_v11 = vsub.s32 0, %v6836_v21  ;;  %v2133_v6 = vshrl.u32 %v2132_v57, 23 }
 0x1db   : > { %5080 = vcosq.f32 %v1905_v28  ;;  %vm2058_vm11 = vcmp.lt.s32.totalorder %v2038_v27, 2  ;;  %vm2060_vm12 = vcmp.lt.s32.totalorder %v2038_v27, 4  ;;  %v2061_v48 = vsel %vm2057_vm9, %v2041_v1, %v2044_v24 }
 0x1dc   : > { %5082 = vsinq.f32 %v1905_v28  ;;  %v4707_v17 = vmin.u32 %v1987_v11, %v6836_v21  ;;  %v2062_v2 = vsel %vm2060_vm12, %v2050_v26, 2102212464  ;;  %v2065_v45 = vsel %vm2057_vm9, %v2044_v24, %v2047_v20 }
 0x1dd   : > { %v2066_v30 = vsel %vm2060_vm12, %v2053_v39, 920167782  ;;  %v2063_v9 = vsel %vm2059_vm10, %v2047_v20, %v2062_v2  ;;  %v2069_v19 = vsel %vm2057_vm9, %v2047_v20, %v2050_v26  ;;  %v2070_v34 = vsel %vm2060_vm12, %v2056_v61, 1326507024 }
 0x1de   : > { %v2067_v33 = vsel %vm2059_vm10, %v2050_v26, %v2066_v30  ;;  %v1910_v12 = vadd.s32 3, %v1906_v5  ;;  %v1989_v58 = vclz %v4707_v17  ;;  %v2007_v37 = vsub.s32 4, %v1983_v31 }
 0x1df   : > { %v2064_v35 = vsel %vm2058_vm11, %v2061_v48, %v2063_v9  ;;  %v2068_v0 = vsel %vm2058_vm11, %v2065_v45, %v2067_v33  ;;  %v2071_v60 = vsel %vm2059_vm10, %v2053_v39, %v2070_v34  ;;  %v4714_v29 = vadd.s32 4294967169, %v2133_v6 }
 0x1e0   : > { %v4708_v25 = vadd.s32 4294967294, %v1989_v58  ;;  %v2072_v46 = vsel %vm2058_vm11, %v2069_v19, %v2071_v60  ;;  %v6850_v36 = vmul.u32.u64.low %v6826_v7, %v2068_v0  ;;  %v6851_v53 = vmul.u32.u64.high %v6826_v7, %v2068_v0, %v6850_v36 }
 0x1e1   : > { %vm1923_vm13 = vcmp.lt.s32.totalorder %v5626_v14, 0  ;;  %v6856_v5 = vmul.u32.u64.low %v6826_v7, %v2072_v46  ;;  %v6857_v8 = vmul.u32.u64.high %v6826_v7, %v2072_v46, %v6856_v5  ;;  %v2129_v63 = vand.u32 2147483647, %v5632_v15 }
 0x1e2   : > { %vm1909_vm14 = vweird.f32 %v5623_v10  ;;  %v1977_v32 = vadd.s32 %v6782_v3, %v6780_v38  ;;  %vm4709_vm15 = vcmp.lt.s32.totalorder %v4708_v25, 0  ;;  %v2008_v27 = vsel %vm1923_vm13, %v2007_v37, %v1983_v31 }
 0x1e3   : > { %v2139_v40 = vadd.s32 1, %v4714_v29  ;;  %v1911_v43 = vand.u32 3, %v1910_v12  ;;  %vm6867_vm0 = vcmp.le.f32.partialorder %v1921_v44, 0.7853982  ;;  %v1992_v1 = vsel %vm4709_vm15, 0, %v4708_v25 }
 0x1e4   : > { %v2080_v57 = vmul.u32 %v6826_v7, %v2064_v35  ;;  %v1993_v24 = vsub.s32 32, %v1992_v1  ;;  %v1994_v50 = vshll.u32 %v6836_v21, %v1992_v1  ;;  %v1997_v41 = vsub.s32 4294967266, %v1992_v1 }
 0x1e5   : > { %v2083_v38 = vadd.s32 1, %v6851_v53  ;;  %v2010_v3 = vsel %vm6867_vm0, 0, %v2008_v27  ;;  %vm2082_vm1 = vc.u32 %v6857_v8, %v6850_v36  ;;  %v2136_v44 = vand.u32 8388607, %v2129_v63 }
 0x1e6   : > { %vm2140_vm2 = vcmp.gt.s32.totalorder %v2139_v40, 0  ;;  %v1995_v31 = vshrl.u32 %v1977_v32, %v1993_v24  ;;  %v1998_v42 = vadd.s32 127, %v1997_v41  ;;  %vm1912_vm3 = vcmp.lt.s32.totalorder %v1911_v43, 2 }
 0x1e7   : > { %v2084_v7 = vsel %vm2082_vm1, %v2083_v38, %v6851_v53  ;;  %v2141_v22 = vsel %vm2140_vm2, %v2139_v40, 0  ;;  %vm1916_vm4 = vcmp.eq.s32.totalorder %v1911_v43, 2  ;;  %vm1913_vm5 = vcmp.eq.s32.totalorder %v1911_v43, 0 }
 0x1e8   : > { %v5081_v20 = vpop.eup %5080  ;;  %v2085_v21 = vadd.s32 %v2084_v7, %v2080_v57  ;;  %v2143_v26 = vand.u32 31, %v2141_v22  ;;  %v1996_v61 = vor.u32 %v1995_v31, %v1994_v50  ;;  %v1999_v11 = vshll.u32 %v1998_v42, 23 }
 0x1e9   : > { %v5083_v28 = vpop.eup %5082  ;;  %v1917_v39 = vxor.u32 2147483648, %v5081_v20  ;;  %v6881_v48 = vadd.s32 3, %v2010_v3  ;;  %v2137_v33 = vor.u32 8388608, %v2136_v44  ;;  %v2142_v12 = vshrl.u32 %v2141_v22, 5 }
 0x1ea   : > { %v1914_v6 = vxor.u32 2147483648, %v5083_v28  ;;  %v2086_v17 = vadd.s32 536870912, %v2085_v21  ;;  %v2144_v2 = vsub.s32 32, %v2143_v26  ;;  %v2000_v30 = vor.u32 4788187, %v1999_v11 }
 0x1eb   : > { %v1918_v45 = vsel %vm1916_vm4, %v1917_v39, %v5083_v28  ;;  %v2003_v9 = vcvt.s32.f32 %v1996_v61  ;;  %v2236_v58 = vand.u32 2139095040, %v5635_v51  ;;  %v2146_v0 = vshll.u32 %v8659_v62, %v2143_v26 }
 0x1ec   : > { %v1915_v19 = vsel %vm1913_vm5, %v5081_v20, %v1914_v6  ;;  %v6883_v34 = vshrl.u32 %v2086_v17, 30  ;;  %v2001_v35 = vand.u32 2147483647, %v2000_v30  ;;  %v2149_v60 = vshll.u32 %v8651_v13, %v2143_v26 }
 0x1ed   : > { %v1919_v37 = vsel %vm1912_vm3, %v1915_v19, %v1918_v45  ;;  %v2147_v46 = vshrl.u32 %v8651_v13, %v2144_v2  ;;  %v2150_v53 = vshrl.u32 %v8652_v54, %v2144_v2  ;;  %v2152_v32 = vshll.u32 %v8652_v54, %v2143_v26 }
 0x1ee   : > { %v1920_v29 = vsel %vm1909_vm14, nan, %v1919_v37  ;;  %v2088_v25 = vshll.u32 %v6883_v34, 30  ;;  %v2004_v5 = vmul.f32 %v2003_v9, %v2001_v35  ;;  %v2153_v27 = vshrl.u32 %v8653_v16, %v2144_v2 }
 0x1ef   : > { %v2155_v40 = vshll.u32 %v8653_v16, %v2143_v26  ;;  %4534 = vst [vmem:[%s5997_s17 + $0x68] sm:$0xff] %v1920_v29  ;;  %v2156_v1 = vshrl.u32 %v8654_v4, %v2144_v2  ;;  %v2158_v10 = vshll.u32 %v8654_v4, %v2143_v26  ;;  %v2233_v57 = vand.u32 2147483647, %v5635_v51 }
 0x1f0   : > { %v6898_v43 = vsub.s32 %v2085_v21, %v2088_v25  ;;  %v2005_v24 = vxor.u32 2147483648, %v2004_v5  ;;  %v2159_v50 = vshrl.u32 %v8655_v49, %v2144_v2  ;;  %v6904_v41 = vshll.u32 %v2137_v33, 8 }
 0x1f1   : > { %v2237_v38 = vshrl.u32 %v2236_v58, 23  ;;  %v2145_v44 = vshrl.u32 %v8659_v62, %v2144_v2  ;;  %v2148_v31 = vor.u32 %v2147_v46, %v2146_v0  ;;  %v2151_v42 = vor.u32 %v2150_v53, %v2149_v60 }
 0x1f2   : > { %v2091_v3 = vsub.s32 0, %v6898_v43  ;;  %v2006_v7 = vsel %vm1923_vm13, %v2005_v24, %v2004_v5  ;;  %v2154_v22 = vor.u32 %v2153_v27, %v2152_v32  ;;  %v2157_v20 = vor.u32 %v2156_v1, %v2155_v40 }
 0x1f3   : > { %vm2161_vm6 = vcmp.lt.s32.totalorder %v2142_v12, 1  ;;  %v2009_v21 = vsel %vm6867_vm0, %v5626_v14, %v2006_v7  ;;  %v2160_v28 = vor.u32 %v2159_v50, %v2158_v10  ;;  %vm2164_vm7 = vcmp.lt.s32.totalorder %v2142_v12, 4 }
 0x1f4   : > { %v4711_v26 = vmin.u32 %v2091_v3, %v6898_v43  ;;  %5084 = vcosq.f32 %v2009_v21  ;;  %vm2162_vm8 = vcmp.lt.s32.totalorder %v2142_v12, 2  ;;  %vm2163_vm9 = vcmp.lt.s32.totalorder %v2142_v12, 3 }
 0x1f5   : > { %v2166_v39 = vsel %vm2164_vm7, %v2154_v22, 2102212464  ;;  %5086 = vsinq.f32 %v2009_v21  ;;  %v2165_v11 = vsel %vm2161_vm6, %v2145_v44, %v2148_v31  ;;  %v2169_v6 = vsel %vm2161_vm6, %v2148_v31, %v2151_v42 }
 0x1f6   : > { %v2093_v61 = vclz %v4711_v26  ;;  %v2081_v17 = vadd.s32 %v6850_v36, %v6857_v8  ;;  %v2167_v52 = vsel %vm2163_vm9, %v2151_v42, %v2166_v39  ;;  %v2170_v2 = vsel %vm2164_vm7, %v2157_v20, 920167782 }
 0x1f7   : > { %v2173_v45 = vsel %vm2161_vm6, %v2151_v42, %v2154_v22  ;;  %v2171_v9 = vsel %vm2163_vm9, %v2154_v22, %v2170_v2  ;;  %v2174_v33 = vsel %vm2164_vm7, %v2160_v28, 1326507024  ;;  %v2240_v19 = vand.u32 8388607, %v2233_v57 }
 0x1f8   : > { %v4712_v30 = vadd.s32 4294967294, %v2093_v61  ;;  %v2168_v58 = vsel %vm2162_vm8, %v2165_v11, %v2167_v52  ;;  %v2172_v37 = vsel %vm2162_vm8, %v2169_v6, %v2171_v9  ;;  %v2175_v35 = vsel %vm2163_vm9, %v2157_v20, %v2174_v33 }
 0x1f9   : > { %v4718_v0 = vadd.s32 4294967169, %v2237_v38  ;;  %v2176_v36 = vsel %vm2162_vm8, %v2173_v45, %v2175_v35  ;;  %v6928_v8 = vmul.u32.u64.low %v6904_v41, %v2172_v37  ;;  %v6929_v60 = vmul.u32.u64.high %v6904_v41, %v2172_v37, %v6928_v8 }
 0x1fa   : > { %vm4713_vm10 = vcmp.lt.s32.totalorder %v4712_v30, 0  ;;  %v2111_v25 = vsub.s32 4, %v6883_v34  ;;  %v6934_v46 = vmul.u32.u64.low %v6904_v41, %v2176_v36  ;;  %v6935_v53 = vmul.u32.u64.high %v6904_v41, %v2176_v36, %v6934_v46 }
 0x1fb   : > { %v2096_v29 = vsel %vm4713_vm10, 0, %v4712_v30  ;;  %v2243_v40 = vadd.s32 1, %v4718_v0  ;;  %vm2013_vm11 = vweird.f32 %v5626_v14  ;;  %v2015_v12 = vand.u32 3, %v6881_v48 }
 0x1fc   : > { %v2097_v5 = vsub.s32 32, %v2096_v29  ;;  %v2098_v32 = vshll.u32 %v6898_v43, %v2096_v29  ;;  %v2101_v27 = vsub.s32 4294967266, %v2096_v29  ;;  %vm2027_vm12 = vcmp.lt.s32.totalorder %v5629_v47, 0 }
 0x1fd   : > { %v2184_v1 = vmul.u32 %v6904_v41, %v2168_v58  ;;  %v2187_v50 = vadd.s32 1, %v6929_v60  ;;  %vm2244_vm13 = vcmp.gt.s32.totalorder %v2243_v40, 0  ;;  %v6946_v38 = vsel %vm2027_vm12, %v2111_v25, %v6883_v34 }
 0x1fe   : > { %v2099_v10 = vshrl.u32 %v2081_v17, %v2097_v5  ;;  %v2102_v24 = vadd.s32 127, %v2101_v27  ;;  %vm2186_vm14 = vc.u32 %v6935_v53, %v6928_v8  ;;  %v2241_v43 = vor.u32 8388608, %v2240_v19 }
 0x1ff   : > { %v2245_v3 = vsel %vm2244_vm13, %v2243_v40, 0  ;;  %vm6952_vm15 = vcmp.le.f32.partialorder %v2025_v23, 0.7853982  ;;  %v2188_v31 = vsel %vm2186_vm14, %v2187_v50, %v6929_v60  ;;  %vm2016_vm0 = vcmp.lt.s32.totalorder %v2015_v12, 2 }
 0x200   : > { %v2100_v41 = vor.u32 %v2099_v10, %v2098_v32  ;;  %v2103_v44 = vshll.u32 %v2102_v24, 23  ;;  %vm2017_vm1 = vcmp.eq.s32.totalorder %v2015_v12, 0  ;;  %v2189_v42 = vadd.s32 %v2188_v31, %v2184_v1 }
 0x201   : > { %v2247_v34 = vand.u32 31, %v2245_v3  ;;  %v5085_v7 = vpop.eup %5084  ;;  %vm2020_vm2 = vcmp.eq.s32.totalorder %v2015_v12, 2  ;;  %v2114_v21 = vsel %vm6952_vm15, 0, %v6946_v38  ;;  %v6960_v61 = vshll.u32 %v2241_v43, 8 }
 0x202   : > { %v2104_v22 = vor.u32 4788187, %v2103_v44  ;;  %v2107_v20 = vcvt.s32.f32 %v2100_v41  ;;  %v5087_v23 = vpop.eup %5086  ;;  %v2021_v26 = vxor.u32 2147483648, %v5085_v7  ;;  %v2190_v28 = vadd.s32 536870912, %v2189_v42 }
 0x203   : > { %v2248_v39 = vsub.s32 32, %v2247_v34  ;;  %v2018_v11 = vxor.u32 2147483648, %v5087_v23  ;;  %v2246_v17 = vshrl.u32 %v2245_v3, 5  ;;  %v2340_v52 = vand.u32 2139095040, %v5638_v18 }
 0x204   : > { %v2105_v6 = vand.u32 2147483647, %v2104_v22  ;;  %v2022_v2 = vsel %vm2020_vm2, %v2021_v26, %v5087_v23  ;;  %v2191_v45 = vshrl.u32 %v2190_v28, 30  ;;  %v2250_v30 = vshll.u32 %v8659_v62, %v2247_v34 }
 0x205   : > { %v2251_v9 = vshrl.u32 %v8651_v13, %v2248_v39  ;;  %v2019_v33 = vsel %vm2017_vm1, %v5085_v7, %v2018_v11  ;;  %v2253_v58 = vshll.u32 %v8651_v13, %v2247_v34  ;;  %v2254_v37 = vshrl.u32 %v8652_v54, %v2248_v39 }
 0x206   : > { %v2108_v19 = vmul.f32 %v2107_v20, %v2105_v6  ;;  %v2023_v35 = vsel %vm2016_vm0, %v2019_v33, %v2022_v2  ;;  %v2192_v0 = vshll.u32 %v2191_v45, 30  ;;  %v2256_v36 = vshll.u32 %v8652_v54, %v2247_v34 }
 0x207   : > { %v2257_v60 = vshrl.u32 %v8653_v16, %v2248_v39  ;;  %v2024_v29 = vsel %vm2013_vm11, nan, %v2023_v35  ;;  %vm2131_vm3 = vcmp.lt.s32.totalorder %v5632_v15, 0  ;;  %v2249_v46 = vshrl.u32 %v8659_v62, %v2248_v39 }
 0x208   : > { %v2109_v25 = vxor.u32 2147483648, %v2108_v19  ;;  %vm2265_vm4 = vcmp.lt.s32.totalorder %v2246_v17, 1  ;;  %v6975_v5 = vsub.s32 %v2189_v42, %v2192_v0  ;;  %v2252_v32 = vor.u32 %v2251_v9, %v2250_v30  ;;  %4535 = vst [vmem:[%s5997_s17 + $0x70] sm:$0xff] %v2024_v29 }
 0x209   : > { %v2259_v27 = vshll.u32 %v8653_v16, %v2247_v34  ;;  %v2260_v40 = vshrl.u32 %v8654_v4, %v2248_v39  ;;  %v2255_v1 = vor.u32 %v2254_v37, %v2253_v58  ;;  %v2262_v14 = vshll.u32 %v8654_v4, %v2247_v34 }
 0x20a   : > { %v2110_v12 = vsel %vm2027_vm12, %v2109_v25, %v2108_v19  ;;  %v2263_v10 = vshrl.u32 %v8655_v49, %v2248_v39  ;;  %vm6989_vm5 = vcmp.le.f32.partialorder %v2129_v63, 0.7853982  ;;  %v2195_v38 = vsub.s32 0, %v6975_v5 }
 0x20b   : > { %v2113_v24 = vsel %vm6952_vm15, %v5629_v47, %v2110_v12  ;;  %v2258_v43 = vor.u32 %v2257_v60, %v2256_v36  ;;  %v2261_v3 = vor.u32 %v2260_v40, %v2259_v27  ;;  %vm2268_vm6 = vcmp.lt.s32.totalorder %v2246_v17, 4 }
 0x20c   : > { %5088 = vcosq.f32 %v2113_v24  ;;  %v2264_v41 = vor.u32 %v2263_v10, %v2262_v14  ;;  %v2341_v44 = vshrl.u32 %v2340_v52, 23  ;;  %v4715_v31 = vmin.u32 %v2195_v38, %v6975_v5 }
 0x20d   : > { %5090 = vsinq.f32 %v2113_v24  ;;  %v2215_v42 = vsub.s32 4, %v2191_v45  ;;  %vm2267_vm7 = vcmp.lt.s32.totalorder %v2246_v17, 3  ;;  %vm2266_vm8 = vcmp.lt.s32.totalorder %v2246_v17, 2 }
 0x20e   : > { %v2270_v48 = vsel %vm2268_vm6, %v2258_v43, 2102212464  ;;  %v2273_v63 = vsel %vm2265_vm4, %v2252_v32, %v2255_v1  ;;  %v2274_v34 = vsel %vm2268_vm6, %v2261_v3, 920167782  ;;  %v2118_v7 = vadd.s32 3, %v2114_v21 }
 0x20f   : > { %v2197_v22 = vclz %v4715_v31  ;;  %v2269_v20 = vsel %vm2265_vm4, %v2249_v46, %v2252_v32  ;;  %v2277_v23 = vsel %vm2265_vm4, %v2255_v1, %v2258_v43  ;;  %v2271_v26 = vsel %vm2267_vm7, %v2255_v1, %v2270_v48 }
 0x210   : > { %v2275_v28 = vsel %vm2267_vm7, %v2258_v43, %v2274_v34  ;;  %v2278_v39 = vsel %vm2268_vm6, %v2264_v41, 1326507024  ;;  %v4722_v11 = vadd.s32 4294967169, %v2341_v44  ;;  %v2216_v52 = vsel %vm2131_vm3, %v2215_v42, %v2191_v45 }
 0x211   : > { %v4716_v6 = vadd.s32 4294967294, %v2197_v22  ;;  %v2276_v2 = vsel %vm2266_vm8, %v2273_v63, %v2275_v28  ;;  %v2279_v21 = vsel %vm2267_vm7, %v2261_v3, %v2278_v39  ;;  %v2272_v30 = vsel %vm2266_vm8, %v2269_v20, %v2271_v26 }
 0x212   : > { %v2280_v9 = vsel %vm2266_vm8, %v2277_v23, %v2279_v21  ;;  %v7010_v33 = vmul.u32.u64.low %v6960_v61, %v2276_v2  ;;  %v7011_v19 = vmul.u32.u64.high %v6960_v61, %v2276_v2, %v7010_v33  ;;  %v2185_v58 = vadd.s32 %v6928_v8, %v6935_v53 }
 0x213   : > { %vm4717_vm9 = vcmp.lt.s32.totalorder %v4716_v6, 0  ;;  %v7017_v37 = vmul.u32.u64.low %v6960_v61, %v2280_v9  ;;  %v7018_v45 = vmul.u32.u64.high %v6960_v61, %v2280_v9, %v7017_v37  ;;  %v2119_v35 = vand.u32 3, %v2118_v7 }
 0x214   : > { %v2200_v0 = vsel %vm4717_vm9, 0, %v4716_v6  ;;  %v2218_v36 = vsel %vm6989_vm5, 0, %v2216_v52  ;;  %v2347_v17 = vadd.s32 1, %v4722_v11  ;;  %v2288_v46 = vmul.u32 %v6960_v61, %v2272_v30 }
 0x215   : > { %v2201_v60 = vsub.s32 32, %v2200_v0  ;;  %v2202_v29 = vshll.u32 %v6975_v5, %v2200_v0  ;;  %v2205_v25 = vsub.s32 4294967266, %v2200_v0  ;;  %v2291_v32 = vadd.s32 1, %v7011_v19 }
 0x216   : > { %vm2348_vm10 = vcmp.gt.s32.totalorder %v2347_v17, 0  ;;  %vm2117_vm11 = vweird.f32 %v5629_v47  ;;  %vm2290_vm12 = vc.u32 %v7018_v45, %v7010_v33  ;;  %v2222_v27 = vadd.s32 3, %v2218_v36 }
 0x217   : > { %v2203_v8 = vshrl.u32 %v2185_v58, %v2201_v60  ;;  %v2206_v53 = vadd.s32 127, %v2205_v25  ;;  %v2292_v40 = vsel %vm2290_vm12, %v2291_v32, %v7011_v19  ;;  %v2337_v12 = vand.u32 2147483647, %v5638_v18 }
 0x218   : > { %v2349_v1 = vsel %vm2348_vm10, %v2347_v17, 0  ;;  %vm2124_vm13 = vcmp.eq.s32.totalorder %v2119_v35, 2  ;;  %v2293_v10 = vadd.s32 %v2292_v40, %v2288_v46  ;;  %vm2120_vm14 = vcmp.lt.s32.totalorder %v2119_v35, 2 }
 0x219   : > { %v5089_v5 = vpop.eup %5088  ;;  %v2204_v14 = vor.u32 %v2203_v8, %v2202_v29  ;;  %v2207_v61 = vshll.u32 %v2206_v53, 23  ;;  %vm2121_vm15 = vcmp.eq.s32.totalorder %v2119_v35, 0  ;;  %v2351_v43 = vand.u32 31, %v2349_v1 }
 0x21a   : > { %v5091_v24 = vpop.eup %5090  ;;  %v2125_v38 = vxor.u32 2147483648, %v5089_v5  ;;  %v2294_v31 = vadd.s32 536870912, %v2293_v10  ;;  %v7030_v48 = vand.u32 3, %v2222_v27  ;;  %v2344_v63 = vand.u32 8388607, %v2337_v12 }
 0x21b   : > { %v2122_v3 = vxor.u32 2147483648, %v5091_v24  ;;  %v2208_v41 = vor.u32 4788187, %v2207_v61  ;;  %v2211_v44 = vcvt.s32.f32 %v2204_v14  ;;  %v2352_v34 = vsub.s32 32, %v2351_v43 }
 0x21c   : > { %v2126_v42 = vsel %vm2124_vm13, %v2125_v38, %v5091_v24  ;;  %v7034_v20 = vshrl.u32 %v2294_v31, 30  ;;  %v2354_v23 = vshll.u32 %v8659_v62, %v2351_v43  ;;  %v2357_v39 = vshll.u32 %v8651_v13, %v2351_v43 }
 0x21d   : > { %v2123_v7 = vsel %vm2121_vm15, %v5089_v5, %v2122_v3  ;;  %v2209_v22 = vand.u32 2147483647, %v2208_v41  ;;  %v2355_v28 = vshrl.u32 %v8651_v13, %v2352_v34  ;;  %v2360_v11 = vshll.u32 %v8652_v54, %v2351_v43 }
 0x21e   : > { %v2127_v26 = vsel %vm2120_vm14, %v2123_v7, %v2126_v42  ;;  %v2296_v2 = vshll.u32 %v7034_v20, 30  ;;  %v2358_v21 = vshrl.u32 %v8652_v54, %v2352_v34  ;;  %v2345_v30 = vor.u32 8388608, %v2344_v63 }
 0x21f   : > { %v2128_v6 = vsel %vm2117_vm11, nan, %v2127_v26  ;;  %v2212_v52 = vmul.f32 %v2211_v44, %v2209_v22  ;;  %v2350_v9 = vshrl.u32 %v2349_v1, 5  ;;  %v2361_v19 = vshrl.u32 %v8653_v16, %v2352_v34 }
 0x220   : > { %v2363_v58 = vshll.u32 %v8653_v16, %v2351_v43  ;;  %4536 = vst [vmem:[%s5997_s17 + $0x78] sm:$0xff] %v2128_v6  ;;  %v7048_v35 = vsub.s32 %v2293_v10, %v2296_v2  ;;  %v2364_v0 = vshrl.u32 %v8654_v4, %v2352_v34  ;;  %v2444_v47 = vand.u32 2139095040, %v5641_v55 }
 0x221   : > { %v2213_v37 = vxor.u32 2147483648, %v2212_v52  ;;  %v2353_v36 = vshrl.u32 %v8659_v62, %v2352_v34  ;;  %v2356_v17 = vor.u32 %v2355_v28, %v2354_v23  ;;  %v2366_v60 = vshll.u32 %v8654_v4, %v2351_v43 }
 0x222   : > { %v2367_v29 = vshrl.u32 %v8655_v49, %v2352_v34  ;;  %v2299_v46 = vsub.s32 0, %v7048_v35  ;;  %v2359_v32 = vor.u32 %v2358_v21, %v2357_v39  ;;  %v2362_v8 = vor.u32 %v2361_v19, %v2360_v11 }
 0x223   : > { %v2214_v25 = vsel %vm2131_vm3, %v2213_v37, %v2212_v52  ;;  %v2365_v27 = vor.u32 %v2364_v0, %v2363_v58  ;;  %vm2369_vm0 = vcmp.lt.s32.totalorder %v2350_v9, 1  ;;  %v2385_v5 = vshll.u32 %v2345_v30, 8 }
 0x224   : > { %v2217_v53 = vsel %vm6989_vm5, %v5632_v15, %v2214_v25  ;;  %v2368_v40 = vor.u32 %v2367_v29, %v2366_v60  ;;  %v4719_v1 = vmin.u32 %v2299_v46, %v7048_v35  ;;  %v2441_v14 = vand.u32 2147483647, %v5641_v55 }
 0x225   : > { %5092 = vcosq.f32 %v2217_v53  ;;  %vm2371_vm1 = vcmp.lt.s32.totalorder %v2350_v9, 3  ;;  %vm2372_vm2 = vcmp.lt.s32.totalorder %v2350_v9, 4  ;;  %v2445_v61 = vshrl.u32 %v2444_v47, 23 }
 0x226   : > { %5094 = vsinq.f32 %v2217_v53  ;;  %v2301_v10 = vclz %v4719_v1  ;;  %vm2370_vm3 = vcmp.lt.s32.totalorder %v2350_v9, 2  ;;  %v2373_v24 = vsel %vm2369_vm0, %v2353_v36, %v2356_v17 }
 0x227   : > { %v2377_v38 = vsel %vm2369_vm0, %v2356_v17, %v2359_v32  ;;  %v2374_v43 = vsel %vm2372_vm2, %v2362_v8, 2102212464  ;;  %v2378_v50 = vsel %vm2372_vm2, %v2365_v27, 920167782  ;;  %v2381_v3 = vsel %vm2369_vm0, %v2359_v32, %v2362_v8 }
 0x228   : > { %v2382_v41 = vsel %vm2372_vm2, %v2368_v40, 1326507024  ;;  %v4720_v44 = vadd.s32 4294967294, %v2301_v10  ;;  %v2375_v31 = vsel %vm2371_vm1, %v2359_v32, %v2374_v43  ;;  %v2379_v42 = vsel %vm2371_vm1, %v2362_v8, %v2378_v50 }
 0x229   : > { %v2383_v63 = vsel %vm2371_vm1, %v2365_v27, %v2382_v41  ;;  %v2289_v34 = vadd.s32 %v7010_v33, %v7018_v45  ;;  %v2380_v7 = vsel %vm2370_vm3, %v2377_v38, %v2379_v42  ;;  %v4726_v23 = vadd.s32 4294967169, %v2445_v61 }
 0x22a   : > { %v2384_v22 = vsel %vm2370_vm3, %v2381_v3, %v2383_v63  ;;  %vm4721_vm4 = vcmp.lt.s32.totalorder %v4720_v44, 0  ;;  %v2376_v26 = vsel %vm2370_vm3, %v2373_v24, %v2375_v31  ;;  %v2319_v30 = vsub.s32 4, %v7034_v20 }
 0x22b   : > { %v7068_v28 = vmul.u32.u64.low %v2385_v5, %v2384_v22  ;;  %v7069_v39 = vmul.u32.u64.high %v2385_v5, %v2384_v22, %v7068_v28  ;;  %v2304_v11 = vsel %vm4721_vm4, 0, %v4720_v44  ;;  %v2451_v2 = vadd.s32 1, %v4726_v23 }
 0x22c   : > { %v7071_v6 = vmul.u32.u64.low %v2385_v5, %v2380_v7  ;;  %v7072_v52 = vmul.u32.u64.high %v2385_v5, %v2380_v7, %v7071_v6  ;;  %v2305_v21 = vsub.s32 32, %v2304_v11  ;;  %v2306_v33 = vshll.u32 %v7048_v35, %v2304_v11 }
 0x22d   : > { %v2309_v45 = vsub.s32 4294967266, %v2304_v11  ;;  %vm2221_vm5 = vweird.f32 %v5632_v15  ;;  %vm2235_vm6 = vcmp.lt.s32.totalorder %v5635_v51, 0  ;;  %v2448_v9 = vand.u32 8388607, %v2441_v14 }
 0x22e   : > { %vm2452_vm7 = vcmp.gt.s32.totalorder %v2451_v2, 0  ;;  %v2307_v19 = vshrl.u32 %v2289_v34, %v2305_v21  ;;  %v2392_v37 = vmul.u32 %v2385_v5, %v2376_v26  ;;  %vm2394_vm8 = vc.u32 %v7069_v39, %v7071_v6 }
 0x22f   : > { %v2310_v58 = vadd.s32 127, %v2309_v45  ;;  %vm2224_vm9 = vcmp.lt.s32.totalorder %v7030_v48, 2  ;;  %vm7086_vm10 = vcmp.le.f32.partialorder %v2233_v57, 0.7853982  ;;  %v2395_v0 = vadd.s32 1, %v7072_v52 }
 0x230   : > { %v2453_v47 = vsel %vm2452_vm7, %v2451_v2, 0  ;;  %v2308_v36 = vor.u32 %v2307_v19, %v2306_v33  ;;  %v7094_v60 = vsel %vm2235_vm6, %v2319_v30, %v7034_v20  ;;  %vm2225_vm11 = vcmp.eq.s32.totalorder %v7030_v48, 0 }
 0x231   : > { %v2311_v17 = vshll.u32 %v2310_v58, 23  ;;  %v2455_v29 = vand.u32 31, %v2453_v47  ;;  %vm2228_vm12 = vcmp.eq.s32.totalorder %v7030_v48, 2  ;;  %v2396_v57 = vsel %vm2394_vm8, %v2395_v0, %v7072_v52 }
 0x232   : > { %v5093_v25 = vpop.eup %5092  ;;  %v2449_v46 = vor.u32 8388608, %v2448_v9  ;;  %v2315_v27 = vcvt.s32.f32 %v2308_v36  ;;  %v2397_v40 = vadd.s32 %v2396_v57, %v2392_v37  ;;  %v2322_v20 = vsel %vm7086_vm10, 0, %v7094_v60 }
 0x233   : > { %v5095_v32 = vpop.eup %5094  ;;  %v2229_v8 = vxor.u32 2147483648, %v5093_v25  ;;  %v2312_v53 = vor.u32 4788187, %v2311_v17  ;;  %v2456_v5 = vsub.s32 32, %v2455_v29  ;;  %v2458_v61 = vshll.u32 %v8659_v62, %v2455_v29 }
 0x234   : > { %v2226_v1 = vxor.u32 2147483648, %v5095_v32  ;;  %v2398_v38 = vadd.s32 536870912, %v2397_v40  ;;  %v2461_v43 = vshll.u32 %v8651_v13, %v2455_v29  ;;  %v2464_v44 = vshll.u32 %v8652_v54, %v2455_v29 }
 0x235   : > { %v2230_v10 = vsel %vm2228_vm12, %v2229_v8, %v5095_v32  ;;  %v2313_v24 = vand.u32 2147483647, %v2312_v53  ;;  %v2459_v3 = vshrl.u32 %v8651_v13, %v2456_v5  ;;  %v2462_v41 = vshrl.u32 %v8652_v54, %v2456_v5 }
 0x236   : > { %v2227_v50 = vsel %vm2225_vm11, %v5093_v25, %v2226_v1  ;;  %v2399_v63 = vshrl.u32 %v2398_v38, 30  ;;  %v2465_v34 = vshrl.u32 %v8653_v16, %v2456_v5  ;;  %v2454_v22 = vshrl.u32 %v2453_v47, 5 }
 0x237   : > { %v2231_v31 = vsel %vm2224_vm9, %v2227_v50, %v2230_v10  ;;  %v2316_v42 = vmul.f32 %v2315_v27, %v2313_v24  ;;  %v2467_v23 = vshll.u32 %v8653_v16, %v2455_v29  ;;  %v7115_v26 = vshll.u32 %v2449_v46, 8 }
 0x238   : > { %v2232_v7 = vsel %vm2221_vm5, nan, %v2231_v31  ;;  %v2400_v11 = vshll.u32 %v2399_v63, 30  ;;  %v2457_v52 = vshrl.u32 %v8659_v62, %v2456_v5  ;;  %v2548_v2 = vand.u32 2139095040, %v5644_v56 }
 0x239   : > { %v2317_v28 = vxor.u32 2147483648, %v2316_v42  ;;  %4537 = vst [vmem:[%s5997_s17 + $0x80] sm:$0xff] %v2232_v7  ;;  %v2460_v48 = vor.u32 %v2459_v3, %v2458_v61  ;;  %v2468_v21 = vshrl.u32 %v8654_v4, %v2456_v5  ;;  %v2470_v33 = vshll.u32 %v8654_v4, %v2455_v29 }
 0x23a   : > { %v2471_v15 = vshrl.u32 %v8655_v49, %v2456_v5  ;;  %v7125_v30 = vsub.s32 %v2397_v40, %v2400_v11  ;;  %v2463_v9 = vor.u32 %v2462_v41, %v2461_v43  ;;  %v2466_v19 = vor.u32 %v2465_v34, %v2464_v44 }
 0x23b   : > { %v2318_v45 = vsel %vm2235_vm6, %v2317_v28, %v2316_v42  ;;  %v2469_v37 = vor.u32 %v2468_v21, %v2467_v23  ;;  %vm2473_vm13 = vcmp.lt.s32.totalorder %v2454_v22, 1  ;;  %vm2475_vm14 = vcmp.lt.s32.totalorder %v2454_v22, 3 }
 0x23c   : > { %v2321_v58 = vsel %vm7086_vm10, %v5635_v51, %v2318_v45  ;;  %v2472_v0 = vor.u32 %v2471_v15, %v2470_v33  ;;  %v2403_v47 = vsub.s32 0, %v7125_v30  ;;  %v2549_v36 = vshrl.u32 %v2548_v2, 23 }
 0x23d   : > { %5096 = vcosq.f32 %v2321_v58  ;;  %vm2474_vm15 = vcmp.lt.s32.totalorder %v2454_v22, 2  ;;  %vm2476_vm0 = vcmp.lt.s32.totalorder %v2454_v22, 4  ;;  %v2477_v17 = vsel %vm2473_vm13, %v2457_v52, %v2460_v48 }
 0x23e   : > { %5098 = vsinq.f32 %v2321_v58  ;;  %v4723_v60 = vmin.u32 %v2403_v47, %v7125_v30  ;;  %v2478_v29 = vsel %vm2476_vm0, %v2466_v19, 2102212464  ;;  %v2481_v25 = vsel %vm2473_vm13, %v2460_v48, %v2463_v9 }
 0x23f   : > { %v2482_v57 = vsel %vm2476_vm0, %v2469_v37, 920167782  ;;  %v2479_v35 = vsel %vm2475_vm14, %v2463_v9, %v2478_v29  ;;  %v2485_v32 = vsel %vm2473_vm13, %v2463_v9, %v2466_v19  ;;  %v2486_v8 = vsel %vm2476_vm0, %v2472_v0, 1326507024 }
 0x240   : > { %v2483_v46 = vsel %vm2475_vm14, %v2466_v19, %v2482_v57  ;;  %v2326_v53 = vadd.s32 3, %v2322_v20  ;;  %v2405_v27 = vclz %v4723_v60  ;;  %v2423_v40 = vsub.s32 4, %v2399_v63 }
 0x241   : > { %v2480_v1 = vsel %vm2474_vm15, %v2477_v17, %v2479_v35  ;;  %v2484_v5 = vsel %vm2474_vm15, %v2481_v25, %v2483_v46  ;;  %v2487_v61 = vsel %vm2475_vm14, %v2469_v37, %v2486_v8  ;;  %v4730_v10 = vadd.s32 4294967169, %v2549_v36 }
 0x242   : > { %v4724_v24 = vadd.s32 4294967294, %v2405_v27  ;;  %v2488_v38 = vsel %vm2474_vm15, %v2485_v32, %v2487_v61  ;;  %v7139_v43 = vmul.u32.u64.low %v7115_v26, %v2484_v5  ;;  %v7140_v50 = vmul.u32.u64.high %v7115_v26, %v2484_v5, %v7139_v43 }
 0x243   : > { %vm2339_vm1 = vcmp.lt.s32.totalorder %v5638_v18, 0  ;;  %v7145_v20 = vmul.u32.u64.low %v7115_v26, %v2488_v38  ;;  %v7146_v3 = vmul.u32.u64.high %v7115_v26, %v2488_v38, %v7145_v20  ;;  %v2545_v41 = vand.u32 2147483647, %v5644_v56 }
 0x244   : > { %vm2325_vm2 = vweird.f32 %v5635_v51  ;;  %v2393_v44 = vadd.s32 %v7071_v6, %v7069_v39  ;;  %vm4725_vm3 = vcmp.lt.s32.totalorder %v4724_v24, 0  ;;  %v2424_v31 = vsel %vm2339_vm1, %v2423_v40, %v2399_v63 }
 0x245   : > { %v2555_v42 = vadd.s32 1, %v4730_v10  ;;  %v2327_v34 = vand.u32 3, %v2326_v53  ;;  %vm7156_vm4 = vcmp.le.f32.partialorder %v2337_v12, 0.7853982  ;;  %v2408_v22 = vsel %vm4725_vm3, 0, %v4724_v24 }
 0x246   : > { %v2496_v23 = vmul.u32 %v7115_v26, %v2480_v1  ;;  %v2409_v28 = vsub.s32 32, %v2408_v22  ;;  %v2410_v11 = vshll.u32 %v7125_v30, %v2408_v22  ;;  %v2413_v52 = vsub.s32 4294967266, %v2408_v22 }
 0x247   : > { %v2499_v39 = vadd.s32 1, %v7140_v50  ;;  %v2426_v6 = vsel %vm7156_vm4, 0, %v2424_v31  ;;  %vm2498_vm5 = vc.u32 %v7146_v3, %v7139_v43  ;;  %v2552_v12 = vand.u32 8388607, %v2545_v41 }
 0x248   : > { %vm2556_vm6 = vcmp.gt.s32.totalorder %v2555_v42, 0  ;;  %v2411_v63 = vshrl.u32 %v2393_v44, %v2409_v28  ;;  %v2414_v2 = vadd.s32 127, %v2413_v52  ;;  %vm2328_vm7 = vcmp.lt.s32.totalorder %v2327_v34, 2 }
 0x249   : > { %v2500_v26 = vsel %vm2498_vm5, %v2499_v39, %v7140_v50  ;;  %v2557_v48 = vsel %vm2556_vm6, %v2555_v42, 0  ;;  %vm2332_vm8 = vcmp.eq.s32.totalorder %v2327_v34, 2  ;;  %vm2329_vm9 = vcmp.eq.s32.totalorder %v2327_v34, 0 }
 0x24a   : > { %v5097_v21 = vpop.eup %5096  ;;  %v2501_v33 = vadd.s32 %v2500_v26, %v2496_v23  ;;  %v2559_v15 = vand.u32 31, %v2557_v48  ;;  %v2412_v9 = vor.u32 %v2411_v63, %v2410_v11  ;;  %v2415_v19 = vshll.u32 %v2414_v2, 23 }
 0x24b   : > { %v5099_v45 = vpop.eup %5098  ;;  %v2333_v30 = vxor.u32 2147483648, %v5097_v21  ;;  %v7170_v37 = vadd.s32 3, %v2426_v6  ;;  %v2553_v29 = vor.u32 8388608, %v2552_v12  ;;  %v2558_v35 = vshrl.u32 %v2557_v48, 5 }
 0x24c   : > { %v2330_v58 = vxor.u32 2147483648, %v5099_v45  ;;  %v2502_v0 = vadd.s32 536870912, %v2501_v33  ;;  %v2560_v47 = vsub.s32 32, %v2559_v15  ;;  %v2416_v17 = vor.u32 4788187, %v2415_v19 }
 0x24d   : > { %v2334_v36 = vsel %vm2332_vm8, %v2333_v30, %v5099_v45  ;;  %v2419_v60 = vcvt.s32.f32 %v2412_v9  ;;  %v2652_v46 = vand.u32 2139095040, %v5647_v59  ;;  %v2562_v53 = vshll.u32 %v8659_v62, %v2559_v15 }
 0x24e   : > { %v2331_v25 = vsel %vm2329_vm9, %v5097_v21, %v2330_v58  ;;  %v7172_v57 = vshrl.u32 %v2502_v0, 30  ;;  %v2417_v8 = vand.u32 2147483647, %v2416_v17  ;;  %v2565_v27 = vshll.u32 %v8651_v13, %v2559_v15 }
 0x24f   : > { %v2335_v32 = vsel %vm2328_vm7, %v2331_v25, %v2334_v36  ;;  %v2563_v5 = vshrl.u32 %v8651_v13, %v2560_v47  ;;  %v2566_v61 = vshrl.u32 %v8652_v54, %v2560_v47  ;;  %v2568_v24 = vshll.u32 %v8652_v54, %v2559_v15 }
 0x250   : > { %v2336_v40 = vsel %vm2325_vm2, nan, %v2335_v32  ;;  %v2504_v1 = vshll.u32 %v7172_v57, 30  ;;  %v2420_v10 = vmul.f32 %v2419_v60, %v2417_v8  ;;  %v2569_v38 = vshrl.u32 %v8653_v16, %v2560_v47 }
 0x251   : > { %v2571_v50 = vshll.u32 %v8653_v16, %v2559_v15  ;;  %4538 = vst [vmem:[%s5997_s17 + $0x88] sm:$0xff] %v2336_v40  ;;  %v2572_v44 = vshrl.u32 %v8654_v4, %v2560_v47  ;;  %v2574_v51 = vshll.u32 %v8654_v4, %v2559_v15  ;;  %v2649_v31 = vand.u32 2147483647, %v5647_v59 }
 0x252   : > { %v7187_v20 = vsub.s32 %v2501_v33, %v2504_v1  ;;  %v2421_v42 = vxor.u32 2147483648, %v2420_v10  ;;  %v2575_v34 = vshrl.u32 %v8655_v49, %v2560_v47  ;;  %v7193_v22 = vshll.u32 %v2553_v29, 8 }
 0x253   : > { %v2653_v23 = vshrl.u32 %v2652_v46, 23  ;;  %v2561_v11 = vshrl.u32 %v8659_v62, %v2560_v47  ;;  %v2564_v52 = vor.u32 %v2563_v5, %v2562_v53  ;;  %v2567_v39 = vor.u32 %v2566_v61, %v2565_v27 }
 0x254   : > { %v2507_v28 = vsub.s32 0, %v7187_v20  ;;  %v2422_v6 = vsel %vm2339_vm1, %v2421_v42, %v2420_v10  ;;  %v2570_v12 = vor.u32 %v2569_v38, %v2568_v24  ;;  %v2573_v63 = vor.u32 %v2572_v44, %v2571_v50 }
 0x255   : > { %vm2577_vm10 = vcmp.lt.s32.totalorder %v2558_v35, 1  ;;  %v2425_v2 = vsel %vm7156_vm4, %v5638_v18, %v2422_v6  ;;  %v2576_v48 = vor.u32 %v2575_v34, %v2574_v51  ;;  %vm2580_vm11 = vcmp.lt.s32.totalorder %v2558_v35, 4 }
 0x256   : > { %v4727_v26 = vmin.u32 %v2507_v28, %v7187_v20  ;;  %5100 = vcosq.f32 %v2425_v2  ;;  %vm2578_vm12 = vcmp.lt.s32.totalorder %v2558_v35, 2  ;;  %vm2579_vm13 = vcmp.lt.s32.totalorder %v2558_v35, 3 }
 0x257   : > { %v2582_v21 = vsel %vm2580_vm11, %v2570_v12, 2102212464  ;;  %5102 = vsinq.f32 %v2425_v2  ;;  %v2581_v15 = vsel %vm2577_vm10, %v2561_v11, %v2564_v52  ;;  %v2585_v45 = vsel %vm2577_vm10, %v2564_v52, %v2567_v39 }
 0x258   : > { %v2509_v33 = vclz %v4727_v26  ;;  %v2497_v30 = vadd.s32 %v7139_v43, %v7146_v3  ;;  %v2583_v7 = vsel %vm2579_vm13, %v2567_v39, %v2582_v21  ;;  %v2586_v9 = vsel %vm2580_vm11, %v2573_v63, 920167782 }
 0x259   : > { %v2589_v19 = vsel %vm2577_vm10, %v2567_v39, %v2570_v12  ;;  %v2587_v0 = vsel %vm2579_vm13, %v2570_v12, %v2586_v9  ;;  %v2590_v47 = vsel %vm2580_vm11, %v2576_v48, 1326507024  ;;  %v2656_v36 = vand.u32 8388607, %v2649_v31 }
 0x25a   : > { %v4728_v58 = vadd.s32 4294967294, %v2509_v33  ;;  %v2584_v17 = vsel %vm2578_vm12, %v2581_v15, %v2583_v7  ;;  %v2588_v60 = vsel %vm2578_vm12, %v2585_v45, %v2587_v0  ;;  %v2591_v29 = vsel %vm2579_vm13, %v2573_v63, %v2590_v47  ;;  %v8702_v33 = vld [vmem:[#allocation8_spill] sm:$0xff] }
 0x25b   : > { %v4734_v25 = vadd.s32 4294967169, %v2653_v23  ;;  %v2592_v43 = vsel %vm2578_vm12, %v2589_v19, %v2591_v29  ;;  %v7217_v3 = vmul.u32.u64.low %v7193_v22, %v2588_v60  ;;  %v7218_v46 = vmul.u32.u64.high %v7193_v22, %v2588_v60, %v7217_v3 }
 0x25c   : > { %vm4729_vm14 = vcmp.lt.s32.totalorder %v4728_v58, 0  ;;  %v2527_v8 = vsub.s32 4, %v7172_v57  ;;  %v7223_v53 = vmul.u32.u64.low %v7193_v22, %v2592_v43  ;;  %v7224_v27 = vmul.u32.u64.high %v7193_v22, %v2592_v43, %v7223_v53 }
 0x25d   : > { %v2512_v32 = vsel %vm4729_vm14, 0, %v4728_v58  ;;  %v2659_v61 = vadd.s32 1, %v4734_v25  ;;  %vm2429_vm15 = vweird.f32 %v5638_v18  ;;  %v2431_v35 = vand.u32 3, %v7170_v37 }
 0x25e   : > { %v2513_v40 = vsub.s32 32, %v2512_v32  ;;  %v2514_v1 = vshll.u32 %v7187_v20, %v2512_v32  ;;  %v2517_v5 = vsub.s32 4294967266, %v2512_v32  ;;  %vm2443_vm0 = vcmp.lt.s32.totalorder %v5641_v55, 0 }
 0x25f   : > { %v2600_v10 = vmul.u32 %v7193_v22, %v2584_v17  ;;  %v2603_v50 = vadd.s32 1, %v7218_v46  ;;  %vm2660_vm1 = vcmp.gt.s32.totalorder %v2659_v61, 0  ;;  %v7235_v44 = vsel %vm2443_vm0, %v2527_v8, %v7172_v57 }
 0x260   : > { %v2515_v24 = vshrl.u32 %v2497_v30, %v2513_v40  ;;  %v2518_v38 = vadd.s32 127, %v2517_v5  ;;  %vm2602_vm2 = vc.u32 %v7224_v27, %v7217_v3  ;;  %v2657_v20 = vor.u32 8388608, %v2656_v36 }
 0x261   : > { %v2661_v51 = vsel %vm2660_vm1, %v2659_v61, 0  ;;  %vm7241_vm3 = vcmp.le.f32.partialorder %v2441_v14, 0.7853982  ;;  %v2604_v22 = vsel %vm2602_vm2, %v2603_v50, %v7218_v46  ;;  %vm2432_vm4 = vcmp.lt.s32.totalorder %v2431_v35, 2 }
 0x262   : > { %v2516_v42 = vor.u32 %v2515_v24, %v2514_v1  ;;  %v2519_v34 = vshll.u32 %v2518_v38, 23  ;;  %vm2433_vm5 = vcmp.eq.s32.totalorder %v2431_v35, 0  ;;  %v2605_v23 = vadd.s32 %v2604_v22, %v2600_v10 }
 0x263   : > { %v2663_v57 = vand.u32 31, %v2661_v51  ;;  %v5101_v28 = vpop.eup %5100  ;;  %vm2436_vm6 = vcmp.eq.s32.totalorder %v2431_v35, 2  ;;  %v2530_v39 = vsel %vm7241_vm3, 0, %v7235_v44  ;;  %v7249_v2 = vshll.u32 %v2657_v20, 8 }
 0x264   : > { %v2520_v11 = vor.u32 4788187, %v2519_v34  ;;  %v2523_v52 = vcvt.s32.f32 %v2516_v42  ;;  %v5103_v14 = vpop.eup %5102  ;;  %v2437_v6 = vxor.u32 2147483648, %v5101_v28  ;;  %v2606_v12 = vadd.s32 536870912, %v2605_v23 }
 0x265   : > { %v2664_v63 = vsub.s32 32, %v2663_v57  ;;  %v2434_v26 = vxor.u32 2147483648, %v5103_v14  ;;  %v2662_v21 = vshrl.u32 %v2661_v51, 5  ;;  %v2756_v15 = vand.u32 2139095040, %v8702_v33 }
 0x266   : > { %v2521_v48 = vand.u32 2147483647, %v2520_v11  ;;  %v2438_v45 = vsel %vm2436_vm6, %v2437_v6, %v5103_v14  ;;  %v2607_v30 = vshrl.u32 %v2606_v12, 30  ;;  %v2666_v7 = vshll.u32 %v8659_v62, %v2663_v57 }
 0x267   : > { %v2667_v9 = vshrl.u32 %v8651_v13, %v2664_v63  ;;  %v2435_v19 = vsel %vm2433_vm5, %v5101_v28, %v2434_v26  ;;  %v2669_v0 = vshll.u32 %v8651_v13, %v2663_v57  ;;  %v2670_v47 = vshrl.u32 %v8652_v54, %v2664_v63 }
 0x268   : > { %v2524_v58 = vmul.f32 %v2523_v52, %v2521_v48  ;;  %v2439_v36 = vsel %vm2432_vm4, %v2435_v19, %v2438_v45  ;;  %v2608_v17 = vshll.u32 %v2607_v30, 30  ;;  %v2672_v60 = vshll.u32 %v8652_v54, %v2663_v57 }
 0x269   : > { %v2673_v29 = vshrl.u32 %v8653_v16, %v2664_v63  ;;  %v2440_v25 = vsel %vm2429_vm15, nan, %v2439_v36  ;;  %vm2547_vm7 = vcmp.lt.s32.totalorder %v5644_v56, 0  ;;  %v2665_v46 = vshrl.u32 %v8659_v62, %v2664_v63 }
 0x26a   : > { %v2525_v43 = vxor.u32 2147483648, %v2524_v58  ;;  %vm2681_vm8 = vcmp.lt.s32.totalorder %v2662_v21, 1  ;;  %v7264_v32 = vsub.s32 %v2605_v23, %v2608_v17  ;;  %v2668_v8 = vor.u32 %v2667_v9, %v2666_v7  ;;  %4539 = vst [vmem:[%s5997_s17 + $0x90] sm:$0xff] %v2440_v25 }
 0x26b   : > { %v2675_v53 = vshll.u32 %v8653_v16, %v2663_v57  ;;  %v2676_v40 = vshrl.u32 %v8654_v4, %v2664_v63  ;;  %v2671_v5 = vor.u32 %v2670_v47, %v2669_v0  ;;  %v2678_v18 = vshll.u32 %v8654_v4, %v2663_v57 }
 0x26c   : > { %v2526_v1 = vsel %vm2443_vm0, %v2525_v43, %v2524_v58  ;;  %v2679_v61 = vshrl.u32 %v8655_v49, %v2664_v63  ;;  %vm7278_vm9 = vcmp.le.f32.partialorder %v2545_v41, 0.7853982  ;;  %v2611_v24 = vsub.s32 0, %v7264_v32 }
 0x26d   : > { %v2529_v35 = vsel %vm7241_vm3, %v5641_v55, %v2526_v1  ;;  %v2674_v38 = vor.u32 %v2673_v29, %v2672_v60  ;;  %v2677_v50 = vor.u32 %v2676_v40, %v2675_v53  ;;  %vm2684_vm10 = vcmp.lt.s32.totalorder %v2662_v21, 4 }
 0x26e   : > { %5104 = vcosq.f32 %v2529_v35  ;;  %v2680_v44 = vor.u32 %v2679_v61, %v2678_v18  ;;  %v2757_v20 = vshrl.u32 %v2756_v15, 23  ;;  %v4731_v51 = vmin.u32 %v2611_v24, %v7264_v32 }
 0x26f   : > { %5106 = vsinq.f32 %v2529_v35  ;;  %v2631_v42 = vsub.s32 4, %v2607_v30  ;;  %vm2683_vm11 = vcmp.lt.s32.totalorder %v2662_v21, 3  ;;  %vm2682_vm12 = vcmp.lt.s32.totalorder %v2662_v21, 2 }
 0x270   : > { %v2686_v37 = vsel %vm2684_vm10, %v2674_v38, 2102212464  ;;  %v2689_v41 = vsel %vm2681_vm8, %v2668_v8, %v2671_v5  ;;  %v2690_v34 = vsel %vm2684_vm10, %v2677_v50, 920167782  ;;  %v2534_v22 = vadd.s32 3, %v2530_v39 }
 0x271   : > { %v2613_v23 = vclz %v4731_v51  ;;  %v2685_v57 = vsel %vm2681_vm8, %v2665_v46, %v2668_v8  ;;  %v2693_v28 = vsel %vm2681_vm8, %v2671_v5, %v2674_v38  ;;  %v2687_v11 = vsel %vm2683_vm11, %v2671_v5, %v2686_v37 }
 0x272   : > { %v2691_v52 = vsel %vm2683_vm11, %v2674_v38, %v2690_v34  ;;  %v2694_v14 = vsel %vm2684_vm10, %v2680_v44, 1326507024  ;;  %v4738_v6 = vadd.s32 4294967169, %v2757_v20  ;;  %v2632_v63 = vsel %vm2547_vm7, %v2631_v42, %v2607_v30 }
 0x273   : > { %v4732_v12 = vadd.s32 4294967294, %v2613_v23  ;;  %v2692_v26 = vsel %vm2682_vm12, %v2689_v41, %v2691_v52  ;;  %v2695_v39 = vsel %vm2683_vm11, %v2677_v50, %v2694_v14  ;;  %v2688_v48 = vsel %vm2682_vm12, %v2685_v57, %v2687_v11 }
 0x274   : > { %v2696_v15 = vsel %vm2682_vm12, %v2693_v28, %v2695_v39  ;;  %v7299_v45 = vmul.u32.u64.low %v7249_v2, %v2692_v26  ;;  %v7300_v7 = vmul.u32.u64.high %v7249_v2, %v2692_v26, %v7299_v45  ;;  %v2601_v9 = vadd.s32 %v7217_v3, %v7224_v27 }
 0x275   : > { %vm4733_vm13 = vcmp.lt.s32.totalorder %v4732_v12, 0  ;;  %v7306_v19 = vmul.u32.u64.low %v7249_v2, %v2696_v15  ;;  %v7307_v30 = vmul.u32.u64.high %v7249_v2, %v2696_v15, %v7306_v19  ;;  %v2535_v58 = vand.u32 3, %v2534_v22 }
 0x276   : > { %v2616_v0 = vsel %vm4733_vm13, 0, %v4732_v12  ;;  %v2634_v47 = vsel %vm7278_vm9, 0, %v2632_v63  ;;  %v2763_v21 = vadd.s32 1, %v4738_v6  ;;  %v2704_v29 = vmul.u32 %v7249_v2, %v2688_v48  ;;  %v8705_v19 = vld [vmem:[#allocation9_spill] sm:$0xff] }
 0x277   : > { %v2617_v36 = vsub.s32 32, %v2616_v0  ;;  %v2618_v17 = vshll.u32 %v7264_v32, %v2616_v0  ;;  %v2621_v60 = vsub.s32 4294967266, %v2616_v0  ;;  %v2707_v25 = vadd.s32 1, %v7300_v7 }
 0x278   : > { %vm2764_vm14 = vcmp.gt.s32.totalorder %v2763_v21, 0  ;;  %vm2533_vm15 = vweird.f32 %v5641_v55  ;;  %vm2706_vm0 = vc.u32 %v7307_v30, %v7299_v45  ;;  %v2638_v43 = vadd.s32 3, %v2634_v47 }
 0x279   : > { %v2619_v3 = vshrl.u32 %v2601_v9, %v2617_v36  ;;  %v2622_v27 = vadd.s32 127, %v2621_v60  ;;  %v2708_v46 = vsel %vm2706_vm0, %v2707_v25, %v7300_v7  ;;  %v2753_v8 = vand.u32 2147483647, %v8702_v33 }
 0x27a   : > { %v2765_v53 = vsel %vm2764_vm14, %v2763_v21, 0  ;;  %vm2540_vm1 = vcmp.eq.s32.totalorder %v2535_v58, 2  ;;  %v2709_v1 = vadd.s32 %v2708_v46, %v2704_v29  ;;  %vm2536_vm2 = vcmp.lt.s32.totalorder %v2535_v58, 2 }
 0x27b   : > { %v5105_v32 = vpop.eup %5104  ;;  %v2620_v40 = vor.u32 %v2619_v3, %v2618_v17  ;;  %v2623_v2 = vshll.u32 %v2622_v27, 23  ;;  %vm2537_vm3 = vcmp.eq.s32.totalorder %v2535_v58, 0  ;;  %v2767_v61 = vand.u32 31, %v2765_v53 }
 0x27c   : > { %v5107_v5 = vpop.eup %5106  ;;  %v2541_v18 = vxor.u32 2147483648, %v5105_v32  ;;  %v2710_v50 = vadd.s32 536870912, %v2709_v1  ;;  %v7319_v20 = vand.u32 3, %v2638_v43  ;;  %v2760_v51 = vand.u32 8388607, %v2753_v8 }
 0x27d   : > { %v2538_v35 = vxor.u32 2147483648, %v5107_v5  ;;  %v2624_v24 = vor.u32 4788187, %v2623_v2  ;;  %v2627_v38 = vcvt.s32.f32 %v2620_v40  ;;  %v2768_v42 = vsub.s32 32, %v2767_v61 }
 0x27e   : > { %v2542_v44 = vsel %vm2540_vm1, %v2541_v18, %v5107_v5  ;;  %v7323_v34 = vshrl.u32 %v2710_v50, 30  ;;  %v2770_v22 = vshll.u32 %v8659_v62, %v2767_v61  ;;  %v2773_v28 = vshll.u32 %v8651_v13, %v2767_v61 }
 0x27f   : > { %v2539_v37 = vsel %vm2537_vm3, %v5105_v32, %v2538_v35  ;;  %v2625_v41 = vand.u32 2147483647, %v2624_v24  ;;  %v2771_v57 = vshrl.u32 %v8651_v13, %v2768_v42  ;;  %v2776_v11 = vshll.u32 %v8652_v54, %v2767_v61 }
 0x280   : > { %v2543_v23 = vsel %vm2536_vm2, %v2539_v37, %v2542_v44  ;;  %v2712_v6 = vshll.u32 %v7323_v34, 30  ;;  %v2774_v12 = vshrl.u32 %v8652_v54, %v2768_v42  ;;  %v2761_v63 = vor.u32 8388608, %v2760_v51 }
 0x281   : > { %v2544_v52 = vsel %vm2533_vm15, nan, %v2543_v23  ;;  %v2628_v14 = vmul.f32 %v2627_v38, %v2625_v41  ;;  %v2766_v26 = vshrl.u32 %v2765_v53, 5  ;;  %v2777_v39 = vshrl.u32 %v8653_v16, %v2768_v42 }
 0x282   : > { %v2779_v48 = vshll.u32 %v8653_v16, %v2767_v61  ;;  %4540 = vst [vmem:[%s5997_s17 + $0x98] sm:$0xff] %v2544_v52  ;;  %v7337_v7 = vsub.s32 %v2709_v1, %v2712_v6  ;;  %v2780_v9 = vshrl.u32 %v8654_v4, %v2768_v42  ;;  %v2860_v55 = vand.u32 2139095040, %v8705_v19 }
 0x283   : > { %v2629_v15 = vxor.u32 2147483648, %v2628_v14  ;;  %v2769_v58 = vshrl.u32 %v8659_v62, %v2768_v42  ;;  %v2772_v0 = vor.u32 %v2771_v57, %v2770_v22  ;;  %v2782_v47 = vshll.u32 %v8654_v4, %v2767_v61 }
 0x284   : > { %v2783_v21 = vshrl.u32 %v8655_v49, %v2768_v42  ;;  %v2715_v17 = vsub.s32 0, %v7337_v7  ;;  %v2775_v60 = vor.u32 %v2774_v12, %v2773_v28  ;;  %v2778_v29 = vor.u32 %v2777_v39, %v2776_v11 }
 0x285   : > { %v2630_v36 = vsel %vm2547_vm7, %v2629_v15, %v2628_v14  ;;  %v2781_v3 = vor.u32 %v2780_v9, %v2779_v48  ;;  %vm2785_vm4 = vcmp.lt.s32.totalorder %v2766_v26, 1  ;;  %v2801_v46 = vshll.u32 %v2761_v63, 8 }
 0x286   : > { %v2633_v25 = vsel %vm7278_vm9, %v5644_v56, %v2630_v36  ;;  %v2784_v27 = vor.u32 %v2783_v21, %v2782_v47  ;;  %v4735_v43 = vmin.u32 %v2715_v17, %v7337_v7  ;;  %v2857_v53 = vand.u32 2147483647, %v8705_v19 }
 0x287   : > { %5108 = vcosq.f32 %v2633_v25  ;;  %vm2787_vm5 = vcmp.lt.s32.totalorder %v2766_v26, 3  ;;  %vm2788_vm6 = vcmp.lt.s32.totalorder %v2766_v26, 4  ;;  %v2861_v32 = vshrl.u32 %v2860_v55, 23 }
 0x288   : > { %5110 = vsinq.f32 %v2633_v25  ;;  %v2717_v40 = vclz %v4735_v43  ;;  %vm2786_vm7 = vcmp.lt.s32.totalorder %v2766_v26, 2  ;;  %v2789_v2 = vsel %vm2785_vm4, %v2769_v58, %v2772_v0 }
 0x289   : > { %v2793_v1 = vsel %vm2785_vm4, %v2772_v0, %v2775_v60  ;;  %v2790_v5 = vsel %vm2788_vm6, %v2778_v29, 2102212464  ;;  %v2794_v10 = vsel %vm2788_vm6, %v2781_v3, 920167782  ;;  %v2797_v18 = vsel %vm2785_vm4, %v2775_v60, %v2778_v29 }
 0x28a   : > { %v2798_v61 = vsel %vm2788_vm6, %v2784_v27, 1326507024  ;;  %v4736_v35 = vadd.s32 4294967294, %v2717_v40  ;;  %v2791_v24 = vsel %vm2787_vm5, %v2775_v60, %v2790_v5  ;;  %v2795_v38 = vsel %vm2787_vm5, %v2778_v29, %v2794_v10 }
 0x28b   : > { %v2799_v50 = vsel %vm2787_vm5, %v2781_v3, %v2798_v61  ;;  %v2705_v44 = vadd.s32 %v7299_v45, %v7307_v30  ;;  %v2796_v51 = vsel %vm2786_vm7, %v2793_v1, %v2795_v38  ;;  %v4742_v37 = vadd.s32 4294967169, %v2861_v32 }
 0x28c   : > { %v2800_v42 = vsel %vm2786_vm7, %v2797_v18, %v2799_v50  ;;  %vm4737_vm8 = vcmp.lt.s32.totalorder %v4736_v35, 0  ;;  %v2792_v41 = vsel %vm2786_vm7, %v2789_v2, %v2791_v24  ;;  %v2735_v6 = vsub.s32 4, %v7323_v34 }
 0x28d   : > { %v7357_v22 = vmul.u32.u64.low %v2801_v46, %v2800_v42  ;;  %v7358_v23 = vmul.u32.u64.high %v2801_v46, %v2800_v42, %v7357_v22  ;;  %v2720_v57 = vsel %vm4737_vm8, 0, %v4736_v35  ;;  %v2867_v52 = vadd.s32 1, %v4742_v37 }
 0x28e   : > { %v7360_v28 = vmul.u32.u64.low %v2801_v46, %v2796_v51  ;;  %v7361_v11 = vmul.u32.u64.high %v2801_v46, %v2796_v51, %v7360_v28  ;;  %v2721_v14 = vsub.s32 32, %v2720_v57  ;;  %v2722_v45 = vshll.u32 %v7337_v7, %v2720_v57 }
 0x28f   : > { %v2725_v30 = vsub.s32 4294967266, %v2720_v57  ;;  %vm2637_vm9 = vweird.f32 %v5644_v56  ;;  %vm2651_vm10 = vcmp.lt.s32.totalorder %v5647_v59, 0  ;;  %v2864_v12 = vand.u32 8388607, %v2857_v53  ;;  %v8708_v57 = vld [vmem:[#allocation10_spill] sm:$0xff] }
 0x290   : > { %vm2868_vm11 = vcmp.gt.s32.totalorder %v2867_v52, 0  ;;  %v2723_v63 = vshrl.u32 %v2705_v44, %v2721_v14  ;;  %v2808_v39 = vmul.u32 %v2801_v46, %v2792_v41  ;;  %vm2810_vm12 = vc.u32 %v7358_v23, %v7360_v28 }
 0x291   : > { %v2726_v26 = vadd.s32 127, %v2725_v30  ;;  %vm2640_vm13 = vcmp.lt.s32.totalorder %v7319_v20, 2  ;;  %vm7375_vm14 = vcmp.le.f32.partialorder %v2649_v31, 0.7853982  ;;  %v2811_v15 = vadd.s32 1, %v7361_v11 }
 0x292   : > { %v2869_v7 = vsel %vm2868_vm11, %v2867_v52, 0  ;;  %v2724_v9 = vor.u32 %v2723_v63, %v2722_v45  ;;  %v7383_v58 = vsel %vm2651_vm10, %v2735_v6, %v7323_v34  ;;  %vm2641_vm15 = vcmp.eq.s32.totalorder %v7319_v20, 0 }
 0x293   : > { %v2727_v55 = vshll.u32 %v2726_v26, 23  ;;  %v2871_v0 = vand.u32 31, %v2869_v7  ;;  %vm2644_vm0 = vcmp.eq.s32.totalorder %v7319_v20, 2  ;;  %v2812_v31 = vsel %vm2810_vm12, %v2811_v15, %v7361_v11 }
 0x294   : > { %v5109_v47 = vpop.eup %5108  ;;  %v2865_v21 = vor.u32 8388608, %v2864_v12  ;;  %v2731_v29 = vcvt.s32.f32 %v2724_v9  ;;  %v2813_v25 = vadd.s32 %v2812_v31, %v2808_v39  ;;  %v2738_v34 = vsel %vm7375_vm14, 0, %v7383_v58 }
 0x295   : > { %v5111_v36 = vpop.eup %5110  ;;  %v2645_v17 = vxor.u32 2147483648, %v5109_v47  ;;  %v2728_v60 = vor.u32 4788187, %v2727_v55  ;;  %v2872_v27 = vsub.s32 32, %v2871_v0  ;;  %v2874_v43 = vshll.u32 %v8659_v62, %v2871_v0 }
 0x296   : > { %v2642_v3 = vxor.u32 2147483648, %v5111_v36  ;;  %v2814_v40 = vadd.s32 536870912, %v2813_v25  ;;  %v2877_v2 = vshll.u32 %v8651_v13, %v2871_v0  ;;  %v2880_v18 = vshll.u32 %v8652_v54, %v2871_v0 }
 0x297   : > { %v2646_v46 = vsel %vm2644_vm0, %v2645_v17, %v5111_v36  ;;  %v2729_v32 = vand.u32 2147483647, %v2728_v60  ;;  %v2875_v5 = vshrl.u32 %v8651_v13, %v2872_v27  ;;  %v2878_v10 = vshrl.u32 %v8652_v54, %v2872_v27 }
 0x298   : > { %v2643_v1 = vsel %vm2641_vm15, %v5109_v47, %v2642_v3  ;;  %v2815_v24 = vshrl.u32 %v2814_v40, 30  ;;  %v2881_v38 = vshrl.u32 %v8653_v16, %v2872_v27  ;;  %v2870_v44 = vshrl.u32 %v2869_v7, 5 }
 0x299   : > { %v2647_v61 = vsel %vm2640_vm13, %v2643_v1, %v2646_v46  ;;  %v2732_v35 = vmul.f32 %v2731_v29, %v2729_v32  ;;  %v2883_v51 = vshll.u32 %v8653_v16, %v2871_v0  ;;  %v7404_v42 = vshll.u32 %v2865_v21, 8 }
 0x29a   : > { %v2648_v50 = vsel %vm2637_vm9, nan, %v2647_v61  ;;  %v2816_v41 = vshll.u32 %v2815_v24, 30  ;;  %v2873_v22 = vshrl.u32 %v8659_v62, %v2872_v27  ;;  %v2964_v11 = vand.u32 2139095040, %v8708_v57 }
 0x29b   : > { %v2733_v37 = vxor.u32 2147483648, %v2732_v35  ;;  %4541 = vst [vmem:[%s5997_s17 + $0xa0] sm:$0xff] %v2648_v50  ;;  %v2876_v20 = vor.u32 %v2875_v5, %v2874_v43  ;;  %v2884_v52 = vshrl.u32 %v8654_v4, %v2872_v27  ;;  %v2886_v14 = vshll.u32 %v8654_v4, %v2871_v0 }
 0x29c   : > { %v2887_v56 = vshrl.u32 %v8655_v49, %v2872_v27  ;;  %v7414_v30 = vsub.s32 %v2813_v25, %v2816_v41  ;;  %v2879_v6 = vor.u32 %v2878_v10, %v2877_v2  ;;  %v2882_v12 = vor.u32 %v2881_v38, %v2880_v18 }
 0x29d   : > { %v2734_v45 = vsel %vm2651_vm10, %v2733_v37, %v2732_v35  ;;  %v2885_v26 = vor.u32 %v2884_v52, %v2883_v51  ;;  %vm2889_vm1 = vcmp.lt.s32.totalorder %v2870_v44, 1  ;;  %vm2891_vm2 = vcmp.lt.s32.totalorder %v2870_v44, 3 }
 0x29e   : > { %v2737_v63 = vsel %vm7375_vm14, %v5647_v59, %v2734_v45  ;;  %v2888_v39 = vor.u32 %v2887_v56, %v2886_v14  ;;  %v2819_v15 = vsub.s32 0, %v7414_v30  ;;  %v2965_v7 = vshrl.u32 %v2964_v11, 23 }
 0x29f   : > { %5112 = vcosq.f32 %v2737_v63  ;;  %vm2890_vm3 = vcmp.lt.s32.totalorder %v2870_v44, 2  ;;  %vm2892_vm4 = vcmp.lt.s32.totalorder %v2870_v44, 4  ;;  %v2893_v9 = vsel %vm2889_vm1, %v2873_v22, %v2876_v20 }
 0x2a0   : > { %5114 = vsinq.f32 %v2737_v63  ;;  %v4739_v55 = vmin.u32 %v2819_v15, %v7414_v30  ;;  %v2894_v58 = vsel %vm2892_vm4, %v2882_v12, 2102212464  ;;  %v2897_v0 = vsel %vm2889_vm1, %v2876_v20, %v2879_v6 }
 0x2a1   : > { %v2898_v47 = vsel %vm2892_vm4, %v2885_v26, 920167782  ;;  %v2895_v48 = vsel %vm2891_vm2, %v2879_v6, %v2894_v58  ;;  %v2901_v21 = vsel %vm2889_vm1, %v2879_v6, %v2882_v12  ;;  %v2902_v36 = vsel %vm2892_vm4, %v2888_v39, 1326507024 }
 0x2a2   : > { %v2899_v31 = vsel %vm2891_vm2, %v2882_v12, %v2898_v47  ;;  %v2742_v17 = vadd.s32 3, %v2738_v34  ;;  %v2821_v60 = vclz %v4739_v55  ;;  %v2839_v29 = vsub.s32 4, %v2815_v24 }
 0x2a3   : > { %v2896_v25 = vsel %vm2890_vm3, %v2893_v9, %v2895_v48  ;;  %v2900_v3 = vsel %vm2890_vm3, %v2897_v0, %v2899_v31  ;;  %v2903_v27 = vsel %vm2891_vm2, %v2885_v26, %v2902_v36  ;;  %v4746_v43 = vadd.s32 4294967169, %v2965_v7  ;;  %v8711_v48 = vld [vmem:[#allocation11_spill] sm:$0xff] }
 0x2a4   : > { %v4740_v46 = vadd.s32 4294967294, %v2821_v60  ;;  %v2904_v32 = vsel %vm2890_vm3, %v2901_v21, %v2903_v27  ;;  %v7428_v40 = vmul.u32.u64.low %v7404_v42, %v2900_v3  ;;  %v7429_v2 = vmul.u32.u64.high %v7404_v42, %v2900_v3, %v7428_v40 }
 0x2a5   : > { %vm2755_vm5 = vcmp.lt.s32.totalorder %v8702_v33, 0  ;;  %v7434_v34 = vmul.u32.u64.low %v7404_v42, %v2904_v32  ;;  %v7435_v1 = vmul.u32.u64.high %v7404_v42, %v2904_v32, %v7434_v34  ;;  %v2961_v5 = vand.u32 2147483647, %v8708_v57 }
 0x2a6   : > { %vm2741_vm6 = vweird.f32 %v5647_v59  ;;  %v2809_v10 = vadd.s32 %v7360_v28, %v7358_v23  ;;  %vm4741_vm7 = vcmp.lt.s32.totalorder %v4740_v46, 0  ;;  %v2840_v18 = vsel %vm2755_vm5, %v2839_v29, %v2815_v24 }
 0x2a7   : > { %v2971_v61 = vadd.s32 1, %v4746_v43  ;;  %v2743_v35 = vand.u32 3, %v2742_v17  ;;  %vm7445_vm8 = vcmp.le.f32.partialorder %v2753_v8, 0.7853982  ;;  %v2824_v50 = vsel %vm4741_vm7, 0, %v4740_v46 }
 0x2a8   : > { %v2912_v44 = vmul.u32 %v7404_v42, %v2896_v25  ;;  %v2825_v51 = vsub.s32 32, %v2824_v50  ;;  %v2826_v37 = vshll.u32 %v7414_v30, %v2824_v50  ;;  %v2829_v41 = vsub.s32 4294967266, %v2824_v50 }
 0x2a9   : > { %v2915_v23 = vadd.s32 1, %v7429_v2  ;;  %v2842_v28 = vsel %vm7445_vm8, 0, %v2840_v18  ;;  %vm2914_vm9 = vc.u32 %v7435_v1, %v7428_v40  ;;  %v2968_v8 = vand.u32 8388607, %v2961_v5 }
 0x2aa   : > { %vm2972_vm10 = vcmp.gt.s32.totalorder %v2971_v61, 0  ;;  %v2827_v24 = vshrl.u32 %v2809_v10, %v2825_v51  ;;  %v2830_v22 = vadd.s32 127, %v2829_v41  ;;  %vm2744_vm11 = vcmp.lt.s32.totalorder %v2743_v35, 2 }
 0x2ab   : > { %v2916_v42 = vsel %vm2914_vm9, %v2915_v23, %v7429_v2  ;;  %v2973_v11 = vsel %vm2972_vm10, %v2971_v61, 0  ;;  %vm2748_vm12 = vcmp.eq.s32.totalorder %v2743_v35, 2  ;;  %vm2745_vm13 = vcmp.eq.s32.totalorder %v2743_v35, 0 }
 0x2ac   : > { %v5113_v20 = vpop.eup %5112  ;;  %v2917_v52 = vadd.s32 %v2916_v42, %v2912_v44  ;;  %v2975_v14 = vand.u32 31, %v2973_v11  ;;  %v2828_v30 = vor.u32 %v2827_v24, %v2826_v37  ;;  %v2831_v6 = vshll.u32 %v2830_v22, 23 }
 0x2ad   : > { %v5115_v56 = vpop.eup %5114  ;;  %v2749_v45 = vxor.u32 2147483648, %v5113_v20  ;;  %v7459_v63 = vadd.s32 3, %v2842_v28  ;;  %v2969_v55 = vor.u32 8388608, %v2968_v8  ;;  %v2974_v47 = vshrl.u32 %v2973_v11, 5 }
 0x2ae   : > { %v2746_v12 = vxor.u32 2147483648, %v5115_v56  ;;  %v2918_v26 = vadd.s32 536870912, %v2917_v52  ;;  %v2976_v39 = vsub.s32 32, %v2975_v14  ;;  %v2832_v7 = vor.u32 4788187, %v2831_v6 }
 0x2af   : > { %v2750_v15 = vsel %vm2748_vm12, %v2749_v45, %v5115_v56  ;;  %v2835_v9 = vcvt.s32.f32 %v2828_v30  ;;  %v3068_v31 = vand.u32 2139095040, %v8711_v48  ;;  %v2978_v17 = vshll.u32 %v8659_v62, %v2975_v14 }
 0x2b0   : > { %v2747_v58 = vsel %vm2745_vm13, %v5113_v20, %v2746_v12  ;;  %v7461_v0 = vshrl.u32 %v2918_v26, 30  ;;  %v2833_v36 = vand.u32 2147483647, %v2832_v7  ;;  %v2981_v60 = vshll.u32 %v8651_v13, %v2975_v14 }
 0x2b1   : > { %v2751_v21 = vsel %vm2744_vm11, %v2747_v58, %v2750_v15  ;;  %v2979_v3 = vshrl.u32 %v8651_v13, %v2976_v39  ;;  %v2982_v27 = vshrl.u32 %v8652_v54, %v2976_v39  ;;  %v2984_v46 = vshll.u32 %v8652_v54, %v2975_v14 }
 0x2b2   : > { %v2752_v29 = vsel %vm2741_vm6, nan, %v2751_v21  ;;  %v2920_v25 = vshll.u32 %v7461_v0, 30  ;;  %v2836_v43 = vmul.f32 %v2835_v9, %v2833_v36  ;;  %v2985_v32 = vshrl.u32 %v8653_v16, %v2976_v39 }
 0x2b3   : > { %v2987_v2 = vshll.u32 %v8653_v16, %v2975_v14  ;;  %4542 = vst [vmem:[%s5997_s17 + $0xa8] sm:$0xff] %v2752_v29  ;;  %v2988_v10 = vshrl.u32 %v8654_v4, %v2976_v39  ;;  %v2990_v59 = vshll.u32 %v8654_v4, %v2975_v14  ;;  %v3065_v18 = vand.u32 2147483647, %v8711_v48 }
 0x2b4   : > { %v7476_v34 = vsub.s32 %v2917_v52, %v2920_v25  ;;  %v2837_v61 = vxor.u32 2147483648, %v2836_v43  ;;  %v2991_v35 = vshrl.u32 %v8655_v49, %v2976_v39  ;;  %v7482_v50 = vshll.u32 %v2969_v55, 8 }
 0x2b5   : > { %v3069_v44 = vshrl.u32 %v3068_v31, 23  ;;  %v2977_v37 = vshrl.u32 %v8659_v62, %v2976_v39  ;;  %v2980_v41 = vor.u32 %v2979_v3, %v2978_v17  ;;  %v2983_v23 = vor.u32 %v2982_v27, %v2981_v60 }
 0x2b6   : > { %v2923_v51 = vsub.s32 0, %v7476_v34  ;;  %v2838_v28 = vsel %vm2755_vm5, %v2837_v61, %v2836_v43  ;;  %v2986_v8 = vor.u32 %v2985_v32, %v2984_v46  ;;  %v2989_v24 = vor.u32 %v2988_v10, %v2987_v2 }
 0x2b7   : > { %vm2993_vm14 = vcmp.lt.s32.totalorder %v2974_v47, 1  ;;  %v2841_v22 = vsel %vm7445_vm8, %v8702_v33, %v2838_v28  ;;  %v2992_v11 = vor.u32 %v2991_v35, %v2990_v59  ;;  %vm2996_vm15 = vcmp.lt.s32.totalorder %v2974_v47, 4 }
 0x2b8   : > { %v4743_v42 = vmin.u32 %v2923_v51, %v7476_v34  ;;  %5116 = vcosq.f32 %v2841_v22  ;;  %vm2994_vm0 = vcmp.lt.s32.totalorder %v2974_v47, 2  ;;  %vm2995_vm1 = vcmp.lt.s32.totalorder %v2974_v47, 3 }
 0x2b9   : > { %v2998_v20 = vsel %vm2996_vm15, %v2986_v8, 2102212464  ;;  %5118 = vsinq.f32 %v2841_v22  ;;  %v2997_v14 = vsel %vm2993_vm14, %v2977_v37, %v2980_v41  ;;  %v3001_v56 = vsel %vm2993_vm14, %v2980_v41, %v2983_v23 }
 0x2ba   : > { %v2925_v52 = vclz %v4743_v42  ;;  %v2913_v45 = vadd.s32 %v7428_v40, %v7435_v1  ;;  %v2999_v38 = vsel %vm2995_vm1, %v2983_v23, %v2998_v20  ;;  %v3002_v30 = vsel %vm2996_vm15, %v2989_v24, 920167782 }
 0x2bb   : > { %v3005_v6 = vsel %vm2993_vm14, %v2983_v23, %v2986_v8  ;;  %v3003_v26 = vsel %vm2995_vm1, %v2986_v8, %v3002_v30  ;;  %v3006_v39 = vsel %vm2996_vm15, %v2992_v11, 1326507024  ;;  %v3072_v15 = vand.u32 8388607, %v3065_v18 }
 0x2bc   : > { %v4744_v12 = vadd.s32 4294967294, %v2925_v52  ;;  %v3000_v7 = vsel %vm2994_vm0, %v2997_v14, %v2999_v38  ;;  %v3004_v9 = vsel %vm2994_vm0, %v3001_v56, %v3003_v26  ;;  %v3007_v55 = vsel %vm2995_vm1, %v2989_v24, %v3006_v39  ;;  %v8714_v52 = vld [vmem:[#allocation12_spill] sm:$0xff] }
 0x2bd   : > { %v4750_v58 = vadd.s32 4294967169, %v3069_v44  ;;  %v3008_v40 = vsel %vm2994_vm0, %v3005_v6, %v3007_v55  ;;  %v7506_v1 = vmul.u32.u64.low %v7482_v50, %v3004_v9  ;;  %v7507_v31 = vmul.u32.u64.high %v7482_v50, %v3004_v9, %v7506_v1 }
 0x2be   : > { %vm4745_vm2 = vcmp.lt.s32.totalorder %v4744_v12, 0  ;;  %v2943_v36 = vsub.s32 4, %v7461_v0  ;;  %v7512_v17 = vmul.u32.u64.low %v7482_v50, %v3008_v40  ;;  %v7513_v60 = vmul.u32.u64.high %v7482_v50, %v3008_v40, %v7512_v17 }
 0x2bf   : > { %v2928_v21 = vsel %vm4745_vm2, 0, %v4744_v12  ;;  %v3075_v27 = vadd.s32 1, %v4750_v58  ;;  %vm2845_vm3 = vweird.f32 %v8702_v33  ;;  %v2847_v47 = vand.u32 3, %v7459_v63 }
 0x2c0   : > { %v2929_v29 = vsub.s32 32, %v2928_v21  ;;  %v2930_v25 = vshll.u32 %v7476_v34, %v2928_v21  ;;  %v2933_v3 = vsub.s32 4294967266, %v2928_v21  ;;  %vm2859_vm4 = vcmp.lt.s32.totalorder %v8705_v19, 0 }
 0x2c1   : > { %v3016_v43 = vmul.u32 %v7482_v50, %v3000_v7  ;;  %v3019_v2 = vadd.s32 1, %v7507_v31  ;;  %vm3076_vm5 = vcmp.gt.s32.totalorder %v3075_v27, 0  ;;  %v7524_v10 = vsel %vm2859_vm4, %v2943_v36, %v7461_v0 }
 0x2c2   : > { %v2931_v46 = vshrl.u32 %v2913_v45, %v2929_v29  ;;  %v2934_v32 = vadd.s32 127, %v2933_v3  ;;  %vm3018_vm6 = vc.u32 %v7513_v60, %v7506_v1  ;;  %v3073_v34 = vor.u32 8388608, %v3072_v15 }
 0x2c3   : > { %v3077_v59 = vsel %vm3076_vm5, %v3075_v27, 0  ;;  %vm7530_vm7 = vcmp.le.f32.partialorder %v2857_v53, 0.7853982  ;;  %v3020_v50 = vsel %vm3018_vm6, %v3019_v2, %v7507_v31  ;;  %vm2848_vm8 = vcmp.lt.s32.totalorder %v2847_v47, 2 }
 0x2c4   : > { %v2932_v61 = vor.u32 %v2931_v46, %v2930_v25  ;;  %v2935_v35 = vshll.u32 %v2934_v32, 23  ;;  %vm2849_vm9 = vcmp.eq.s32.totalorder %v2847_v47, 0  ;;  %v3021_v44 = vadd.s32 %v3020_v50, %v3016_v43 }
 0x2c5   : > { %v3079_v0 = vand.u32 31, %v3077_v59  ;;  %v5117_v51 = vpop.eup %5116  ;;  %vm2852_vm10 = vcmp.eq.s32.totalorder %v2847_v47, 2  ;;  %v2946_v23 = vsel %vm7530_vm7, 0, %v7524_v10  ;;  %v7538_v22 = vshll.u32 %v3073_v34, 8 }
 0x2c6   : > { %v2936_v37 = vor.u32 4788187, %v2935_v35  ;;  %v2939_v41 = vcvt.s32.f32 %v2932_v61  ;;  %v5119_v53 = vpop.eup %5118  ;;  %v2853_v28 = vxor.u32 2147483648, %v5117_v51  ;;  %v3022_v8 = vadd.s32 536870912, %v3021_v44 }
 0x2c7   : > { %v3080_v24 = vsub.s32 32, %v3079_v0  ;;  %v2850_v42 = vxor.u32 2147483648, %v5119_v53  ;;  %v3078_v20 = vshrl.u32 %v3077_v59, 5  ;;  %v3172_v14 = vand.u32 2139095040, %v8714_v52 }
 0x2c8   : > { %v2937_v11 = vand.u32 2147483647, %v2936_v37  ;;  %v2854_v56 = vsel %vm2852_vm10, %v2853_v28, %v5119_v53  ;;  %v3023_v45 = vshrl.u32 %v3022_v8, 30  ;;  %v3082_v38 = vshll.u32 %v8659_v62, %v3079_v0 }
 0x2c9   : > { %v3083_v30 = vshrl.u32 %v8651_v13, %v3080_v24  ;;  %v2851_v6 = vsel %vm2849_vm9, %v5117_v51, %v2850_v42  ;;  %v3085_v26 = vshll.u32 %v8651_v13, %v3079_v0  ;;  %v3086_v39 = vshrl.u32 %v8652_v54, %v3080_v24 }
 0x2ca   : > { %v2940_v12 = vmul.f32 %v2939_v41, %v2937_v11  ;;  %v2855_v15 = vsel %vm2848_vm8, %v2851_v6, %v2854_v56  ;;  %v3024_v7 = vshll.u32 %v3023_v45, 30  ;;  %v3088_v9 = vshll.u32 %v8652_v54, %v3079_v0 }
 0x2cb   : > { %v3089_v55 = vshrl.u32 %v8653_v16, %v3080_v24  ;;  %v2856_v58 = vsel %vm2845_vm3, nan, %v2855_v15  ;;  %vm2963_vm11 = vcmp.lt.s32.totalorder %v8708_v57, 0  ;;  %v3081_v31 = vshrl.u32 %v8659_v62, %v3080_v24 }
 0x2cc   : > { %v2941_v40 = vxor.u32 2147483648, %v2940_v12  ;;  %vm3097_vm12 = vcmp.lt.s32.totalorder %v3078_v20, 1  ;;  %v7553_v21 = vsub.s32 %v3021_v44, %v3024_v7  ;;  %v3084_v36 = vor.u32 %v3083_v30, %v3082_v38  ;;  %4543 = vst [vmem:[%s5997_s17 + $0xb0] sm:$0xff] %v2856_v58 }
 0x2cd   : > { %v3091_v17 = vshll.u32 %v8653_v16, %v3079_v0  ;;  %v3092_v29 = vshrl.u32 %v8654_v4, %v3080_v24  ;;  %v3087_v3 = vor.u32 %v3086_v39, %v3085_v26  ;;  %v3094_v33 = vshll.u32 %v8654_v4, %v3079_v0 }
 0x2ce   : > { %v2942_v25 = vsel %vm2859_vm4, %v2941_v40, %v2940_v12  ;;  %v3095_v27 = vshrl.u32 %v8655_v49, %v3080_v24  ;;  %vm7567_vm13 = vcmp.le.f32.partialorder %v2961_v5, 0.7853982  ;;  %v3027_v46 = vsub.s32 0, %v7553_v21 }
 0x2cf   : > { %v2945_v47 = vsel %vm7530_vm7, %v8705_v19, %v2942_v25  ;;  %v3090_v32 = vor.u32 %v3089_v55, %v3088_v9  ;;  %v3093_v2 = vor.u32 %v3092_v29, %v3091_v17  ;;  %vm3100_vm14 = vcmp.lt.s32.totalorder %v3078_v20, 4 }
 0x2d0   : > { %5120 = vcosq.f32 %v2945_v47  ;;  %v3096_v10 = vor.u32 %v3095_v27, %v3094_v33  ;;  %v3173_v34 = vshrl.u32 %v3172_v14, 23  ;;  %v4747_v59 = vmin.u32 %v3027_v46, %v7553_v21 }
 0x2d1   : > { %5122 = vsinq.f32 %v2945_v47  ;;  %v3047_v61 = vsub.s32 4, %v3023_v45  ;;  %vm3099_vm15 = vcmp.lt.s32.totalorder %v3078_v20, 3  ;;  %vm3098_vm0 = vcmp.lt.s32.totalorder %v3078_v20, 2 }
 0x2d2   : > { %v3102_v63 = vsel %vm3100_vm14, %v3090_v32, 2102212464  ;;  %v3105_v5 = vsel %vm3097_vm12, %v3084_v36, %v3087_v3  ;;  %v3106_v35 = vsel %vm3100_vm14, %v3093_v2, 920167782  ;;  %v2950_v50 = vadd.s32 3, %v2946_v23 }
 0x2d3   : > { %v3029_v44 = vclz %v4747_v59  ;;  %v3101_v0 = vsel %vm3097_vm12, %v3081_v31, %v3084_v36  ;;  %v3109_v51 = vsel %vm3097_vm12, %v3087_v3, %v3090_v32  ;;  %v3103_v37 = vsel %vm3099_vm15, %v3087_v3, %v3102_v63 }
 0x2d4   : > { %v3107_v41 = vsel %vm3099_vm15, %v3090_v32, %v3106_v35  ;;  %v3110_v53 = vsel %vm3100_vm14, %v3096_v10, 1326507024  ;;  %v4754_v28 = vadd.s32 4294967169, %v3173_v34  ;;  %v3048_v24 = vsel %vm2963_vm11, %v3047_v61, %v3023_v45 }
 0x2d5   : > { %v4748_v8 = vadd.s32 4294967294, %v3029_v44  ;;  %v3108_v42 = vsel %vm3098_vm0, %v3105_v5, %v3107_v41  ;;  %v3111_v23 = vsel %vm3099_vm15, %v3093_v2, %v3110_v53  ;;  %v3104_v11 = vsel %vm3098_vm0, %v3101_v0, %v3103_v37 }
 0x2d6   : > { %v3112_v14 = vsel %vm3098_vm0, %v3109_v51, %v3111_v23  ;;  %v7588_v56 = vmul.u32.u64.low %v7538_v22, %v3108_v42  ;;  %v7589_v38 = vmul.u32.u64.high %v7538_v22, %v3108_v42, %v7588_v56  ;;  %v3017_v30 = vadd.s32 %v7506_v1, %v7513_v60 }
 0x2d7   : > { %vm4749_vm1 = vcmp.lt.s32.totalorder %v4748_v8, 0  ;;  %v7595_v6 = vmul.u32.u64.low %v7538_v22, %v3112_v14  ;;  %v7596_v45 = vmul.u32.u64.high %v7538_v22, %v3112_v14, %v7595_v6  ;;  %v2951_v12 = vand.u32 3, %v2950_v50 }
 0x2d8   : > { %v3032_v26 = vsel %vm4749_vm1, 0, %v4748_v8  ;;  %v3050_v39 = vsel %vm7567_vm13, 0, %v3048_v24  ;;  %v3179_v20 = vadd.s32 1, %v4754_v28  ;;  %v3120_v55 = vmul.u32 %v7538_v22, %v3104_v11  ;;  %v8717_v6 = vld [vmem:[#allocation13_spill] sm:$0xff] }
 0x2d9   : > { %v3033_v15 = vsub.s32 32, %v3032_v26  ;;  %v3034_v7 = vshll.u32 %v7553_v21, %v3032_v26  ;;  %v3037_v9 = vsub.s32 4294967266, %v3032_v26  ;;  %v3123_v58 = vadd.s32 1, %v7589_v38 }
 0x2da   : > { %vm3180_vm2 = vcmp.gt.s32.totalorder %v3179_v20, 0  ;;  %vm2949_vm3 = vweird.f32 %v8705_v19  ;;  %vm3122_vm4 = vc.u32 %v7596_v45, %v7588_v56  ;;  %v3054_v40 = vadd.s32 3, %v3050_v39 }
 0x2db   : > { %v3035_v1 = vshrl.u32 %v3017_v30, %v3033_v15  ;;  %v3038_v60 = vadd.s32 127, %v3037_v9  ;;  %v3124_v31 = vsel %vm3122_vm4, %v3123_v58, %v7589_v38  ;;  %v3169_v36 = vand.u32 2147483647, %v8714_v52 }
 0x2dc   : > { %v3181_v17 = vsel %vm3180_vm2, %v3179_v20, 0  ;;  %vm2956_vm5 = vcmp.eq.s32.totalorder %v2951_v12, 2  ;;  %v3125_v25 = vadd.s32 %v3124_v31, %v3120_v55  ;;  %vm2952_vm6 = vcmp.lt.s32.totalorder %v2951_v12, 2 }
 0x2dd   : > { %v5121_v21 = vpop.eup %5120  ;;  %v3036_v29 = vor.u32 %v3035_v1, %v3034_v7  ;;  %v3039_v22 = vshll.u32 %v3038_v60, 23  ;;  %vm2953_vm7 = vcmp.eq.s32.totalorder %v2951_v12, 0  ;;  %v3183_v27 = vand.u32 31, %v3181_v17 }
 0x2de   : > { %v5123_v3 = vpop.eup %5122  ;;  %v2957_v33 = vxor.u32 2147483648, %v5121_v21  ;;  %v3126_v2 = vadd.s32 536870912, %v3125_v25  ;;  %v7608_v34 = vand.u32 3, %v3054_v40  ;;  %v3176_v59 = vand.u32 8388607, %v3169_v36 }
 0x2df   : > { %v2954_v47 = vxor.u32 2147483648, %v5123_v3  ;;  %v3040_v46 = vor.u32 4788187, %v3039_v22  ;;  %v3043_v32 = vcvt.s32.f32 %v3036_v29  ;;  %v3184_v61 = vsub.s32 32, %v3183_v27 }
 0x2e0   : > { %v2958_v10 = vsel %vm2956_vm5, %v2957_v33, %v5123_v3  ;;  %v7612_v35 = vshrl.u32 %v3126_v2, 30  ;;  %v3186_v50 = vshll.u32 %v8659_v62, %v3183_v27  ;;  %v3189_v51 = vshll.u32 %v8651_v13, %v3183_v27 }
 0x2e1   : > { %v2955_v63 = vsel %vm2953_vm7, %v5121_v21, %v2954_v47  ;;  %v3041_v5 = vand.u32 2147483647, %v3040_v46  ;;  %v3187_v0 = vshrl.u32 %v8651_v13, %v3184_v61  ;;  %v3192_v37 = vshll.u32 %v8652_v54, %v3183_v27 }
 0x2e2   : > { %v2959_v44 = vsel %vm2952_vm6, %v2955_v63, %v2958_v10  ;;  %v3128_v28 = vshll.u32 %v7612_v35, 30  ;;  %v3190_v8 = vshrl.u32 %v8652_v54, %v3184_v61  ;;  %v3177_v24 = vor.u32 8388608, %v3176_v59 }
 0x2e3   : > { %v2960_v41 = vsel %vm2949_vm3, nan, %v2959_v44  ;;  %v3044_v53 = vmul.f32 %v3043_v32, %v3041_v5  ;;  %v3182_v42 = vshrl.u32 %v3181_v17, 5  ;;  %v3193_v23 = vshrl.u32 %v8653_v16, %v3184_v61 }
 0x2e4   : > { %v3195_v11 = vshll.u32 %v8653_v16, %v3183_v27  ;;  %4544 = vst [vmem:[%s5997_s17 + $0xb8] sm:$0xff] %v2960_v41  ;;  %v7626_v38 = vsub.s32 %v3125_v25, %v3128_v28  ;;  %v3196_v30 = vshrl.u32 %v8654_v4, %v3184_v61  ;;  %v3276_v19 = vand.u32 2139095040, %v8717_v6 }
 0x2e5   : > { %v3045_v14 = vxor.u32 2147483648, %v3044_v53  ;;  %v3185_v12 = vshrl.u32 %v8659_v62, %v3184_v61  ;;  %v3188_v26 = vor.u32 %v3187_v0, %v3186_v50  ;;  %v3198_v39 = vshll.u32 %v8654_v4, %v3183_v27 }
 0x2e6   : > { %v3199_v20 = vshrl.u32 %v8655_v49, %v3184_v61  ;;  %v3131_v7 = vsub.s32 0, %v7626_v38  ;;  %v3191_v9 = vor.u32 %v3190_v8, %v3189_v51  ;;  %v3194_v55 = vor.u32 %v3193_v23, %v3192_v37 }
 0x2e7   : > { %v3046_v15 = vsel %vm2963_vm11, %v3045_v14, %v3044_v53  ;;  %v3197_v1 = vor.u32 %v3196_v30, %v3195_v11  ;;  %vm3201_vm8 = vcmp.lt.s32.totalorder %v3182_v42, 1  ;;  %v3217_v31 = vshll.u32 %v3177_v24, 8 }
 0x2e8   : > { %v3049_v58 = vsel %vm7567_vm13, %v8708_v57, %v3046_v15  ;;  %v3200_v60 = vor.u32 %v3199_v20, %v3198_v39  ;;  %v4751_v40 = vmin.u32 %v3131_v7, %v7626_v38  ;;  %v3273_v17 = vand.u32 2147483647, %v8717_v6 }
 0x2e9   : > { %5124 = vcosq.f32 %v3049_v58  ;;  %vm3203_vm9 = vcmp.lt.s32.totalorder %v3182_v42, 3  ;;  %vm3204_vm10 = vcmp.lt.s32.totalorder %v3182_v42, 4  ;;  %v3277_v21 = vshrl.u32 %v3276_v19, 23 }
 0x2ea   : > { %5126 = vsinq.f32 %v3049_v58  ;;  %v3133_v29 = vclz %v4751_v40  ;;  %vm3202_vm11 = vcmp.lt.s32.totalorder %v3182_v42, 2  ;;  %v3205_v22 = vsel %vm3201_vm8, %v3185_v12, %v3188_v26 }
 0x2eb   : > { %v3209_v25 = vsel %vm3201_vm8, %v3188_v26, %v3191_v9  ;;  %v3206_v3 = vsel %vm3204_vm10, %v3194_v55, 2102212464  ;;  %v3210_v43 = vsel %vm3204_vm10, %v3197_v1, 920167782  ;;  %v3213_v33 = vsel %vm3201_vm8, %v3191_v9, %v3194_v55 }
 0x2ec   : > { %v3214_v27 = vsel %vm3204_vm10, %v3200_v60, 1326507024  ;;  %v4752_v47 = vadd.s32 4294967294, %v3133_v29  ;;  %v3207_v46 = vsel %vm3203_vm9, %v3191_v9, %v3206_v3  ;;  %v3211_v32 = vsel %vm3203_vm9, %v3194_v55, %v3210_v43 }
 0x2ed   : > { %v3215_v2 = vsel %vm3203_vm9, %v3197_v1, %v3214_v27  ;;  %v3121_v10 = vadd.s32 %v7588_v56, %v7596_v45  ;;  %v3212_v59 = vsel %vm3202_vm11, %v3209_v25, %v3211_v32  ;;  %v4758_v63 = vadd.s32 4294967169, %v3277_v21 }
 0x2ee   : > { %v3216_v61 = vsel %vm3202_vm11, %v3213_v33, %v3215_v2  ;;  %vm4753_vm12 = vcmp.lt.s32.totalorder %v4752_v47, 0  ;;  %v3208_v5 = vsel %vm3202_vm11, %v3205_v22, %v3207_v46  ;;  %v3151_v28 = vsub.s32 4, %v7612_v35 }
 0x2ef   : > { %v7646_v50 = vmul.u32.u64.low %v3217_v31, %v3216_v61  ;;  %v7647_v44 = vmul.u32.u64.high %v3217_v31, %v3216_v61, %v7646_v50  ;;  %v3136_v0 = vsel %vm4753_vm12, 0, %v4752_v47  ;;  %v3283_v41 = vadd.s32 1, %v4758_v63 }
 0x2f0   : > { %v7649_v51 = vmul.u32.u64.low %v3217_v31, %v3212_v59  ;;  %v7650_v37 = vmul.u32.u64.high %v3217_v31, %v3212_v59, %v7649_v51  ;;  %v3137_v53 = vsub.s32 32, %v3136_v0  ;;  %v3138_v56 = vshll.u32 %v7626_v38, %v3136_v0 }
 0x2f1   : > { %v3141_v45 = vsub.s32 4294967266, %v3136_v0  ;;  %vm3053_vm13 = vweird.f32 %v8708_v57  ;;  %vm3067_vm14 = vcmp.lt.s32.totalorder %v8711_v48, 0  ;;  %v3280_v8 = vand.u32 8388607, %v3273_v17  ;;  %v8720_v0 = vld [vmem:[#allocation14_spill] sm:$0xff] }
 0x2f2   : > { %vm3284_vm15 = vcmp.gt.s32.totalorder %v3283_v41, 0  ;;  %v3139_v24 = vshrl.u32 %v3121_v10, %v3137_v53  ;;  %v3224_v23 = vmul.u32 %v3217_v31, %v3208_v5  ;;  %vm3226_vm0 = vc.u32 %v7647_v44, %v7649_v51 }
 0x2f3   : > { %v3142_v42 = vadd.s32 127, %v3141_v45  ;;  %vm3056_vm1 = vcmp.lt.s32.totalorder %v7608_v34, 2  ;;  %vm7664_vm2 = vcmp.le.f32.partialorder %v3065_v18, 0.7853982  ;;  %v3227_v14 = vadd.s32 1, %v7650_v37 }
 0x2f4   : > { %v3285_v38 = vsel %vm3284_vm15, %v3283_v41, 0  ;;  %v3140_v30 = vor.u32 %v3139_v24, %v3138_v56  ;;  %v7672_v12 = vsel %vm3067_vm14, %v3151_v28, %v7612_v35  ;;  %vm3057_vm3 = vcmp.eq.s32.totalorder %v7608_v34, 0 }
 0x2f5   : > { %v3143_v19 = vshll.u32 %v3142_v42, 23  ;;  %v3287_v26 = vand.u32 31, %v3285_v38  ;;  %vm3060_vm4 = vcmp.eq.s32.totalorder %v7608_v34, 2  ;;  %v3228_v18 = vsel %vm3226_vm0, %v3227_v14, %v7650_v37 }
 0x2f6   : > { %v5125_v39 = vpop.eup %5124  ;;  %v3281_v20 = vor.u32 8388608, %v3280_v8  ;;  %v3147_v55 = vcvt.s32.f32 %v3140_v30  ;;  %v3229_v58 = vadd.s32 %v3228_v18, %v3224_v23  ;;  %v3154_v35 = vsel %vm7664_vm2, 0, %v7672_v12 }
 0x2f7   : > { %v5127_v15 = vpop.eup %5126  ;;  %v3061_v7 = vxor.u32 2147483648, %v5125_v39  ;;  %v3144_v9 = vor.u32 4788187, %v3143_v19  ;;  %v3288_v60 = vsub.s32 32, %v3287_v26  ;;  %v3290_v40 = vshll.u32 %v8659_v62, %v3287_v26 }
 0x2f8   : > { %v3058_v1 = vxor.u32 2147483648, %v5127_v15  ;;  %v3230_v29 = vadd.s32 536870912, %v3229_v58  ;;  %v3293_v22 = vshll.u32 %v8651_v13, %v3287_v26  ;;  %v3296_v33 = vshll.u32 %v8652_v54, %v3287_v26 }
 0x2f9   : > { %v3062_v31 = vsel %vm3060_vm4, %v3061_v7, %v5127_v15  ;;  %v3145_v21 = vand.u32 2147483647, %v3144_v9  ;;  %v3291_v3 = vshrl.u32 %v8651_v13, %v3288_v60  ;;  %v3294_v43 = vshrl.u32 %v8652_v54, %v3288_v60 }
 0x2fa   : > { %v3059_v25 = vsel %vm3057_vm3, %v5125_v39, %v3058_v1  ;;  %v3231_v46 = vshrl.u32 %v3230_v29, 30  ;;  %v3297_v32 = vshrl.u32 %v8653_v16, %v3288_v60  ;;  %v3286_v10 = vshrl.u32 %v3285_v38, 5 }
 0x2fb   : > { %v3063_v27 = vsel %vm3056_vm1, %v3059_v25, %v3062_v31  ;;  %v3148_v47 = vmul.f32 %v3147_v55, %v3145_v21  ;;  %v3299_v59 = vshll.u32 %v8653_v16, %v3287_v26  ;;  %v7693_v61 = vshll.u32 %v3281_v20, 8 }
 0x2fc   : > { %v3064_v2 = vsel %vm3053_vm13, nan, %v3063_v27  ;;  %v3232_v5 = vshll.u32 %v3231_v46, 30  ;;  %v3289_v50 = vshrl.u32 %v8659_v62, %v3288_v60  ;;  %v3380_v37 = vand.u32 2139095040, %v8720_v0 }
 0x2fd   : > { %v3149_v63 = vxor.u32 2147483648, %v3148_v47  ;;  %4545 = vst [vmem:[%s5997_s17 + $0xc0] sm:$0xff] %v3064_v2  ;;  %v3292_v34 = vor.u32 %v3291_v3, %v3290_v40  ;;  %v3300_v41 = vshrl.u32 %v8654_v4, %v3288_v60  ;;  %v3302_v53 = vshll.u32 %v8654_v4, %v3287_v26 }
 0x2fe   : > { %v3303_v57 = vshrl.u32 %v8655_v49, %v3288_v60  ;;  %v7703_v45 = vsub.s32 %v3229_v58, %v3232_v5  ;;  %v3295_v28 = vor.u32 %v3294_v43, %v3293_v22  ;;  %v3298_v8 = vor.u32 %v3297_v32, %v3296_v33 }
 0x2ff   : > { %v3150_v56 = vsel %vm3067_vm14, %v3149_v63, %v3148_v47  ;;  %v3301_v42 = vor.u32 %v3300_v41, %v3299_v59  ;;  %vm3305_vm5 = vcmp.lt.s32.totalorder %v3286_v10, 1  ;;  %vm3307_vm6 = vcmp.lt.s32.totalorder %v3286_v10, 3 }
 0x300   : > { %v3153_v24 = vsel %vm7664_vm2, %v8711_v48, %v3150_v56  ;;  %v3304_v23 = vor.u32 %v3303_v57, %v3302_v53  ;;  %v3235_v14 = vsub.s32 0, %v7703_v45  ;;  %v3381_v38 = vshrl.u32 %v3380_v37, 23 }
 0x301   : > { %5128 = vcosq.f32 %v3153_v24  ;;  %vm3306_vm7 = vcmp.lt.s32.totalorder %v3286_v10, 2  ;;  %vm3308_vm8 = vcmp.lt.s32.totalorder %v3286_v10, 4  ;;  %v3309_v30 = vsel %vm3305_vm5, %v3289_v50, %v3292_v34 }
 0x302   : > { %5130 = vsinq.f32 %v3153_v24  ;;  %v4755_v19 = vmin.u32 %v3235_v14, %v7703_v45  ;;  %v3310_v12 = vsel %vm3308_vm8, %v3298_v8, 2102212464  ;;  %v3313_v26 = vsel %vm3305_vm5, %v3292_v34, %v3295_v28 }
 0x303   : > { %v3314_v39 = vsel %vm3308_vm8, %v3301_v42, 920167782  ;;  %v3311_v11 = vsel %vm3307_vm6, %v3295_v28, %v3310_v12  ;;  %v3317_v20 = vsel %vm3305_vm5, %v3295_v28, %v3298_v8  ;;  %v3318_v15 = vsel %vm3308_vm8, %v3304_v23, 1326507024 }
 0x304   : > { %v3315_v18 = vsel %vm3307_vm6, %v3298_v8, %v3314_v39  ;;  %v3158_v7 = vadd.s32 3, %v3154_v35  ;;  %v3237_v9 = vclz %v4755_v19  ;;  %v3255_v55 = vsub.s32 4, %v3231_v46 }
 0x305   : > { %v3312_v58 = vsel %vm3306_vm7, %v3309_v30, %v3311_v11  ;;  %v3316_v1 = vsel %vm3306_vm7, %v3313_v26, %v3315_v18  ;;  %v3319_v60 = vsel %vm3307_vm6, %v3301_v42, %v3318_v15  ;;  %v4762_v40 = vadd.s32 4294967169, %v3381_v38  ;;  %v8723_v11 = vld [vmem:[#allocation15_spill] sm:$0xff] }
 0x306   : > { %v4756_v31 = vadd.s32 4294967294, %v3237_v9  ;;  %v3320_v21 = vsel %vm3306_vm7, %v3317_v20, %v3319_v60  ;;  %v7717_v29 = vmul.u32.u64.low %v7693_v61, %v3316_v1  ;;  %v7718_v22 = vmul.u32.u64.high %v7693_v61, %v3316_v1, %v7717_v29 }
 0x307   : > { %vm3171_vm9 = vcmp.lt.s32.totalorder %v8714_v52, 0  ;;  %v7723_v35 = vmul.u32.u64.low %v7693_v61, %v3320_v21  ;;  %v7724_v25 = vmul.u32.u64.high %v7693_v61, %v3320_v21, %v7723_v35  ;;  %v3377_v3 = vand.u32 2147483647, %v8720_v0 }
 0x308   : > { %vm3157_vm10 = vweird.f32 %v8711_v48  ;;  %v3225_v43 = vadd.s32 %v7649_v51, %v7647_v44  ;;  %vm4757_vm11 = vcmp.lt.s32.totalorder %v4756_v31, 0  ;;  %v3256_v33 = vsel %vm3171_vm9, %v3255_v55, %v3231_v46 }
 0x309   : > { %v3387_v27 = vadd.s32 1, %v4762_v40  ;;  %v3159_v47 = vand.u32 3, %v3158_v7  ;;  %vm7734_vm12 = vcmp.le.f32.partialorder %v3169_v36, 0.7853982  ;;  %v3240_v2 = vsel %vm4757_vm11, 0, %v4756_v31 }
 0x30a   : > { %v3328_v10 = vmul.u32 %v7693_v61, %v3312_v58  ;;  %v3241_v59 = vsub.s32 32, %v3240_v2  ;;  %v3242_v63 = vshll.u32 %v7703_v45, %v3240_v2  ;;  %v3245_v5 = vsub.s32 4294967266, %v3240_v2 }
 0x30b   : > { %v3331_v44 = vadd.s32 1, %v7718_v22  ;;  %v3258_v51 = vsel %vm7734_vm12, 0, %v3256_v33  ;;  %vm3330_vm13 = vc.u32 %v7724_v25, %v7717_v29  ;;  %v3384_v36 = vand.u32 8388607, %v3377_v3 }
 0x30c   : > { %vm3388_vm14 = vcmp.gt.s32.totalorder %v3387_v27, 0  ;;  %v3243_v46 = vshrl.u32 %v3225_v43, %v3241_v59  ;;  %v3246_v50 = vadd.s32 127, %v3245_v5  ;;  %vm3160_vm15 = vcmp.lt.s32.totalorder %v3159_v47, 2 }
 0x30d   : > { %v3332_v61 = vsel %vm3330_vm13, %v3331_v44, %v7718_v22  ;;  %v3389_v37 = vsel %vm3388_vm14, %v3387_v27, 0  ;;  %vm3164_vm0 = vcmp.eq.s32.totalorder %v3159_v47, 2  ;;  %vm3161_vm1 = vcmp.eq.s32.totalorder %v3159_v47, 0 }
 0x30e   : > { %v5129_v34 = vpop.eup %5128  ;;  %v3333_v41 = vadd.s32 %v3332_v61, %v3328_v10  ;;  %v3391_v53 = vand.u32 31, %v3389_v37  ;;  %v3244_v45 = vor.u32 %v3243_v46, %v3242_v63  ;;  %v3247_v28 = vshll.u32 %v3246_v50, 23 }
 0x30f   : > { %v5131_v57 = vpop.eup %5130  ;;  %v3165_v56 = vxor.u32 2147483648, %v5129_v34  ;;  %v7748_v24 = vadd.s32 3, %v3258_v51  ;;  %v3385_v19 = vor.u32 8388608, %v3384_v36  ;;  %v3390_v39 = vshrl.u32 %v3389_v37, 5 }
 0x310   : > { %v3162_v8 = vxor.u32 2147483648, %v5131_v57  ;;  %v3334_v42 = vadd.s32 536870912, %v3333_v41  ;;  %v3392_v23 = vsub.s32 32, %v3391_v53  ;;  %v3248_v38 = vor.u32 4788187, %v3247_v28 }
 0x311   : > { %v3166_v14 = vsel %vm3164_vm0, %v3165_v56, %v5131_v57  ;;  %v3251_v30 = vcvt.s32.f32 %v3244_v45  ;;  %v3484_v18 = vand.u32 2139095040, %v8723_v11  ;;  %v3394_v7 = vshll.u32 %v8659_v62, %v3391_v53 }
 0x312   : > { %v3163_v12 = vsel %vm3161_vm1, %v5129_v34, %v3162_v8  ;;  %v7750_v26 = vshrl.u32 %v3334_v42, 30  ;;  %v3249_v15 = vand.u32 2147483647, %v3248_v38  ;;  %v3397_v9 = vshll.u32 %v8651_v13, %v3391_v53 }
 0x313   : > { %v3167_v20 = vsel %vm3160_vm15, %v3163_v12, %v3166_v14  ;;  %v3395_v1 = vshrl.u32 %v8651_v13, %v3392_v23  ;;  %v3398_v60 = vshrl.u32 %v8652_v54, %v3392_v23  ;;  %v3400_v31 = vshll.u32 %v8652_v54, %v3391_v53 }
 0x314   : > { %v3168_v55 = vsel %vm3157_vm10, nan, %v3167_v20  ;;  %v3336_v58 = vshll.u32 %v7750_v26, 30  ;;  %v3252_v40 = vmul.f32 %v3251_v30, %v3249_v15  ;;  %v3401_v21 = vshrl.u32 %v8653_v16, %v3392_v23 }
 0x315   : > { %v3403_v22 = vshll.u32 %v8653_v16, %v3391_v53  ;;  %4546 = vst [vmem:[%s5997_s17 + $0xc8] sm:$0xff] %v3168_v55  ;;  %v3404_v43 = vshrl.u32 %v8654_v4, %v3392_v23  ;;  %v3406_v48 = vshll.u32 %v8654_v4, %v3391_v53  ;;  %v3481_v33 = vand.u32 2147483647, %v8723_v11 }
 0x316   : > { %v7765_v35 = vsub.s32 %v3333_v41, %v3336_v58  ;;  %v3253_v27 = vxor.u32 2147483648, %v3252_v40  ;;  %v3407_v47 = vshrl.u32 %v8655_v49, %v3392_v23  ;;  %v7771_v2 = vshll.u32 %v3385_v19, 8 }
 0x317   : > { %v3485_v10 = vshrl.u32 %v3484_v18, 23  ;;  %v3393_v63 = vshrl.u32 %v8659_v62, %v3392_v23  ;;  %v3396_v5 = vor.u32 %v3395_v1, %v3394_v7  ;;  %v3399_v44 = vor.u32 %v3398_v60, %v3397_v9 }
 0x318   : > { %v3339_v59 = vsub.s32 0, %v7765_v35  ;;  %v3254_v51 = vsel %vm3171_vm9, %v3253_v27, %v3252_v40  ;;  %v3402_v36 = vor.u32 %v3401_v21, %v3400_v31  ;;  %v3405_v46 = vor.u32 %v3404_v43, %v3403_v22 }
 0x319   : > { %vm3409_vm2 = vcmp.lt.s32.totalorder %v3390_v39, 1  ;;  %v3257_v50 = vsel %vm7734_vm12, %v8714_v52, %v3254_v51  ;;  %v3408_v37 = vor.u32 %v3407_v47, %v3406_v48  ;;  %vm3412_vm3 = vcmp.lt.s32.totalorder %v3390_v39, 4 }
 0x31a   : > { %v4759_v61 = vmin.u32 %v3339_v59, %v7765_v35  ;;  %5132 = vcosq.f32 %v3257_v50  ;;  %vm3410_vm4 = vcmp.lt.s32.totalorder %v3390_v39, 2  ;;  %vm3411_vm5 = vcmp.lt.s32.totalorder %v3390_v39, 3 }
 0x31b   : > { %v3414_v34 = vsel %vm3412_vm3, %v3402_v36, 2102212464  ;;  %5134 = vsinq.f32 %v3257_v50  ;;  %v3413_v53 = vsel %vm3409_vm2, %v3393_v63, %v3396_v5  ;;  %v3417_v57 = vsel %vm3409_vm2, %v3396_v5, %v3399_v44 }
 0x31c   : > { %v3341_v41 = vclz %v4759_v61  ;;  %v3329_v56 = vadd.s32 %v7717_v29, %v7724_v25  ;;  %v3415_v32 = vsel %vm3411_vm5, %v3399_v44, %v3414_v34  ;;  %v3418_v45 = vsel %vm3412_vm3, %v3405_v46, 920167782 }
 0x31d   : > { %v3421_v28 = vsel %vm3409_vm2, %v3399_v44, %v3402_v36  ;;  %v3419_v42 = vsel %vm3411_vm5, %v3402_v36, %v3418_v45  ;;  %v3422_v23 = vsel %vm3412_vm3, %v3408_v37, 1326507024  ;;  %v3488_v14 = vand.u32 8388607, %v3481_v33 }
 0x31e   : > { %v4760_v8 = vadd.s32 4294967294, %v3341_v41  ;;  %v3416_v38 = vsel %vm3410_vm4, %v3413_v53, %v3415_v32  ;;  %v3420_v30 = vsel %vm3410_vm4, %v3417_v57, %v3419_v42  ;;  %v3423_v19 = vsel %vm3411_vm5, %v3405_v46, %v3422_v23  ;;  %v8726_v41 = vld [vmem:[#allocation16_spill] sm:$0xff] }
 0x31f   : > { %v4766_v12 = vadd.s32 4294967169, %v3485_v10  ;;  %v3424_v29 = vsel %vm3410_vm4, %v3421_v28, %v3423_v19  ;;  %v7795_v25 = vmul.u32.u64.low %v7771_v2, %v3420_v30  ;;  %v7796_v18 = vmul.u32.u64.high %v7771_v2, %v3420_v30, %v7795_v25 }
 0x320   : > { %vm4761_vm6 = vcmp.lt.s32.totalorder %v4760_v8, 0  ;;  %v3359_v15 = vsub.s32 4, %v7750_v26  ;;  %v7801_v7 = vmul.u32.u64.low %v7771_v2, %v3424_v29  ;;  %v7802_v9 = vmul.u32.u64.high %v7771_v2, %v3424_v29, %v7801_v7 }
 0x321   : > { %v3344_v20 = vsel %vm4761_vm6, 0, %v4760_v8  ;;  %v3491_v60 = vadd.s32 1, %v4766_v12  ;;  %vm3261_vm7 = vweird.f32 %v8714_v52  ;;  %v3263_v39 = vand.u32 3, %v7748_v24 }
 0x322   : > { %v3345_v55 = vsub.s32 32, %v3344_v20  ;;  %v3346_v58 = vshll.u32 %v7765_v35, %v3344_v20  ;;  %v3349_v1 = vsub.s32 4294967266, %v3344_v20  ;;  %vm3275_vm8 = vcmp.lt.s32.totalorder %v8717_v6, 0 }
 0x323   : > { %v3432_v40 = vmul.u32 %v7771_v2, %v3416_v38  ;;  %v3435_v22 = vadd.s32 1, %v7796_v18  ;;  %vm3492_vm9 = vcmp.gt.s32.totalorder %v3491_v60, 0  ;;  %v7813_v43 = vsel %vm3275_vm8, %v3359_v15, %v7750_v26 }
 0x324   : > { %v3347_v31 = vshrl.u32 %v3329_v56, %v3345_v55  ;;  %v3350_v21 = vadd.s32 127, %v3349_v1  ;;  %vm3434_vm10 = vc.u32 %v7802_v9, %v7795_v25  ;;  %v3489_v35 = vor.u32 8388608, %v3488_v14 }
 0x325   : > { %v3493_v48 = vsel %vm3492_vm9, %v3491_v60, 0  ;;  %vm7819_vm11 = vcmp.le.f32.partialorder %v3273_v17, 0.7853982  ;;  %v3436_v2 = vsel %vm3434_vm10, %v3435_v22, %v7796_v18  ;;  %vm3264_vm12 = vcmp.lt.s32.totalorder %v3263_v39, 2 }
 0x326   : > { %v3348_v27 = vor.u32 %v3347_v31, %v3346_v58  ;;  %v3351_v47 = vshll.u32 %v3350_v21, 23  ;;  %vm3265_vm13 = vcmp.eq.s32.totalorder %v3263_v39, 0  ;;  %v3437_v10 = vadd.s32 %v3436_v2, %v3432_v40 }
 0x327   : > { %v3495_v26 = vand.u32 31, %v3493_v48  ;;  %v5133_v59 = vpop.eup %5132  ;;  %vm3268_vm14 = vcmp.eq.s32.totalorder %v3263_v39, 2  ;;  %v3362_v44 = vsel %vm7819_vm11, 0, %v7813_v43  ;;  %v7827_v50 = vshll.u32 %v3489_v35, 8 }
 0x328   : > { %v3352_v63 = vor.u32 4788187, %v3351_v47  ;;  %v3355_v5 = vcvt.s32.f32 %v3348_v27  ;;  %v5135_v17 = vpop.eup %5134  ;;  %v3269_v51 = vxor.u32 2147483648, %v5133_v59  ;;  %v3438_v36 = vadd.s32 536870912, %v3437_v10 }
 0x329   : > { %v3496_v46 = vsub.s32 32, %v3495_v26  ;;  %v3266_v61 = vxor.u32 2147483648, %v5135_v17  ;;  %v3494_v34 = vshrl.u32 %v3493_v48, 5  ;;  %v3588_v53 = vand.u32 2139095040, %v8726_v41 }
 0x32a   : > { %v3353_v37 = vand.u32 2147483647, %v3352_v63  ;;  %v3270_v57 = vsel %vm3268_vm14, %v3269_v51, %v5135_v17  ;;  %v3439_v56 = vshrl.u32 %v3438_v36, 30  ;;  %v3498_v32 = vshll.u32 %v8659_v62, %v3495_v26 }
 0x32b   : > { %v3499_v45 = vshrl.u32 %v8651_v13, %v3496_v46  ;;  %v3267_v28 = vsel %vm3265_vm13, %v5133_v59, %v3266_v61  ;;  %v3501_v42 = vshll.u32 %v8651_v13, %v3495_v26  ;;  %v3502_v23 = vshrl.u32 %v8652_v54, %v3496_v46 }
 0x32c   : > { %v3356_v8 = vmul.f32 %v3355_v5, %v3353_v37  ;;  %v3271_v14 = vsel %vm3264_vm12, %v3267_v28, %v3270_v57  ;;  %v3440_v38 = vshll.u32 %v3439_v56, 30  ;;  %v3504_v30 = vshll.u32 %v8652_v54, %v3495_v26 }
 0x32d   : > { %v3505_v19 = vshrl.u32 %v8653_v16, %v3496_v46  ;;  %v3272_v12 = vsel %vm3261_vm7, nan, %v3271_v14  ;;  %vm3379_vm15 = vcmp.lt.s32.totalorder %v8720_v0, 0  ;;  %v3497_v18 = vshrl.u32 %v8659_v62, %v3496_v46 }
 0x32e   : > { %v3357_v29 = vxor.u32 2147483648, %v3356_v8  ;;  %vm3513_vm0 = vcmp.lt.s32.totalorder %v3494_v34, 1  ;;  %v7842_v20 = vsub.s32 %v3437_v10, %v3440_v38  ;;  %v3500_v15 = vor.u32 %v3499_v45, %v3498_v32  ;;  %4547 = vst [vmem:[%s5997_s17 + $0xd0] sm:$0xff] %v3272_v12 }
 0x32f   : > { %v3507_v7 = vshll.u32 %v8653_v16, %v3495_v26  ;;  %v3508_v55 = vshrl.u32 %v8654_v4, %v3496_v46  ;;  %v3503_v1 = vor.u32 %v3502_v23, %v3501_v42  ;;  %v3510_v52 = vshll.u32 %v8654_v4, %v3495_v26 }
 0x330   : > { %v3358_v58 = vsel %vm3275_vm8, %v3357_v29, %v3356_v8  ;;  %v3511_v60 = vshrl.u32 %v8655_v49, %v3496_v46  ;;  %vm7856_vm1 = vcmp.le.f32.partialorder %v3377_v3, 0.7853982  ;;  %v3443_v31 = vsub.s32 0, %v7842_v20 }
 0x331   : > { %v3361_v39 = vsel %vm7819_vm11, %v8717_v6, %v3358_v58  ;;  %v3506_v21 = vor.u32 %v3505_v19, %v3504_v30  ;;  %v3509_v22 = vor.u32 %v3508_v55, %v3507_v7  ;;  %vm3516_vm2 = vcmp.lt.s32.totalorder %v3494_v34, 4 }
 0x332   : > { %5136 = vcosq.f32 %v3361_v39  ;;  %v3512_v43 = vor.u32 %v3511_v60, %v3510_v52  ;;  %v3589_v35 = vshrl.u32 %v3588_v53, 23  ;;  %v4763_v48 = vmin.u32 %v3443_v31, %v7842_v20 }
 0x333   : > { %5138 = vsinq.f32 %v3361_v39  ;;  %v3463_v27 = vsub.s32 4, %v3439_v56  ;;  %vm3515_vm3 = vcmp.lt.s32.totalorder %v3494_v34, 3  ;;  %vm3514_vm4 = vcmp.lt.s32.totalorder %v3494_v34, 2 }
 0x334   : > { %v3518_v24 = vsel %vm3516_vm2, %v3506_v21, 2102212464  ;;  %v3521_v3 = vsel %vm3513_vm0, %v3500_v15, %v3503_v1  ;;  %v3522_v47 = vsel %vm3516_vm2, %v3509_v22, 920167782  ;;  %v3366_v2 = vadd.s32 3, %v3362_v44 }
 0x335   : > { %v3445_v10 = vclz %v4763_v48  ;;  %v3517_v26 = vsel %vm3513_vm0, %v3497_v18, %v3500_v15  ;;  %v3525_v59 = vsel %vm3513_vm0, %v3503_v1, %v3506_v21  ;;  %v3519_v63 = vsel %vm3515_vm3, %v3503_v1, %v3518_v24 }
 0x336   : > { %v3523_v5 = vsel %vm3515_vm3, %v3506_v21, %v3522_v47  ;;  %v3526_v17 = vsel %vm3516_vm2, %v3512_v43, 1326507024  ;;  %v4770_v51 = vadd.s32 4294967169, %v3589_v35  ;;  %v3464_v46 = vsel %vm3379_vm15, %v3463_v27, %v3439_v56 }
 0x337   : > { %v4764_v36 = vadd.s32 4294967294, %v3445_v10  ;;  %v3524_v61 = vsel %vm3514_vm4, %v3521_v3, %v3523_v5  ;;  %v3527_v44 = vsel %vm3515_vm3, %v3509_v22, %v3526_v17  ;;  %v3520_v37 = vsel %vm3514_vm4, %v3517_v26, %v3519_v63 }
 0x338   : > { %v3528_v53 = vsel %vm3514_vm4, %v3525_v59, %v3527_v44  ;;  %v7877_v57 = vmul.u32.u64.low %v7827_v50, %v3524_v61  ;;  %v7878_v32 = vmul.u32.u64.high %v7827_v50, %v3524_v61, %v7877_v57  ;;  %v3433_v45 = vadd.s32 %v7795_v25, %v7802_v9 }
 0x339   : > { %vm4765_vm5 = vcmp.lt.s32.totalorder %v4764_v36, 0  ;;  %v7884_v28 = vmul.u32.u64.low %v7827_v50, %v3528_v53  ;;  %v7885_v56 = vmul.u32.u64.high %v7827_v50, %v3528_v53, %v7884_v28  ;;  %v3367_v8 = vand.u32 3, %v3366_v2 }
 0x33a   : > { %v3448_v42 = vsel %vm4765_vm5, 0, %v4764_v36  ;;  %v3466_v23 = vsel %vm7856_vm1, 0, %v3464_v46  ;;  %v3595_v34 = vadd.s32 1, %v4770_v51  ;;  %v3536_v19 = vmul.u32 %v7827_v50, %v3520_v37  ;;  %v8729_v28 = vld [vmem:[#allocation17_spill] sm:$0xff] }
 0x33b   : > { %v3449_v14 = vsub.s32 32, %v3448_v42  ;;  %v3450_v38 = vshll.u32 %v7842_v20, %v3448_v42  ;;  %v3453_v30 = vsub.s32 4294967266, %v3448_v42  ;;  %v3539_v12 = vadd.s32 1, %v7878_v32 }
 0x33c   : > { %vm3596_vm6 = vcmp.gt.s32.totalorder %v3595_v34, 0  ;;  %vm3365_vm7 = vweird.f32 %v8717_v6  ;;  %vm3538_vm8 = vc.u32 %v7885_v56, %v7877_v57  ;;  %v3470_v29 = vadd.s32 3, %v3466_v23 }
 0x33d   : > { %v3451_v25 = vshrl.u32 %v3433_v45, %v3449_v14  ;;  %v3454_v9 = vadd.s32 127, %v3453_v30  ;;  %v3540_v18 = vsel %vm3538_vm8, %v3539_v12, %v7878_v32  ;;  %v3585_v15 = vand.u32 2147483647, %v8726_v41 }
 0x33e   : > { %v3597_v7 = vsel %vm3596_vm6, %v3595_v34, 0  ;;  %vm3372_vm9 = vcmp.eq.s32.totalorder %v3367_v8, 2  ;;  %v3541_v58 = vadd.s32 %v3540_v18, %v3536_v19  ;;  %vm3368_vm10 = vcmp.lt.s32.totalorder %v3367_v8, 2 }
 0x33f   : > { %v5137_v20 = vpop.eup %5136  ;;  %v3452_v55 = vor.u32 %v3451_v25, %v3450_v38  ;;  %v3455_v50 = vshll.u32 %v3454_v9, 23  ;;  %vm3369_vm11 = vcmp.eq.s32.totalorder %v3367_v8, 0  ;;  %v3599_v60 = vand.u32 31, %v3597_v7 }
 0x340   : > { %v5139_v1 = vpop.eup %5138  ;;  %v3373_v52 = vxor.u32 2147483648, %v5137_v20  ;;  %v3542_v22 = vadd.s32 536870912, %v3541_v58  ;;  %v7897_v35 = vand.u32 3, %v3470_v29  ;;  %v3592_v48 = vand.u32 8388607, %v3585_v15 }
 0x341   : > { %v3370_v39 = vxor.u32 2147483648, %v5139_v1  ;;  %v3456_v31 = vor.u32 4788187, %v3455_v50  ;;  %v3459_v21 = vcvt.s32.f32 %v3452_v55  ;;  %v3600_v27 = vsub.s32 32, %v3599_v60 }
 0x342   : > { %v3374_v43 = vsel %vm3372_vm9, %v3373_v52, %v5139_v1  ;;  %v7901_v47 = vshrl.u32 %v3542_v22, 30  ;;  %v3602_v2 = vshll.u32 %v8659_v62, %v3599_v60  ;;  %v3605_v59 = vshll.u32 %v8651_v13, %v3599_v60 }
 0x343   : > { %v3371_v24 = vsel %vm3369_vm11, %v5137_v20, %v3370_v39  ;;  %v3457_v3 = vand.u32 2147483647, %v3456_v31  ;;  %v3603_v26 = vshrl.u32 %v8651_v13, %v3600_v27  ;;  %v3608_v63 = vshll.u32 %v8652_v54, %v3599_v60 }
 0x344   : > { %v3375_v10 = vsel %vm3368_vm10, %v3371_v24, %v3374_v43  ;;  %v3544_v51 = vshll.u32 %v7901_v47, 30  ;;  %v3606_v36 = vshrl.u32 %v8652_v54, %v3600_v27  ;;  %v3593_v46 = vor.u32 8388608, %v3592_v48 }
 0x345   : > { %v3376_v5 = vsel %vm3365_vm7, nan, %v3375_v10  ;;  %v3460_v17 = vmul.f32 %v3459_v21, %v3457_v3  ;;  %v3598_v61 = vshrl.u32 %v3597_v7, 5  ;;  %v3609_v44 = vshrl.u32 %v8653_v16, %v3600_v27 }
 0x346   : > { %v3611_v37 = vshll.u32 %v8653_v16, %v3599_v60  ;;  %4548 = vst [vmem:[%s5997_s17 + $0xd8] sm:$0xff] %v3376_v5  ;;  %v7915_v32 = vsub.s32 %v3541_v58, %v3544_v51  ;;  %v3612_v45 = vshrl.u32 %v8654_v4, %v3600_v27  ;;  %v3692_v6 = vand.u32 2139095040, %v8729_v28 }
 0x347   : > { %v3461_v53 = vxor.u32 2147483648, %v3460_v17  ;;  %v3601_v8 = vshrl.u32 %v8659_v62, %v3600_v27  ;;  %v3604_v42 = vor.u32 %v3603_v26, %v3602_v2  ;;  %v3614_v23 = vshll.u32 %v8654_v4, %v3599_v60 }
 0x348   : > { %v3615_v34 = vshrl.u32 %v8655_v49, %v3600_v27  ;;  %v3547_v38 = vsub.s32 0, %v7915_v32  ;;  %v3607_v30 = vor.u32 %v3606_v36, %v3605_v59  ;;  %v3610_v19 = vor.u32 %v3609_v44, %v3608_v63 }
 0x349   : > { %v3462_v14 = vsel %vm3379_vm15, %v3461_v53, %v3460_v17  ;;  %v3613_v25 = vor.u32 %v3612_v45, %v3611_v37  ;;  %vm3617_vm12 = vcmp.lt.s32.totalorder %v3598_v61, 1  ;;  %v3633_v18 = vshll.u32 %v3593_v46, 8 }
 0x34a   : > { %v3465_v12 = vsel %vm7856_vm1, %v8720_v0, %v3462_v14  ;;  %v3616_v9 = vor.u32 %v3615_v34, %v3614_v23  ;;  %v4767_v29 = vmin.u32 %v3547_v38, %v7915_v32  ;;  %v3689_v7 = vand.u32 2147483647, %v8729_v28 }
 0x34b   : > { %5140 = vcosq.f32 %v3465_v12  ;;  %vm3619_vm13 = vcmp.lt.s32.totalorder %v3598_v61, 3  ;;  %vm3620_vm14 = vcmp.lt.s32.totalorder %v3598_v61, 4  ;;  %v3693_v20 = vshrl.u32 %v3692_v6, 23 }
 0x34c   : > { %5142 = vsinq.f32 %v3465_v12  ;;  %v3549_v55 = vclz %v4767_v29  ;;  %vm3618_vm15 = vcmp.lt.s32.totalorder %v3598_v61, 2  ;;  %v3621_v50 = vsel %vm3617_vm12, %v3601_v8, %v3604_v42 }
 0x34d   : > { %v3625_v58 = vsel %vm3617_vm12, %v3604_v42, %v3607_v30  ;;  %v3622_v1 = vsel %vm3620_vm14, %v3610_v19, 2102212464  ;;  %v3626_v40 = vsel %vm3620_vm14, %v3613_v25, 920167782  ;;  %v3629_v52 = vsel %vm3617_vm12, %v3607_v30, %v3610_v19 }
 0x34e   : > { %v3630_v60 = vsel %vm3620_vm14, %v3616_v9, 1326507024  ;;  %v4768_v39 = vadd.s32 4294967294, %v3549_v55  ;;  %v3623_v31 = vsel %vm3619_vm13, %v3607_v30, %v3622_v1  ;;  %v3627_v21 = vsel %vm3619_vm13, %v3610_v19, %v3626_v40 }
 0x34f   : > { %v3631_v22 = vsel %vm3619_vm13, %v3613_v25, %v3630_v60  ;;  %v3537_v43 = vadd.s32 %v7877_v57, %v7885_v56  ;;  %v3628_v48 = vsel %vm3618_vm15, %v3625_v58, %v3627_v21  ;;  %v4774_v24 = vadd.s32 4294967169, %v3693_v20 }
 0x350   : > { %v3632_v27 = vsel %vm3618_vm15, %v3629_v52, %v3631_v22  ;;  %vm4769_vm0 = vcmp.lt.s32.totalorder %v4768_v39, 0  ;;  %v3624_v3 = vsel %vm3618_vm15, %v3621_v50, %v3623_v31  ;;  %v3567_v51 = vsub.s32 4, %v7901_v47 }
 0x351   : > { %v7935_v2 = vmul.u32.u64.low %v3633_v18, %v3632_v27  ;;  %v7936_v10 = vmul.u32.u64.high %v3633_v18, %v3632_v27, %v7935_v2  ;;  %v3552_v26 = vsel %vm4769_vm0, 0, %v4768_v39  ;;  %v3699_v5 = vadd.s32 1, %v4774_v24 }
 0x352   : > { %v7938_v59 = vmul.u32.u64.low %v3633_v18, %v3628_v48  ;;  %v7939_v63 = vmul.u32.u64.high %v3633_v18, %v3628_v48, %v7938_v59  ;;  %v3553_v17 = vsub.s32 32, %v3552_v26  ;;  %v3554_v57 = vshll.u32 %v7915_v32, %v3552_v26 }
 0x353   : > { %v3557_v56 = vsub.s32 4294967266, %v3552_v26  ;;  %vm3469_vm1 = vweird.f32 %v8720_v0  ;;  %vm3483_vm2 = vcmp.lt.s32.totalorder %v8723_v11, 0  ;;  %v3696_v36 = vand.u32 8388607, %v3689_v7  ;;  %v8732_v26 = vld [vmem:[#allocation18_spill] sm:$0xff] }
 0x354   : > { %vm3700_vm3 = vcmp.gt.s32.totalorder %v3699_v5, 0  ;;  %v3555_v46 = vshrl.u32 %v3537_v43, %v3553_v17  ;;  %v3640_v44 = vmul.u32 %v3633_v18, %v3624_v3  ;;  %vm3642_vm4 = vc.u32 %v7936_v10, %v7938_v59 }
 0x355   : > { %v3558_v61 = vadd.s32 127, %v3557_v56  ;;  %vm3472_vm5 = vcmp.lt.s32.totalorder %v7897_v35, 2  ;;  %vm7953_vm6 = vcmp.le.f32.partialorder %v3481_v33, 0.7853982  ;;  %v3643_v53 = vadd.s32 1, %v7939_v63 }
 0x356   : > { %v3701_v32 = vsel %vm3700_vm3, %v3699_v5, 0  ;;  %v3556_v45 = vor.u32 %v3555_v46, %v3554_v57  ;;  %v7961_v8 = vsel %vm3483_vm2, %v3567_v51, %v7901_v47  ;;  %vm3473_vm7 = vcmp.eq.s32.totalorder %v7897_v35, 0 }
 0x357   : > { %v3559_v6 = vshll.u32 %v3558_v61, 23  ;;  %v3703_v42 = vand.u32 31, %v3701_v32  ;;  %vm3476_vm8 = vcmp.eq.s32.totalorder %v7897_v35, 2  ;;  %v3644_v33 = vsel %vm3642_vm4, %v3643_v53, %v7939_v63 }
 0x358   : > { %v5141_v23 = vpop.eup %5140  ;;  %v3697_v34 = vor.u32 8388608, %v3696_v36  ;;  %v3563_v19 = vcvt.s32.f32 %v3556_v45  ;;  %v3645_v12 = vadd.s32 %v3644_v33, %v3640_v44  ;;  %v3570_v47 = vsel %vm7953_vm6, 0, %v7961_v8 }
 0x359   : > { %v5143_v14 = vpop.eup %5142  ;;  %v3477_v38 = vxor.u32 2147483648, %v5141_v23  ;;  %v3560_v30 = vor.u32 4788187, %v3559_v6  ;;  %v3704_v9 = vsub.s32 32, %v3703_v42  ;;  %v3706_v29 = vshll.u32 %v8659_v62, %v3703_v42 }
 0x35a   : > { %v3474_v25 = vxor.u32 2147483648, %v5143_v14  ;;  %v3646_v55 = vadd.s32 536870912, %v3645_v12  ;;  %v3709_v50 = vshll.u32 %v8651_v13, %v3703_v42  ;;  %v3712_v52 = vshll.u32 %v8652_v54, %v3703_v42 }
 0x35b   : > { %v3478_v18 = vsel %vm3476_vm8, %v3477_v38, %v5143_v14  ;;  %v3561_v20 = vand.u32 2147483647, %v3560_v30  ;;  %v3707_v1 = vshrl.u32 %v8651_v13, %v3704_v9  ;;  %v3710_v40 = vshrl.u32 %v8652_v54, %v3704_v9 }
 0x35c   : > { %v3475_v58 = vsel %vm3473_vm7, %v5141_v23, %v3474_v25  ;;  %v3647_v31 = vshrl.u32 %v3646_v55, 30  ;;  %v3713_v21 = vshrl.u32 %v8653_v16, %v3704_v9  ;;  %v3702_v43 = vshrl.u32 %v3701_v32, 5 }
 0x35d   : > { %v3479_v60 = vsel %vm3472_vm5, %v3475_v58, %v3478_v18  ;;  %v3564_v39 = vmul.f32 %v3563_v19, %v3561_v20  ;;  %v3715_v48 = vshll.u32 %v8653_v16, %v3703_v42  ;;  %v7982_v27 = vshll.u32 %v3697_v34, 8 }
 0x35e   : > { %v3480_v22 = vsel %vm3469_vm1, nan, %v3479_v60  ;;  %v3648_v3 = vshll.u32 %v3647_v31, 30  ;;  %v3705_v2 = vshrl.u32 %v8659_v62, %v3704_v9  ;;  %v3796_v63 = vand.u32 2139095040, %v8732_v26 }
 0x35f   : > { %v3565_v24 = vxor.u32 2147483648, %v3564_v39  ;;  %4549 = vst [vmem:[%s5997_s17 + $0xe0] sm:$0xff] %v3480_v22  ;;  %v3708_v35 = vor.u32 %v3707_v1, %v3706_v29  ;;  %v3716_v5 = vshrl.u32 %v8654_v4, %v3704_v9  ;;  %v3718_v17 = vshll.u32 %v8654_v4, %v3703_v42 }
 0x360   : > { %v3719_v0 = vshrl.u32 %v8655_v49, %v3704_v9  ;;  %v7992_v56 = vsub.s32 %v3645_v12, %v3648_v3  ;;  %v3711_v51 = vor.u32 %v3710_v40, %v3709_v50  ;;  %v3714_v36 = vor.u32 %v3713_v21, %v3712_v52 }
 0x361   : > { %v3566_v57 = vsel %vm3483_vm2, %v3565_v24, %v3564_v39  ;;  %v3717_v61 = vor.u32 %v3716_v5, %v3715_v48  ;;  %vm3721_vm9 = vcmp.lt.s32.totalorder %v3702_v43, 1  ;;  %vm3723_vm10 = vcmp.lt.s32.totalorder %v3702_v43, 3 }
 0x362   : > { %v3569_v46 = vsel %vm7953_vm6, %v8723_v11, %v3566_v57  ;;  %v3720_v44 = vor.u32 %v3719_v0, %v3718_v17  ;;  %v3651_v53 = vsub.s32 0, %v7992_v56  ;;  %v3797_v32 = vshrl.u32 %v3796_v63, 23 }
 0x363   : > { %5144 = vcosq.f32 %v3569_v46  ;;  %vm3722_vm11 = vcmp.lt.s32.totalorder %v3702_v43, 2  ;;  %vm3724_vm12 = vcmp.lt.s32.totalorder %v3702_v43, 4  ;;  %v3725_v45 = vsel %vm3721_vm9, %v3705_v2, %v3708_v35 }
 0x364   : > { %5146 = vsinq.f32 %v3569_v46  ;;  %v4771_v6 = vmin.u32 %v3651_v53, %v7992_v56  ;;  %v3726_v8 = vsel %vm3724_vm12, %v3714_v36, 2102212464  ;;  %v3729_v42 = vsel %vm3721_vm9, %v3708_v35, %v3711_v51 }
 0x365   : > { %v3730_v23 = vsel %vm3724_vm12, %v3717_v61, 920167782  ;;  %v3727_v37 = vsel %vm3723_vm10, %v3711_v51, %v3726_v8  ;;  %v3733_v34 = vsel %vm3721_vm9, %v3711_v51, %v3714_v36  ;;  %v3734_v14 = vsel %vm3724_vm12, %v3720_v44, 1326507024 }
 0x366   : > { %v3731_v33 = vsel %vm3723_vm10, %v3714_v36, %v3730_v23  ;;  %v3574_v38 = vadd.s32 3, %v3570_v47  ;;  %v3653_v30 = vclz %v4771_v6  ;;  %v3671_v19 = vsub.s32 4, %v3647_v31 }
 0x367   : > { %v3728_v12 = vsel %vm3722_vm11, %v3725_v45, %v3727_v37  ;;  %v3732_v25 = vsel %vm3722_vm11, %v3729_v42, %v3731_v33  ;;  %v3735_v9 = vsel %vm3723_vm10, %v3717_v61, %v3734_v14  ;;  %v4778_v29 = vadd.s32 4294967169, %v3797_v32  ;;  %v8735_v37 = vld [vmem:[#allocation19_spill] sm:$0xff] }
 0x368   : > { %v4772_v18 = vadd.s32 4294967294, %v3653_v30  ;;  %v3736_v20 = vsel %vm3722_vm11, %v3733_v34, %v3735_v9  ;;  %v8006_v55 = vmul.u32.u64.low %v7982_v27, %v3732_v25  ;;  %v8007_v50 = vmul.u32.u64.high %v7982_v27, %v3732_v25, %v8006_v55 }
 0x369   : > { %vm3587_vm13 = vcmp.lt.s32.totalorder %v8726_v41, 0  ;;  %v8012_v47 = vmul.u32.u64.low %v7982_v27, %v3736_v20  ;;  %v8013_v58 = vmul.u32.u64.high %v7982_v27, %v3736_v20, %v8012_v47  ;;  %v3793_v1 = vand.u32 2147483647, %v8732_v26 }
 0x36a   : > { %vm3573_vm14 = vweird.f32 %v8723_v11  ;;  %v3641_v40 = vadd.s32 %v7938_v59, %v7936_v10  ;;  %vm4773_vm15 = vcmp.lt.s32.totalorder %v4772_v18, 0  ;;  %v3672_v52 = vsel %vm3587_vm13, %v3671_v19, %v3647_v31 }
 0x36b   : > { %v3803_v60 = vadd.s32 1, %v4778_v29  ;;  %v3575_v39 = vand.u32 3, %v3574_v38  ;;  %vm8023_vm0 = vcmp.le.f32.partialorder %v3585_v15, 0.7853982  ;;  %v3656_v22 = vsel %vm4773_vm15, 0, %v4772_v18 }
 0x36c   : > { %v3744_v43 = vmul.u32 %v7982_v27, %v3728_v12  ;;  %v3657_v48 = vsub.s32 32, %v3656_v22  ;;  %v3658_v24 = vshll.u32 %v7992_v56, %v3656_v22  ;;  %v3661_v3 = vsub.s32 4294967266, %v3656_v22 }
 0x36d   : > { %v3747_v10 = vadd.s32 1, %v8007_v50  ;;  %v3674_v59 = vsel %vm8023_vm0, 0, %v3672_v52  ;;  %vm3746_vm1 = vc.u32 %v8013_v58, %v8006_v55  ;;  %v3800_v15 = vand.u32 8388607, %v3793_v1 }
 0x36e   : > { %vm3804_vm2 = vcmp.gt.s32.totalorder %v3803_v60, 0  ;;  %v3659_v31 = vshrl.u32 %v3641_v40, %v3657_v48  ;;  %v3662_v2 = vadd.s32 127, %v3661_v3  ;;  %vm3576_vm3 = vcmp.lt.s32.totalorder %v3575_v39, 2 }
 0x36f   : > { %v3748_v27 = vsel %vm3746_vm1, %v3747_v10, %v8007_v50  ;;  %v3805_v63 = vsel %vm3804_vm2, %v3803_v60, 0  ;;  %vm3580_vm4 = vcmp.eq.s32.totalorder %v3575_v39, 2  ;;  %vm3577_vm5 = vcmp.eq.s32.totalorder %v3575_v39, 0 }
 0x370   : > { %v5145_v35 = vpop.eup %5144  ;;  %v3749_v5 = vadd.s32 %v3748_v27, %v3744_v43  ;;  %v3807_v17 = vand.u32 31, %v3805_v63  ;;  %v3660_v56 = vor.u32 %v3659_v31, %v3658_v24  ;;  %v3663_v51 = vshll.u32 %v3662_v2, 23 }
 0x371   : > { %v5147_v0 = vpop.eup %5146  ;;  %v3581_v57 = vxor.u32 2147483648, %v5145_v35  ;;  %v8037_v46 = vadd.s32 3, %v3674_v59  ;;  %v3801_v6 = vor.u32 8388608, %v3800_v15  ;;  %v3806_v23 = vshrl.u32 %v3805_v63, 5 }
 0x372   : > { %v3578_v36 = vxor.u32 2147483648, %v5147_v0  ;;  %v3750_v61 = vadd.s32 536870912, %v3749_v5  ;;  %v3808_v44 = vsub.s32 32, %v3807_v17  ;;  %v3664_v32 = vor.u32 4788187, %v3663_v51 }
 0x373   : > { %v3582_v53 = vsel %vm3580_vm4, %v3581_v57, %v5147_v0  ;;  %v3667_v45 = vcvt.s32.f32 %v3660_v56  ;;  %v3900_v33 = vand.u32 2139095040, %v8735_v37  ;;  %v3810_v38 = vshll.u32 %v8659_v62, %v3807_v17 }
 0x374   : > { %v3579_v8 = vsel %vm3577_vm5, %v5145_v35, %v3578_v36  ;;  %v8039_v42 = vshrl.u32 %v3750_v61, 30  ;;  %v3665_v14 = vand.u32 2147483647, %v3664_v32  ;;  %v3813_v30 = vshll.u32 %v8651_v13, %v3807_v17 }
 0x375   : > { %v3583_v34 = vsel %vm3576_vm3, %v3579_v8, %v3582_v53  ;;  %v3811_v25 = vshrl.u32 %v8651_v13, %v3808_v44  ;;  %v3814_v9 = vshrl.u32 %v8652_v54, %v3808_v44  ;;  %v3816_v18 = vshll.u32 %v8652_v54, %v3807_v17 }
 0x376   : > { %v3584_v19 = vsel %vm3573_vm14, nan, %v3583_v34  ;;  %v3752_v12 = vshll.u32 %v8039_v42, 30  ;;  %v3668_v29 = vmul.f32 %v3667_v45, %v3665_v14  ;;  %v3817_v20 = vshrl.u32 %v8653_v16, %v3808_v44 }
 0x377   : > { %v3819_v50 = vshll.u32 %v8653_v16, %v3807_v17  ;;  %4550 = vst [vmem:[%s5997_s17 + $0xe8] sm:$0xff] %v3584_v19  ;;  %v3820_v40 = vshrl.u32 %v8654_v4, %v3808_v44  ;;  %v3822_v11 = vshll.u32 %v8654_v4, %v3807_v17  ;;  %v3897_v52 = vand.u32 2147483647, %v8735_v37 }
 0x378   : > { %v8054_v47 = vsub.s32 %v3749_v5, %v3752_v12  ;;  %v3669_v60 = vxor.u32 2147483648, %v3668_v29  ;;  %v3823_v39 = vshrl.u32 %v8655_v49, %v3808_v44  ;;  %v8060_v22 = vshll.u32 %v3801_v6, 8 }
 0x379   : > { %v3901_v43 = vshrl.u32 %v3900_v33, 23  ;;  %v3809_v24 = vshrl.u32 %v8659_v62, %v3808_v44  ;;  %v3812_v3 = vor.u32 %v3811_v25, %v3810_v38  ;;  %v3815_v10 = vor.u32 %v3814_v9, %v3813_v30 }
 0x37a   : > { %v3755_v48 = vsub.s32 0, %v8054_v47  ;;  %v3670_v59 = vsel %vm3587_vm13, %v3669_v60, %v3668_v29  ;;  %v3818_v15 = vor.u32 %v3817_v20, %v3816_v18  ;;  %v3821_v31 = vor.u32 %v3820_v40, %v3819_v50 }
 0x37b   : > { %vm3825_vm6 = vcmp.lt.s32.totalorder %v3806_v23, 1  ;;  %v3673_v2 = vsel %vm8023_vm0, %v8726_v41, %v3670_v59  ;;  %v3824_v63 = vor.u32 %v3823_v39, %v3822_v11  ;;  %vm3828_vm7 = vcmp.lt.s32.totalorder %v3806_v23, 4 }
 0x37c   : > { %v4775_v27 = vmin.u32 %v3755_v48, %v8054_v47  ;;  %5148 = vcosq.f32 %v3673_v2  ;;  %vm3826_vm8 = vcmp.lt.s32.totalorder %v3806_v23, 2  ;;  %vm3827_vm9 = vcmp.lt.s32.totalorder %v3806_v23, 3 }
 0x37d   : > { %v3830_v35 = vsel %vm3828_vm7, %v3818_v15, 2102212464  ;;  %5150 = vsinq.f32 %v3673_v2  ;;  %v3829_v17 = vsel %vm3825_vm6, %v3809_v24, %v3812_v3  ;;  %v3833_v0 = vsel %vm3825_vm6, %v3812_v3, %v3815_v10 }
 0x37e   : > { %v3757_v5 = vclz %v4775_v27  ;;  %v3745_v57 = vadd.s32 %v8006_v55, %v8013_v58  ;;  %v3831_v21 = vsel %vm3827_vm9, %v3815_v10, %v3830_v35  ;;  %v3834_v56 = vsel %vm3828_vm7, %v3821_v31, 920167782 }
 0x37f   : > { %v3837_v51 = vsel %vm3825_vm6, %v3815_v10, %v3818_v15  ;;  %v3835_v61 = vsel %vm3827_vm9, %v3818_v15, %v3834_v56  ;;  %v3838_v44 = vsel %vm3828_vm7, %v3824_v63, 1326507024  ;;  %v3904_v53 = vand.u32 8388607, %v3897_v52 }
 0x380   : > { %v4776_v36 = vadd.s32 4294967294, %v3757_v5  ;;  %v3832_v32 = vsel %vm3826_vm8, %v3829_v17, %v3831_v21  ;;  %v3836_v45 = vsel %vm3826_vm8, %v3833_v0, %v3835_v61  ;;  %v3839_v6 = vsel %vm3827_vm9, %v3821_v31, %v3838_v44  ;;  %v8738_v5 = vld [vmem:[#allocation20_spill] sm:$0xff] }
 0x381   : > { %v4782_v8 = vadd.s32 4294967169, %v3901_v43  ;;  %v3840_v55 = vsel %vm3826_vm8, %v3837_v51, %v3839_v6  ;;  %v8084_v58 = vmul.u32.u64.low %v8060_v22, %v3836_v45  ;;  %v8085_v33 = vmul.u32.u64.high %v8060_v22, %v3836_v45, %v8084_v58 }
 0x382   : > { %vm4777_vm10 = vcmp.lt.s32.totalorder %v4776_v36, 0  ;;  %v3775_v14 = vsub.s32 4, %v8039_v42  ;;  %v8090_v38 = vmul.u32.u64.low %v8060_v22, %v3840_v55  ;;  %v8091_v30 = vmul.u32.u64.high %v8060_v22, %v3840_v55, %v8090_v38 }
 0x383   : > { %v3760_v34 = vsel %vm4777_vm10, 0, %v4776_v36  ;;  %v3907_v9 = vadd.s32 1, %v4782_v8  ;;  %vm3677_vm11 = vweird.f32 %v8726_v41  ;;  %v3679_v23 = vand.u32 3, %v8037_v46 }
 0x384   : > { %v3761_v19 = vsub.s32 32, %v3760_v34  ;;  %v3762_v12 = vshll.u32 %v8054_v47, %v3760_v34  ;;  %v3765_v25 = vsub.s32 4294967266, %v3760_v34  ;;  %vm3691_vm12 = vcmp.lt.s32.totalorder %v8729_v28, 0 }
 0x385   : > { %v3848_v29 = vmul.u32 %v8060_v22, %v3832_v32  ;;  %v3851_v50 = vadd.s32 1, %v8085_v33  ;;  %vm3908_vm13 = vcmp.gt.s32.totalorder %v3907_v9, 0  ;;  %v8102_v40 = vsel %vm3691_vm12, %v3775_v14, %v8039_v42 }
 0x386   : > { %v3763_v18 = vshrl.u32 %v3745_v57, %v3761_v19  ;;  %v3766_v20 = vadd.s32 127, %v3765_v25  ;;  %vm3850_vm14 = vc.u32 %v8091_v30, %v8084_v58  ;;  %v3905_v47 = vor.u32 8388608, %v3904_v53 }
 0x387   : > { %v3909_v11 = vsel %vm3908_vm13, %v3907_v9, 0  ;;  %vm8108_vm15 = vcmp.le.f32.partialorder %v3689_v7, 0.7853982  ;;  %v3852_v22 = vsel %vm3850_vm14, %v3851_v50, %v8085_v33  ;;  %vm3680_vm0 = vcmp.lt.s32.totalorder %v3679_v23, 2 }
 0x388   : > { %v3764_v60 = vor.u32 %v3763_v18, %v3762_v12  ;;  %v3767_v39 = vshll.u32 %v3766_v20, 23  ;;  %vm3681_vm1 = vcmp.eq.s32.totalorder %v3679_v23, 0  ;;  %v3853_v43 = vadd.s32 %v3852_v22, %v3848_v29 }
 0x389   : > { %v3911_v42 = vand.u32 31, %v3909_v11  ;;  %v5149_v48 = vpop.eup %5148  ;;  %vm3684_vm2 = vcmp.eq.s32.totalorder %v3679_v23, 2  ;;  %v3778_v10 = vsel %vm8108_vm15, 0, %v8102_v40  ;;  %v8116_v2 = vshll.u32 %v3905_v47, 8 }
 0x38a   : > { %v3768_v24 = vor.u32 4788187, %v3767_v39  ;;  %v3771_v3 = vcvt.s32.f32 %v3764_v60  ;;  %v5151_v7 = vpop.eup %5150  ;;  %v3685_v59 = vxor.u32 2147483648, %v5149_v48  ;;  %v3854_v15 = vadd.s32 536870912, %v3853_v43 }
 0x38b   : > { %v3912_v31 = vsub.s32 32, %v3911_v42  ;;  %v3682_v27 = vxor.u32 2147483648, %v5151_v7  ;;  %v3910_v35 = vshrl.u32 %v3909_v11, 5  ;;  %v4004_v17 = vand.u32 2139095040, %v8738_v5 }
 0x38c   : > { %v3769_v63 = vand.u32 2147483647, %v3768_v24  ;;  %v3686_v0 = vsel %vm3684_vm2, %v3685_v59, %v5151_v7  ;;  %v3855_v57 = vshrl.u32 %v3854_v15, 30  ;;  %v3914_v21 = vshll.u32 %v8659_v62, %v3911_v42 }
 0x38d   : > { %v3915_v56 = vshrl.u32 %v8651_v13, %v3912_v31  ;;  %v3683_v51 = vsel %vm3681_vm1, %v5149_v48, %v3682_v27  ;;  %v3917_v61 = vshll.u32 %v8651_v13, %v3911_v42  ;;  %v3918_v44 = vshrl.u32 %v8652_v54, %v3912_v31 }
 0x38e   : > { %v3772_v36 = vmul.f32 %v3771_v3, %v3769_v63  ;;  %v3687_v53 = vsel %vm3680_vm0, %v3683_v51, %v3686_v0  ;;  %v3856_v32 = vshll.u32 %v3855_v57, 30  ;;  %v3920_v45 = vshll.u32 %v8652_v54, %v3911_v42 }
 0x38f   : > { %v3921_v6 = vshrl.u32 %v8653_v16, %v3912_v31  ;;  %v3688_v8 = vsel %vm3677_vm11, nan, %v3687_v53  ;;  %vm3795_vm3 = vcmp.lt.s32.totalorder %v8732_v26, 0  ;;  %v3913_v33 = vshrl.u32 %v8659_v62, %v3912_v31 }
 0x390   : > { %v3773_v55 = vxor.u32 2147483648, %v3772_v36  ;;  %vm3929_vm4 = vcmp.lt.s32.totalorder %v3910_v35, 1  ;;  %v8131_v34 = vsub.s32 %v3853_v43, %v3856_v32  ;;  %v3916_v14 = vor.u32 %v3915_v56, %v3914_v21  ;;  %4551 = vst [vmem:[%s5997_s17 + $0xf0] sm:$0xff] %v3688_v8 }
 0x391   : > { %v3923_v38 = vshll.u32 %v8653_v16, %v3911_v42  ;;  %v3924_v19 = vshrl.u32 %v8654_v4, %v3912_v31  ;;  %v3919_v25 = vor.u32 %v3918_v44, %v3917_v61  ;;  %v3926_v41 = vshll.u32 %v8654_v4, %v3911_v42 }
 0x392   : > { %v3774_v12 = vsel %vm3691_vm12, %v3773_v55, %v3772_v36  ;;  %v3927_v9 = vshrl.u32 %v8655_v49, %v3912_v31  ;;  %vm8145_vm5 = vcmp.le.f32.partialorder %v3793_v1, 0.7853982  ;;  %v3859_v18 = vsub.s32 0, %v8131_v34 }
 0x393   : > { %v3777_v23 = vsel %vm8108_vm15, %v8729_v28, %v3774_v12  ;;  %v3922_v20 = vor.u32 %v3921_v6, %v3920_v45  ;;  %v3925_v50 = vor.u32 %v3924_v19, %v3923_v38  ;;  %vm3932_vm6 = vcmp.lt.s32.totalorder %v3910_v35, 4 }
 0x394   : > { %5152 = vcosq.f32 %v3777_v23  ;;  %v3928_v40 = vor.u32 %v3927_v9, %v3926_v41  ;;  %v4005_v47 = vshrl.u32 %v4004_v17, 23  ;;  %v4779_v11 = vmin.u32 %v3859_v18, %v8131_v34 }
 0x395   : > { %5154 = vsinq.f32 %v3777_v23  ;;  %v3879_v60 = vsub.s32 4, %v3855_v57  ;;  %vm3931_vm7 = vcmp.lt.s32.totalorder %v3910_v35, 3  ;;  %vm3930_vm8 = vcmp.lt.s32.totalorder %v3910_v35, 2 }
 0x396   : > { %v3934_v46 = vsel %vm3932_vm6, %v3922_v20, 2102212464  ;;  %v3937_v1 = vsel %vm3929_vm4, %v3916_v14, %v3919_v25  ;;  %v3938_v39 = vsel %vm3932_vm6, %v3925_v50, 920167782  ;;  %v3782_v22 = vadd.s32 3, %v3778_v10 }
 0x397   : > { %v3861_v43 = vclz %v4779_v11  ;;  %v3933_v42 = vsel %vm3929_vm4, %v3913_v33, %v3916_v14  ;;  %v3941_v48 = vsel %vm3929_vm4, %v3919_v25, %v3922_v20  ;;  %v3935_v24 = vsel %vm3931_vm7, %v3919_v25, %v3934_v46 }
 0x398   : > { %v3939_v3 = vsel %vm3931_vm7, %v3922_v20, %v3938_v39  ;;  %v3942_v7 = vsel %vm3932_vm6, %v3928_v40, 1326507024  ;;  %v4786_v59 = vadd.s32 4294967169, %v4005_v47  ;;  %v3880_v31 = vsel %vm3795_vm3, %v3879_v60, %v3855_v57 }
 0x399   : > { %v4780_v15 = vadd.s32 4294967294, %v3861_v43  ;;  %v3940_v27 = vsel %vm3930_vm8, %v3937_v1, %v3939_v3  ;;  %v3943_v10 = vsel %vm3931_vm7, %v3925_v50, %v3942_v7  ;;  %v3936_v63 = vsel %vm3930_vm8, %v3933_v42, %v3935_v24 }
 0x39a   : > { %v3944_v17 = vsel %vm3930_vm8, %v3941_v48, %v3943_v10  ;;  %v8166_v0 = vmul.u32.u64.low %v8116_v2, %v3940_v27  ;;  %v8167_v21 = vmul.u32.u64.high %v8116_v2, %v3940_v27, %v8166_v0  ;;  %v3849_v56 = vadd.s32 %v8084_v58, %v8091_v30 }
 0x39b   : > { %vm4781_vm9 = vcmp.lt.s32.totalorder %v4780_v15, 0  ;;  %v8173_v51 = vmul.u32.u64.low %v8116_v2, %v3944_v17  ;;  %v8174_v57 = vmul.u32.u64.high %v8116_v2, %v3944_v17, %v8173_v51  ;;  %v3783_v36 = vand.u32 3, %v3782_v22 }
 0x39c   : > { %v3864_v61 = vsel %vm4781_vm9, 0, %v4780_v15  ;;  %v3882_v44 = vsel %vm8145_vm5, 0, %v3880_v31  ;;  %v4011_v35 = vadd.s32 1, %v4786_v59  ;;  %v3952_v6 = vmul.u32 %v8116_v2, %v3936_v63  ;;  %v8741_v51 = vld [vmem:[#allocation21_spill] sm:$0xff] }
 0x39d   : > { %v3865_v53 = vsub.s32 32, %v3864_v61  ;;  %v3866_v32 = vshll.u32 %v8131_v34, %v3864_v61  ;;  %v3869_v45 = vsub.s32 4294967266, %v3864_v61  ;;  %v3955_v8 = vadd.s32 1, %v8167_v21 }
 0x39e   : > { %vm4012_vm10 = vcmp.gt.s32.totalorder %v4011_v35, 0  ;;  %vm3781_vm11 = vweird.f32 %v8729_v28  ;;  %vm3954_vm12 = vc.u32 %v8174_v57, %v8166_v0  ;;  %v3886_v55 = vadd.s32 3, %v3882_v44 }
 0x39f   : > { %v3867_v58 = vshrl.u32 %v3849_v56, %v3865_v53  ;;  %v3870_v30 = vadd.s32 127, %v3869_v45  ;;  %v3956_v33 = vsel %vm3954_vm12, %v3955_v8, %v8167_v21  ;;  %v4001_v14 = vand.u32 2147483647, %v8738_v5 }
 0x3a0   : > { %v4013_v38 = vsel %vm4012_vm10, %v4011_v35, 0  ;;  %vm3788_vm13 = vcmp.eq.s32.totalorder %v3783_v36, 2  ;;  %v3957_v12 = vadd.s32 %v3956_v33, %v3952_v6  ;;  %vm3784_vm14 = vcmp.lt.s32.totalorder %v3783_v36, 2 }
 0x3a1   : > { %v5153_v34 = vpop.eup %5152  ;;  %v3868_v19 = vor.u32 %v3867_v58, %v3866_v32  ;;  %v3871_v2 = vshll.u32 %v3870_v30, 23  ;;  %vm3785_vm15 = vcmp.eq.s32.totalorder %v3783_v36, 0  ;;  %v4015_v9 = vand.u32 31, %v4013_v38 }
 0x3a2   : > { %v5155_v25 = vpop.eup %5154  ;;  %v3789_v41 = vxor.u32 2147483648, %v5153_v34  ;;  %v3958_v50 = vadd.s32 536870912, %v3957_v12  ;;  %v8186_v47 = vand.u32 3, %v3886_v55  ;;  %v4008_v11 = vand.u32 8388607, %v4001_v14 }
 0x3a3   : > { %v3786_v23 = vxor.u32 2147483648, %v5155_v25  ;;  %v3872_v18 = vor.u32 4788187, %v3871_v2  ;;  %v3875_v20 = vcvt.s32.f32 %v3868_v19  ;;  %v4016_v60 = vsub.s32 32, %v4015_v9 }
 0x3a4   : > { %v3790_v40 = vsel %vm3788_vm13, %v3789_v41, %v5155_v25  ;;  %v8190_v39 = vshrl.u32 %v3958_v50, 30  ;;  %v4018_v22 = vshll.u32 %v8659_v62, %v4015_v9  ;;  %v4021_v48 = vshll.u32 %v8651_v13, %v4015_v9 }
 0x3a5   : > { %v3787_v46 = vsel %vm3785_vm15, %v5153_v34, %v3786_v23  ;;  %v3873_v1 = vand.u32 2147483647, %v3872_v18  ;;  %v4019_v42 = vshrl.u32 %v8651_v13, %v4016_v60  ;;  %v4024_v24 = vshll.u32 %v8652_v54, %v4015_v9 }
 0x3a6   : > { %v3791_v43 = vsel %vm3784_vm14, %v3787_v46, %v3790_v40  ;;  %v3960_v59 = vshll.u32 %v8190_v39, 30  ;;  %v4022_v15 = vshrl.u32 %v8652_v54, %v4016_v60  ;;  %v4009_v31 = vor.u32 8388608, %v4008_v11 }
 0x3a7   : > { %v3792_v3 = vsel %vm3781_vm11, nan, %v3791_v43  ;;  %v3876_v7 = vmul.f32 %v3875_v20, %v3873_v1  ;;  %v4014_v27 = vshrl.u32 %v4013_v38, 5  ;;  %v4025_v10 = vshrl.u32 %v8653_v16, %v4016_v60 }
 0x3a8   : > { %v4027_v63 = vshll.u32 %v8653_v16, %v4015_v9  ;;  %4552 = vst [vmem:[%s5997_s17 + $0xf8] sm:$0xff] %v3792_v3  ;;  %v8204_v21 = vsub.s32 %v3957_v12, %v3960_v59  ;;  %v4028_v56 = vshrl.u32 %v8654_v4, %v4016_v60  ;;  %v4108_v28 = vand.u32 2139095040, %v8741_v51 }
 0x3a9   : > { %v3877_v17 = vxor.u32 2147483648, %v3876_v7  ;;  %v4017_v36 = vshrl.u32 %v8659_v62, %v4016_v60  ;;  %v4020_v61 = vor.u32 %v4019_v42, %v4018_v22  ;;  %v4030_v44 = vshll.u32 %v8654_v4, %v4015_v9 }
 0x3aa   : > { %v4031_v35 = vshrl.u32 %v8655_v49, %v4016_v60  ;;  %v3963_v32 = vsub.s32 0, %v8204_v21  ;;  %v4023_v45 = vor.u32 %v4022_v15, %v4021_v48  ;;  %v4026_v6 = vor.u32 %v4025_v10, %v4024_v24 }
 0x3ab   : > { %v3878_v53 = vsel %vm3795_vm3, %v3877_v17, %v3876_v7  ;;  %v4029_v58 = vor.u32 %v4028_v56, %v4027_v63  ;;  %vm4033_vm0 = vcmp.lt.s32.totalorder %v4014_v27, 1  ;;  %v4049_v33 = vshll.u32 %v4009_v31, 8 }
 0x3ac   : > { %v3881_v8 = vsel %vm8145_vm5, %v8732_v26, %v3878_v53  ;;  %v4032_v30 = vor.u32 %v4031_v35, %v4030_v44  ;;  %v4783_v55 = vmin.u32 %v3963_v32, %v8204_v21  ;;  %v4105_v38 = vand.u32 2147483647, %v8741_v51 }
 0x3ad   : > { %5156 = vcosq.f32 %v3881_v8  ;;  %vm4035_vm1 = vcmp.lt.s32.totalorder %v4014_v27, 3  ;;  %vm4036_vm2 = vcmp.lt.s32.totalorder %v4014_v27, 4  ;;  %v4109_v34 = vshrl.u32 %v4108_v28, 23 }
 0x3ae   : > { %5158 = vsinq.f32 %v3881_v8  ;;  %v3965_v19 = vclz %v4783_v55  ;;  %vm4034_vm3 = vcmp.lt.s32.totalorder %v4014_v27, 2  ;;  %v4037_v2 = vsel %vm4033_vm0, %v4017_v36, %v4020_v61 }
 0x3af   : > { %v4041_v12 = vsel %vm4033_vm0, %v4020_v61, %v4023_v45  ;;  %v4038_v25 = vsel %vm4036_vm2, %v4026_v6, 2102212464  ;;  %v4042_v29 = vsel %vm4036_vm2, %v4029_v58, 920167782  ;;  %v4045_v41 = vsel %vm4033_vm0, %v4023_v45, %v4026_v6 }
 0x3b0   : > { %v4046_v9 = vsel %vm4036_vm2, %v4032_v30, 1326507024  ;;  %v4784_v23 = vadd.s32 4294967294, %v3965_v19  ;;  %v4039_v18 = vsel %vm4035_vm1, %v4023_v45, %v4038_v25  ;;  %v4043_v20 = vsel %vm4035_vm1, %v4026_v6, %v4042_v29 }
 0x3b1   : > { %v4047_v50 = vsel %vm4035_vm1, %v4029_v58, %v4046_v9  ;;  %v3953_v40 = vadd.s32 %v8166_v0, %v8174_v57  ;;  %v4044_v11 = vsel %vm4034_vm3, %v4041_v12, %v4043_v20  ;;  %v4790_v46 = vadd.s32 4294967169, %v4109_v34 }
 0x3b2   : > { %v4048_v60 = vsel %vm4034_vm3, %v4045_v41, %v4047_v50  ;;  %vm4785_vm4 = vcmp.lt.s32.totalorder %v4784_v23, 0  ;;  %v4040_v1 = vsel %vm4034_vm3, %v4037_v2, %v4039_v18  ;;  %v3983_v59 = vsub.s32 4, %v8190_v39 }
 0x3b3   : > { %v8224_v22 = vmul.u32.u64.low %v4049_v33, %v4048_v60  ;;  %v8225_v43 = vmul.u32.u64.high %v4049_v33, %v4048_v60, %v8224_v22  ;;  %v3968_v42 = vsel %vm4785_vm4, 0, %v4784_v23  ;;  %v4115_v3 = vadd.s32 1, %v4790_v46 }
 0x3b4   : > { %v8227_v48 = vmul.u32.u64.low %v4049_v33, %v4044_v11  ;;  %v8228_v24 = vmul.u32.u64.high %v4049_v33, %v4044_v11, %v8227_v48  ;;  %v3969_v7 = vsub.s32 32, %v3968_v42  ;;  %v3970_v0 = vshll.u32 %v8204_v21, %v3968_v42 }
 0x3b5   : > { %v3973_v57 = vsub.s32 4294967266, %v3968_v42  ;;  %vm3885_vm5 = vweird.f32 %v8732_v26  ;;  %vm3899_vm6 = vcmp.lt.s32.totalorder %v8735_v37, 0  ;;  %v4112_v15 = vand.u32 8388607, %v4105_v38 }
 0x3b6   : > { %vm4116_vm7 = vcmp.gt.s32.totalorder %v4115_v3, 0  ;;  %v3971_v31 = vshrl.u32 %v3953_v40, %v3969_v7  ;;  %v4056_v10 = vmul.u32 %v4049_v33, %v4040_v1  ;;  %vm4058_vm8 = vc.u32 %v8225_v43, %v8227_v48 }
 0x3b7   : > { %v3974_v27 = vadd.s32 127, %v3973_v57  ;;  %vm3888_vm9 = vcmp.lt.s32.totalorder %v8186_v47, 2  ;;  %vm8242_vm10 = vcmp.le.f32.partialorder %v3897_v52, 0.7853982  ;;  %v4059_v17 = vadd.s32 1, %v8228_v24 }
 0x3b8   : > { %v4117_v21 = vsel %vm4116_vm7, %v4115_v3, 0  ;;  %v3972_v56 = vor.u32 %v3971_v31, %v3970_v0  ;;  %v8250_v36 = vsel %vm3899_vm6, %v3983_v59, %v8190_v39  ;;  %vm3889_vm11 = vcmp.eq.s32.totalorder %v8186_v47, 0 }
 0x3b9   : > { %v3975_v28 = vshll.u32 %v3974_v27, 23  ;;  %v4119_v61 = vand.u32 31, %v4117_v21  ;;  %vm3892_vm12 = vcmp.eq.s32.totalorder %v8186_v47, 2  ;;  %v4060_v52 = vsel %vm4058_vm8, %v4059_v17, %v8228_v24  ;;  %v8744_v47 = vld [vmem:[#allocation22_spill] sm:$0xff] }
 0x3ba   : > { %v5157_v44 = vpop.eup %5156  ;;  %v4113_v35 = vor.u32 8388608, %v4112_v15  ;;  %v3979_v6 = vcvt.s32.f32 %v3972_v56  ;;  %v4061_v8 = vadd.s32 %v4060_v52, %v4056_v10  ;;  %v3986_v39 = vsel %vm8242_vm10, 0, %v8250_v36 }
 0x3bb   : > { %v5159_v53 = vpop.eup %5158  ;;  %v3893_v32 = vxor.u32 2147483648, %v5157_v44  ;;  %v3976_v45 = vor.u32 4788187, %v3975_v28  ;;  %v4120_v30 = vsub.s32 32, %v4119_v61  ;;  %v4122_v55 = vshll.u32 %v8659_v62, %v4119_v61 }
 0x3bc   : > { %v3890_v58 = vxor.u32 2147483648, %v5159_v53  ;;  %v4062_v19 = vadd.s32 536870912, %v4061_v8  ;;  %v4125_v2 = vshll.u32 %v8651_v13, %v4119_v61  ;;  %v4128_v41 = vshll.u32 %v8652_v54, %v4119_v61 }
 0x3bd   : > { %v3894_v33 = vsel %vm3892_vm12, %v3893_v32, %v5159_v53  ;;  %v3977_v34 = vand.u32 2147483647, %v3976_v45  ;;  %v4123_v25 = vshrl.u32 %v8651_v13, %v4120_v30  ;;  %v4126_v29 = vshrl.u32 %v8652_v54, %v4120_v30 }
 0x3be   : > { %v3891_v12 = vsel %vm3889_vm11, %v5157_v44, %v3890_v58  ;;  %v8267_v18 = vshrl.u32 %v4062_v19, 30  ;;  %v4129_v20 = vshrl.u32 %v8653_v16, %v4120_v30  ;;  %v4118_v40 = vshrl.u32 %v4117_v21, 5 }
 0x3bf   : > { %v3895_v9 = vsel %vm3888_vm9, %v3891_v12, %v3894_v33  ;;  %v3980_v23 = vmul.f32 %v3979_v6, %v3977_v34  ;;  %v4131_v11 = vshll.u32 %v8653_v16, %v4119_v61  ;;  %v8273_v60 = vshll.u32 %v4113_v35, 8 }
 0x3c0   : > { %v3896_v50 = vsel %vm3885_vm5, nan, %v3895_v9  ;;  %v4064_v1 = vshll.u32 %v8267_v18, 30  ;;  %v4121_v22 = vshrl.u32 %v8659_v62, %v4120_v30  ;;  %v4212_v42 = vand.u32 2139095040, %v8744_v47 }
 0x3c1   : > { %v3981_v46 = vxor.u32 2147483648, %v3980_v23  ;;  %4553 = vst [vmem:[%s5997_s17 + $0x100] sm:$0xff] %v3896_v50  ;;  %v4124_v24 = vor.u32 %v4123_v25, %v4122_v55  ;;  %v4132_v3 = vshrl.u32 %v8654_v4, %v4120_v30  ;;  %v4134_v7 = vshll.u32 %v8654_v4, %v4119_v61 }
 0x3c2   : > { %v4135_v26 = vshrl.u32 %v8655_v49, %v4120_v30  ;;  %v8284_v57 = vsub.s32 %v4061_v8, %v4064_v1  ;;  %v4127_v59 = vor.u32 %v4126_v29, %v4125_v2  ;;  %v4130_v15 = vor.u32 %v4129_v20, %v4128_v41 }
 0x3c3   : > { %v3982_v0 = vsel %vm3899_vm6, %v3981_v46, %v3980_v23  ;;  %v4133_v27 = vor.u32 %v4132_v3, %v4131_v11  ;;  %vm4137_vm13 = vcmp.lt.s32.totalorder %v4118_v40, 1  ;;  %vm4139_vm14 = vcmp.lt.s32.totalorder %v4118_v40, 3 }
 0x3c4   : > { %v3985_v31 = vsel %vm8242_vm10, %v8735_v37, %v3982_v0  ;;  %v4136_v10 = vor.u32 %v4135_v26, %v4134_v7  ;;  %v4067_v17 = vsub.s32 0, %v8284_v57  ;;  %v4213_v21 = vshrl.u32 %v4212_v42, 23 }
 0x3c5   : > { %5160 = vcosq.f32 %v3985_v31  ;;  %vm4138_vm15 = vcmp.lt.s32.totalorder %v4118_v40, 2  ;;  %vm4140_vm0 = vcmp.lt.s32.totalorder %v4118_v40, 4  ;;  %v4141_v56 = vsel %vm4137_vm13, %v4121_v22, %v4124_v24 }
 0x3c6   : > { %5162 = vsinq.f32 %v3985_v31  ;;  %v4787_v28 = vmin.u32 %v4067_v17, %v8284_v57  ;;  %v4142_v36 = vsel %vm4140_vm0, %v4130_v15, 2102212464  ;;  %v4145_v61 = vsel %vm4137_vm13, %v4124_v24, %v4127_v59 }
 0x3c7   : > { %v4146_v44 = vsel %vm4140_vm0, %v4133_v27, 920167782  ;;  %v4143_v63 = vsel %vm4139_vm14, %v4127_v59, %v4142_v36  ;;  %v4149_v35 = vsel %vm4137_vm13, %v4127_v59, %v4130_v15  ;;  %v4150_v53 = vsel %vm4140_vm0, %v4136_v10, 1326507024 }
 0x3c8   : > { %v4147_v52 = vsel %vm4139_vm14, %v4130_v15, %v4146_v44  ;;  %v3990_v32 = vadd.s32 3, %v3986_v39  ;;  %v4069_v45 = vclz %v4787_v28  ;;  %v4144_v6 = vsel %vm4138_vm15, %v4141_v56, %v4143_v63  ;;  %v8747_v44 = vld [vmem:[#allocation23_spill] sm:$0xff] }
 0x3c9   : > { %v4148_v8 = vsel %vm4138_vm15, %v4145_v61, %v4147_v52  ;;  %v4151_v58 = vsel %vm4139_vm14, %v4133_v27, %v4150_v53  ;;  %v4794_v30 = vadd.s32 4294967169, %v4213_v21  ;;  %v4087_v2 = vsub.s32 4, %v8267_v18 }
 0x3ca   : > { %v4788_v55 = vadd.s32 4294967294, %v4069_v45  ;;  %v4152_v33 = vsel %vm4138_vm15, %v4149_v35, %v4151_v58  ;;  %v8298_v34 = vmul.u32.u64.low %v8273_v60, %v4148_v8  ;;  %v8299_v19 = vmul.u32.u64.high %v8273_v60, %v4148_v8, %v8298_v34 }
 0x3cb   : > { %v8304_v39 = vmul.u32.u64.low %v8273_v60, %v4152_v33  ;;  %v8305_v12 = vmul.u32.u64.high %v8273_v60, %v4152_v33, %v8304_v39  ;;  %v4209_v25 = vand.u32 2147483647, %v8744_v47  ;;  %vm3989_vm1 = vweird.f32 %v8735_v37 }
 0x3cc   : > { %vm4003_vm2 = vcmp.lt.s32.totalorder %v8738_v5, 0  ;;  %v4057_v29 = vadd.s32 %v8227_v48, %v8225_v43  ;;  %vm4789_vm3 = vcmp.lt.s32.totalorder %v4788_v55, 0  ;;  %v4219_v41 = vadd.s32 1, %v4794_v30 }
 0x3cd   : > { %v3991_v9 = vand.u32 3, %v3990_v32  ;;  %vm8314_vm4 = vcmp.le.f32.partialorder %v4001_v14, 0.7853982  ;;  %v4072_v20 = vsel %vm4789_vm3, 0, %v4788_v55  ;;  %v4160_v50 = vmul.u32 %v8273_v60, %v4144_v6 }
 0x3ce   : > { %v4073_v40 = vsub.s32 32, %v4072_v20  ;;  %v4074_v11 = vshll.u32 %v8284_v57, %v4072_v20  ;;  %v4077_v46 = vsub.s32 4294967266, %v4072_v20  ;;  %v4163_v1 = vadd.s32 1, %v8299_v19 }
 0x3cf   : > { %v4088_v43 = vsel %vm4003_vm2, %v4087_v2, %v8267_v18  ;;  %vm4162_vm5 = vc.u32 %v8305_v12, %v8298_v34  ;;  %v4216_v14 = vand.u32 8388607, %v4209_v25  ;;  %vm4220_vm6 = vcmp.gt.s32.totalorder %v4219_v41, 0 }
 0x3d0   : > { %v4075_v48 = vshrl.u32 %v4057_v29, %v4073_v40  ;;  %v4078_v22 = vadd.s32 127, %v4077_v46  ;;  %v4164_v60 = vsel %vm4162_vm5, %v4163_v1, %v8299_v19  ;;  %v4221_v42 = vsel %vm4220_vm6, %v4219_v41, 0 }
 0x3d1   : > { %vm3992_vm7 = vcmp.lt.s32.totalorder %v3991_v9, 2  ;;  %vm3996_vm8 = vcmp.eq.s32.totalorder %v3991_v9, 2  ;;  %v4165_v3 = vadd.s32 %v4164_v60, %v4160_v50  ;;  %v4223_v7 = vand.u32 31, %v4221_v42 }
 0x3d2   : > { %v5161_v24 = vpop.eup %5160  ;;  %vm3993_vm9 = vcmp.eq.s32.totalorder %v3991_v9, 0  ;;  %v4076_v0 = vor.u32 %v4075_v48, %v4074_v11  ;;  %v4079_v57 = vshll.u32 %v4078_v22, 23  ;;  %v4090_v15 = vsel %vm8314_vm4, 0, %v4088_v43 }
 0x3d3   : > { %v5163_v26 = vpop.eup %5162  ;;  %v3997_v18 = vxor.u32 2147483648, %v5161_v24  ;;  %v4166_v31 = vadd.s32 536870912, %v4165_v3  ;;  %v4224_v27 = vsub.s32 32, %v4223_v7  ;;  %v4217_v56 = vor.u32 8388608, %v4216_v14 }
 0x3d4   : > { %v3994_v59 = vxor.u32 2147483648, %v5163_v26  ;;  %v4080_v17 = vor.u32 4788187, %v4079_v57  ;;  %v4083_v21 = vcvt.s32.f32 %v4076_v0  ;;  %v4222_v61 = vshrl.u32 %v4221_v42, 5 }
 0x3d5   : > { %v3998_v10 = vsel %vm3996_vm8, %v3997_v18, %v5163_v26  ;;  %v8331_v36 = vshrl.u32 %v4166_v31, 30  ;;  %v4316_v63 = vand.u32 2139095040, %v8747_v44  ;;  %v4226_v53 = vshll.u32 %v8659_v62, %v4223_v7 }
 0x3d6   : > { %v3995_v28 = vsel %vm3993_vm9, %v5161_v24, %v3994_v59  ;;  %v4081_v35 = vand.u32 2147483647, %v4080_v17  ;;  %v4229_v32 = vshll.u32 %v8651_v13, %v4223_v7  ;;  %v4227_v8 = vshrl.u32 %v8651_v13, %v4224_v27 }
 0x3d7   : > { %v3999_v52 = vsel %vm3992_vm7, %v3995_v28, %v3998_v10  ;;  %v4168_v6 = vshll.u32 %v8331_v36, 30  ;;  %v4230_v58 = vshrl.u32 %v8652_v54, %v4224_v27  ;;  %v4232_v55 = vshll.u32 %v8652_v54, %v4223_v7 }
 0x3d8   : > { %v4000_v45 = vsel %vm3989_vm1, nan, %v3999_v52  ;;  %v4084_v30 = vmul.f32 %v4083_v21, %v4081_v35  ;;  %v4233_v33 = vshrl.u32 %v8653_v16, %v4224_v27  ;;  %v4235_v19 = vshll.u32 %v8653_v16, %v4223_v7 }
 0x3d9   : > { %4554 = vst [vmem:[%s5997_s17 + $0x108] sm:$0xff] %v4000_v45  ;;  %v4094_v2 = vadd.s32 3, %v4090_v15  ;;  %v8346_v39 = vsub.s32 %v4165_v3, %v4168_v6  ;;  %v4236_v37 = vshrl.u32 %v8654_v4, %v4224_v27  ;;  %v4238_v29 = vshll.u32 %v8654_v4, %v4223_v7 }
 0x3da   : > { %v4085_v41 = vxor.u32 2147483648, %v4084_v30  ;;  %v4239_v9 = vshrl.u32 %v8655_v49, %v4224_v27  ;;  %v8351_v20 = vshll.u32 %v4217_v56, 8  ;;  %v4317_v50 = vshrl.u32 %v4316_v63, 23 }
 0x3db   : > { %v4171_v40 = vsub.s32 0, %v8346_v39  ;;  %v4225_v11 = vshrl.u32 %v8659_v62, %v4224_v27  ;;  %v4228_v46 = vor.u32 %v4227_v8, %v4226_v53  ;;  %v4231_v1 = vor.u32 %v4230_v58, %v4229_v32 }
 0x3dc   : > { %v4086_v43 = vsel %vm4003_vm2, %v4085_v41, %v4084_v30  ;;  %v4234_v14 = vor.u32 %v4233_v33, %v4232_v55  ;;  %v4237_v48 = vor.u32 %v4236_v37, %v4235_v19  ;;  %vm4241_vm10 = vcmp.lt.s32.totalorder %v4222_v61, 1 }
 0x3dd   : > { %v4089_v22 = vsel %vm8314_vm4, %v8738_v5, %v4086_v43  ;;  %v4791_v60 = vmin.u32 %v4171_v40, %v8346_v39  ;;  %v4240_v42 = vor.u32 %v4239_v9, %v4238_v29  ;;  %vm4244_vm11 = vcmp.lt.s32.totalorder %v4222_v61, 4 }
 0x3de   : > { %5164 = vcosq.f32 %v4089_v22  ;;  %vm4242_vm12 = vcmp.lt.s32.totalorder %v4222_v61, 2  ;;  %vm4243_vm13 = vcmp.lt.s32.totalorder %v4222_v61, 3  ;;  %v4246_v24 = vsel %vm4244_vm11, %v4234_v14, 2102212464 }
 0x3df   : > { %5166 = vsinq.f32 %v4089_v22  ;;  %v4173_v3 = vclz %v4791_v60  ;;  %v4245_v7 = vsel %vm4241_vm10, %v4225_v11, %v4228_v46  ;;  %v4249_v26 = vsel %vm4241_vm10, %v4228_v46, %v4231_v1 }
 0x3e0   : > { %v4247_v18 = vsel %vm4243_vm13, %v4231_v1, %v4246_v24  ;;  %v4250_v0 = vsel %vm4244_vm11, %v4237_v48, 920167782  ;;  %v4253_v57 = vsel %vm4241_vm10, %v4231_v1, %v4234_v14  ;;  %v4313_v23 = vand.u32 2147483647, %v8747_v44  ;;  %v8750_v24 = vld [vmem:[#allocation24_spill] sm:$0xff] }
 0x3e1   : > { %v4161_v59 = vadd.s32 %v8298_v34, %v8305_v12  ;;  %v4792_v15 = vadd.s32 4294967294, %v4173_v3  ;;  %v4251_v31 = vsel %vm4243_vm13, %v4234_v14, %v4250_v0  ;;  %v4254_v27 = vsel %vm4244_vm11, %v4240_v42, 1326507024 }
 0x3e2   : > { %v4248_v10 = vsel %vm4242_vm12, %v4245_v7, %v4247_v18  ;;  %v4252_v17 = vsel %vm4242_vm12, %v4249_v26, %v4251_v31  ;;  %v4255_v21 = vsel %vm4243_vm13, %v4237_v48, %v4254_v27  ;;  %v4798_v56 = vadd.s32 4294967169, %v4317_v50 }
 0x3e3   : > { %vm4793_vm14 = vcmp.lt.s32.totalorder %v4792_v15, 0  ;;  %v4256_v28 = vsel %vm4242_vm12, %v4253_v57, %v4255_v21  ;;  %v8374_v63 = vmul.u32.u64.low %v8351_v20, %v4252_v17  ;;  %v8375_v52 = vmul.u32.u64.high %v8351_v20, %v4252_v17, %v8374_v63 }
 0x3e4   : > { %v4176_v34 = vsel %vm4793_vm14, 0, %v4792_v15  ;;  %v4191_v12 = vsub.s32 4, %v8331_v36  ;;  %v8380_v35 = vmul.u32.u64.low %v8351_v20, %v4256_v28  ;;  %v8381_v53 = vmul.u32.u64.high %v8351_v20, %v4256_v28, %v8380_v35 }
 0x3e5   : > { %v4177_v32 = vsub.s32 32, %v4176_v34  ;;  %v4178_v45 = vshll.u32 %v8346_v39, %v4176_v34  ;;  %v4181_v6 = vsub.s32 4294967266, %v4176_v34  ;;  %v4323_v8 = vadd.s32 1, %v4798_v56 }
 0x3e6   : > { %vm4093_vm15 = vweird.f32 %v8738_v5  ;;  %v4095_v61 = vand.u32 3, %v4094_v2  ;;  %vm4107_vm0 = vcmp.lt.s32.totalorder %v8741_v51, 0  ;;  %v4264_v58 = vmul.u32 %v8351_v20, %v4248_v10 }
 0x3e7   : > { %v4179_v30 = vshrl.u32 %v4161_v59, %v4177_v32  ;;  %v4182_v55 = vadd.s32 127, %v4181_v6  ;;  %v4267_v33 = vadd.s32 1, %v8375_v52  ;;  %vm4324_vm1 = vcmp.gt.s32.totalorder %v4323_v8, 0 }
 0x3e8   : > { %v8391_v19 = vsel %vm4107_vm0, %v4191_v12, %v8331_v36  ;;  %vm4266_vm2 = vc.u32 %v8381_v53, %v8374_v63  ;;  %v4320_v2 = vand.u32 8388607, %v4313_v23  ;;  %v4325_v39 = vsel %vm4324_vm1, %v4323_v8, 0 }
 0x3e9   : > { %vm8399_vm3 = vcmp.le.f32.partialorder %v4105_v38, 0.7853982  ;;  %v4180_v29 = vor.u32 %v4179_v30, %v4178_v45  ;;  %v4183_v41 = vshll.u32 %v4182_v55, 23  ;;  %v4268_v9 = vsel %vm4266_vm2, %v4267_v33, %v8375_v52 }
 0x3ea   : > { %vm4096_vm4 = vcmp.lt.s32.totalorder %v4095_v61, 2  ;;  %vm4097_vm5 = vcmp.eq.s32.totalorder %v4095_v61, 0  ;;  %v4269_v36 = vadd.s32 %v4268_v9, %v4264_v58  ;;  %v4327_v20 = vand.u32 31, %v4325_v39 }
 0x3eb   : > { %v5165_v50 = vpop.eup %5164  ;;  %vm4100_vm6 = vcmp.eq.s32.totalorder %v4095_v61, 2  ;;  %v4184_v40 = vor.u32 4788187, %v4183_v41  ;;  %v4187_v11 = vcvt.s32.f32 %v4180_v29  ;;  %v4194_v46 = vsel %vm8399_vm3, 0, %v8391_v19 }
 0x3ec   : > { %v5167_v38 = vpop.eup %5166  ;;  %v4101_v1 = vxor.u32 2147483648, %v5165_v50  ;;  %v4270_v43 = vadd.s32 536870912, %v4269_v36  ;;  %v4321_v14 = vor.u32 8388608, %v4320_v2  ;;  %v4328_v48 = vsub.s32 32, %v4327_v20 }
 0x3ed   : > { %v4098_v22 = vxor.u32 2147483648, %v5167_v38  ;;  %v4185_v60 = vand.u32 2147483647, %v4184_v40  ;;  %v4326_v42 = vshrl.u32 %v4325_v39, 5  ;;  %v4420_v3 = vand.u32 2139095040, %v8750_v24 }
 0x3ee   : > { %v4102_v7 = vsel %vm4100_vm6, %v4101_v1, %v5167_v38  ;;  %v8408_v26 = vshrl.u32 %v4270_v43, 30  ;;  %v4330_v18 = vshll.u32 %v8659_v62, %v4327_v20  ;;  %v4331_v0 = vshrl.u32 %v8651_v13, %v4328_v48 }
 0x3ef   : > { %v4099_v57 = vsel %vm4097_vm5, %v5165_v50, %v4098_v22  ;;  %v4188_v59 = vmul.f32 %v4187_v11, %v4185_v60  ;;  %v4333_v15 = vshll.u32 %v8651_v13, %v4327_v20  ;;  %v4334_v31 = vshrl.u32 %v8652_v54, %v4328_v48 }
 0x3f0   : > { %v4103_v27 = vsel %vm4096_vm4, %v4099_v57, %v4102_v7  ;;  %v4272_v10 = vshll.u32 %v8408_v26, 30  ;;  %v4336_v17 = vshll.u32 %v8652_v54, %v4327_v20  ;;  %v4337_v21 = vshrl.u32 %v8653_v16, %v4328_v48 }
 0x3f1   : > { %v4104_v56 = vsel %vm4093_vm15, nan, %v4103_v27  ;;  %v4189_v28 = vxor.u32 2147483648, %v4188_v59  ;;  %v4329_v52 = vshrl.u32 %v8659_v62, %v4328_v48  ;;  %vm4345_vm7 = vcmp.lt.s32.totalorder %v4326_v42, 1 }
 0x3f2   : > { %v8422_v34 = vsub.s32 %v4269_v36, %v4272_v10  ;;  %v4332_v12 = vor.u32 %v4331_v0, %v4330_v18  ;;  %v4339_v35 = vshll.u32 %v8653_v16, %v4327_v20  ;;  %v4340_v32 = vshrl.u32 %v8654_v4, %v4328_v48  ;;  %4555 = vst [vmem:[%s5997_s17 + $0x110] sm:$0xff] %v4104_v56 }
 0x3f3   : > { %v4190_v45 = vsel %vm4107_vm0, %v4189_v28, %v4188_v59  ;;  %v4335_v6 = vor.u32 %v4334_v31, %v4333_v15  ;;  %v4342_v8 = vshll.u32 %v8654_v4, %v4327_v20  ;;  %v4343_v5 = vshrl.u32 %v8655_v49, %v4328_v48 }
 0x3f4   : > { %v4193_v61 = vsel %vm8399_vm3, %v8741_v51, %v4190_v45  ;;  %v4275_v58 = vsub.s32 0, %v8422_v34  ;;  %v4338_v30 = vor.u32 %v4337_v21, %v4336_v17  ;;  %v4341_v55 = vor.u32 %v4340_v32, %v4339_v35 }
 0x3f5   : > { %5168 = vcosq.f32 %v4193_v61  ;;  %v4344_v33 = vor.u32 %v4343_v5, %v4342_v8  ;;  %vm4348_vm8 = vcmp.lt.s32.totalorder %v4326_v42, 4  ;;  %v4421_v19 = vshrl.u32 %v4420_v3, 23 }
 0x3f6   : > { %5170 = vsinq.f32 %v4193_v61  ;;  %v4795_v2 = vmin.u32 %v4275_v58, %v8422_v34  ;;  %vm4347_vm9 = vcmp.lt.s32.totalorder %v4326_v42, 3  ;;  %v4361_v39 = vshll.u32 %v4321_v14, 8 }
 0x3f7   : > { %vm4346_vm10 = vcmp.lt.s32.totalorder %v4326_v42, 2  ;;  %v4350_v29 = vsel %vm4348_vm8, %v4338_v30, 2102212464  ;;  %v4353_v41 = vsel %vm4345_vm7, %v4332_v12, %v4335_v6  ;;  %v4354_v37 = vsel %vm4348_vm8, %v4341_v55, 920167782 }
 0x3f8   : > { %v4198_v9 = vadd.s32 3, %v4194_v46  ;;  %v4277_v36 = vclz %v4795_v2  ;;  %v4349_v20 = vsel %vm4345_vm7, %v4329_v52, %v4332_v12  ;;  %v4357_v50 = vsel %vm4345_vm7, %v4335_v6, %v4338_v30 }
 0x3f9   : > { %v4351_v40 = vsel %vm4347_vm9, %v4335_v6, %v4350_v29  ;;  %v4355_v11 = vsel %vm4347_vm9, %v4338_v30, %v4354_v37  ;;  %v4358_v38 = vsel %vm4348_vm8, %v4344_v33, 1326507024  ;;  %v4802_v1 = vadd.s32 4294967169, %v4421_v19 }
 0x3fa   : > { %v4796_v43 = vadd.s32 4294967294, %v4277_v36  ;;  %v4356_v14 = vsel %vm4346_vm10, %v4353_v41, %v4355_v11  ;;  %v4359_v48 = vsel %vm4347_vm9, %v4341_v55, %v4358_v38  ;;  %v4352_v22 = vsel %vm4346_vm10, %v4349_v20, %v4351_v40 }
 0x3fb   : > { %v4360_v46 = vsel %vm4346_vm10, %v4357_v50, %v4359_v48  ;;  %v8448_v60 = vmul.u32.u64.low %v4361_v39, %v4356_v14  ;;  %v8449_v3 = vmul.u32.u64.high %v4361_v39, %v4356_v14, %v8448_v60  ;;  %v4265_v7 = vadd.s32 %v8374_v63, %v8381_v53 }
 0x3fc   : > { %vm4797_vm11 = vcmp.lt.s32.totalorder %v4796_v43, 0  ;;  %v8454_v18 = vmul.u32.u64.low %v4361_v39, %v4360_v46  ;;  %v8455_v0 = vmul.u32.u64.high %v4361_v39, %v4360_v46, %v8454_v18  ;;  %v4199_v57 = vand.u32 3, %v4198_v9 }
 0x3fd   : > { %v4280_v59 = vsel %vm4797_vm11, 0, %v4796_v43  ;;  %v4427_v15 = vadd.s32 1, %v4802_v1  ;;  %v4368_v42 = vmul.u32 %v4361_v39, %v4352_v22  ;;  %v4371_v17 = vadd.s32 1, %v8449_v3 }
 0x3fe   : > { %v4281_v31 = vsub.s32 32, %v4280_v59  ;;  %v4282_v27 = vshll.u32 %v8422_v34, %v4280_v59  ;;  %v4285_v10 = vsub.s32 4294967266, %v4280_v59  ;;  %vm4197_vm13 = vweird.f32 %v8741_v51 }
 0x3ff   : > { %vm4428_vm12 = vcmp.gt.s32.totalorder %v4427_v15, 0  ;;  %vm4370_vm14 = vc.u32 %v8455_v0, %v8448_v60  ;;  %vm4211_vm15 = vcmp.lt.s32.totalorder %v8744_v47, 0  ;;  %v4417_v53 = vand.u32 2147483647, %v8750_v24 }
 0x400   : > { %v4283_v21 = vshrl.u32 %v4265_v7, %v4281_v31  ;;  %v4286_v56 = vadd.s32 127, %v4285_v10  ;;  %v4372_v63 = vsel %vm4370_vm14, %v4371_v17, %v8449_v3  ;;  %v4429_v28 = vsel %vm4428_vm12, %v4427_v15, 0 }
 0x401   : > { %vm4204_vm0 = vcmp.eq.s32.totalorder %v4199_v57, 2  ;;  %vm8467_vm1 = vcmp.le.f32.partialorder %v4209_v25, 0.7853982  ;;  %v4373_v32 = vadd.s32 %v4372_v63, %v4368_v42  ;;  %vm4200_vm2 = vcmp.lt.s32.totalorder %v4199_v57, 2 }
 0x402   : > { %v5169_v52 = vpop.eup %5168  ;;  %v4284_v12 = vor.u32 %v4283_v21, %v4282_v27  ;;  %v4287_v35 = vshll.u32 %v4286_v56, 23  ;;  %vm4201_vm3 = vcmp.eq.s32.totalorder %v4199_v57, 0  ;;  %v4431_v8 = vand.u32 31, %v4429_v28 }
 0x403   : > { %v5171_v45 = vpop.eup %5170  ;;  %v4205_v6 = vxor.u32 2147483648, %v5169_v52  ;;  %v4374_v30 = vadd.s32 536870912, %v4373_v32  ;;  %v4295_v33 = vsub.s32 4, %v8408_v26  ;;  %v4424_v25 = vand.u32 8388607, %v4417_v53 }
 0x404   : > { %v4202_v5 = vxor.u32 2147483648, %v5171_v45  ;;  %v4288_v61 = vor.u32 4788187, %v4287_v35  ;;  %v4291_v58 = vcvt.s32.f32 %v4284_v12  ;;  %v4432_v19 = vsub.s32 32, %v4431_v8 }
 0x405   : > { %v4206_v55 = vsel %vm4204_vm0, %v4205_v6, %v5171_v45  ;;  %v8474_v29 = vshrl.u32 %v4374_v30, 30  ;;  %v4434_v41 = vshll.u32 %v8659_v62, %v4431_v8  ;;  %v4437_v36 = vshll.u32 %v8651_v13, %v4431_v8 }
 0x406   : > { %v4203_v2 = vsel %vm4201_vm3, %v5169_v52, %v4202_v5  ;;  %v4289_v39 = vand.u32 2147483647, %v4288_v61  ;;  %v4435_v9 = vshrl.u32 %v8651_v13, %v4432_v19  ;;  %v4440_v20 = vshll.u32 %v8652_v54, %v4431_v8 }
 0x407   : > { %v4207_v37 = vsel %vm4200_vm2, %v4203_v2, %v4206_v55  ;;  %v4376_v11 = vshll.u32 %v8474_v29, 30  ;;  %v4438_v38 = vshrl.u32 %v8652_v54, %v4432_v19  ;;  %v4296_v1 = vsel %vm4211_vm15, %v4295_v33, %v8408_v26 }
 0x408   : > { %v4208_v50 = vsel %vm4197_vm13, nan, %v4207_v37  ;;  %v4292_v40 = vmul.f32 %v4291_v58, %v4289_v39  ;;  %v4430_v43 = vshrl.u32 %v4429_v28, 5  ;;  %v4441_v14 = vshrl.u32 %v8653_v16, %v4432_v19 }
 0x409   : > { %v4443_v48 = vshll.u32 %v8653_v16, %v4431_v8  ;;  %4556 = vst [vmem:[%s5997_s17 + $0x118] sm:$0xff] %v4208_v50  ;;  %v4377_v22 = vsub.s32 %v4373_v32, %v4376_v11  ;;  %v4425_v46 = vor.u32 8388608, %v4424_v25  ;;  %v4444_v51 = vshrl.u32 %v8654_v4, %v4432_v19 }
 0x40a   : > { %v4293_v13 = vxor.u32 2147483648, %v4292_v40  ;;  %v4433_v3 = vshrl.u32 %v8659_v62, %v4432_v19  ;;  %v4436_v7 = vor.u32 %v4435_v9, %v4434_v41  ;;  %v4446_v54 = vshll.u32 %v8654_v4, %v4431_v8 }
 0x40b   : > { %v4447_v18 = vshrl.u32 %v8655_v49, %v4432_v19  ;;  %v4379_v57 = vsub.s32 0, %v4377_v22  ;;  %v4439_v59 = vor.u32 %v4438_v38, %v4437_v36  ;;  %v4442_v15 = vor.u32 %v4441_v14, %v4440_v20 }
 0x40c   : > { %v4294_v26 = vsel %vm4211_vm15, %v4293_v13, %v4292_v40  ;;  %v4445_v31 = vor.u32 %v4444_v51, %v4443_v48  ;;  %vm4449_vm4 = vcmp.lt.s32.totalorder %v4430_v43, 1  ;;  %v4298_v62 = vsel %vm8467_vm1, 0, %v4296_v1 }
 0x40d   : > { %v4297_v16 = vsel %vm8467_vm1, %v8744_v47, %v4294_v26  ;;  %v4448_v27 = vor.u32 %v4447_v18, %v4446_v54  ;;  %v4799_v4 = vmin.u32 %v4379_v57, %v4377_v22  ;;  %vm4451_vm5 = vcmp.lt.s32.totalorder %v4430_v43, 3 }
 0x40e   : > { %5172 = vcosq.f32 %v4297_v16  ;;  %vm4452_vm6 = vcmp.lt.s32.totalorder %v4430_v43, 4  ;;  %v4465_v49 = vshll.u32 %v4425_v46, 8  ;;  %vm4450_vm7 = vcmp.lt.s32.totalorder %v4430_v43, 2 }
 0x40f   : > { %5174 = vsinq.f32 %v4297_v16  ;;  %v4381_v10 = vclz %v4799_v4  ;;  %v4453_v42 = vsel %vm4449_vm4, %v4433_v3, %v4436_v7  ;;  %v4457_v17 = vsel %vm4449_vm4, %v4436_v7, %v4439_v59 }
 0x410   : > { %v4454_v21 = vsel %vm4452_vm6, %v4442_v15, 2102212464  ;;  %v4458_v56 = vsel %vm4452_vm6, %v4445_v31, 920167782  ;;  %v4461_v63 = vsel %vm4449_vm4, %v4439_v59, %v4442_v15  ;;  %v4462_v28 = vsel %vm4452_vm6, %v4448_v27, 1326507024 }
 0x411   : > { %v4800_v52 = vadd.s32 4294967294, %v4381_v10  ;;  %v4455_v12 = vsel %vm4451_vm5, %v4439_v59, %v4454_v21  ;;  %v4459_v35 = vsel %vm4451_vm5, %v4442_v15, %v4458_v56  ;;  %v4463_v32 = vsel %vm4451_vm5, %v4445_v31, %v4462_v28 }
 0x412   : > { %v4302_v34 = vadd.s32 3, %v4298_v62  ;;  %v4460_v45 = vsel %vm4450_vm7, %v4457_v17, %v4459_v35  ;;  %v4464_v6 = vsel %vm4450_vm7, %v4461_v63, %v4463_v32  ;;  %v4369_v8 = vadd.s32 %v8448_v60, %v8455_v0 }
 0x413   : > { %vm4801_vm8 = vcmp.lt.s32.totalorder %v4800_v52, 0  ;;  %v8506_v5 = vmul.u32.u64.low %v4465_v49, %v4464_v6  ;;  %v8507_v61 = vmul.u32.u64.high %v4465_v49, %v4464_v6, %v8506_v5  ;;  %v4456_v30 = vsel %vm4450_vm7, %v4453_v42, %v4455_v12 }
 0x414   : > { %v4384_v58 = vsel %vm4801_vm8, 0, %v4800_v52  ;;  %v8510_v55 = vmul.u32.u64.low %v4465_v49, %v4460_v45  ;;  %v8511_v33 = vmul.u32.u64.high %v4465_v49, %v4460_v45, %v8510_v55  ;;  %v4303_v39 = vand.u32 3, %v4302_v34 }
 0x415   : > { %v4385_v25 = vsub.s32 32, %v4384_v58  ;;  %v4386_v19 = vshll.u32 %v4377_v22, %v4384_v58  ;;  %v4389_v2 = vsub.s32 4294967266, %v4384_v58  ;;  %v4472_v9 = vmul.u32 %v4465_v49, %v4456_v30 }
 0x416   : > { %vm4474_vm9 = vc.u32 %v8507_v61, %v8510_v55  ;;  %v4475_v60 = vadd.s32 1, %v8511_v33  ;;  %vm4305_vm10 = vcmp.eq.s32.totalorder %v4303_v39, 0  ;;  %vm4308_vm11 = vcmp.eq.s32.totalorder %v4303_v39, 2 }
 0x417   : > { %v4387_v41 = vshrl.u32 %v4369_v8, %v4385_v25  ;;  %v4390_v37 = vadd.s32 127, %v4389_v2  ;;  %vm4304_vm12 = vcmp.lt.s32.totalorder %v4303_v39, 2  ;;  %vm4301_vm13 = vweird.f32 %v8744_v47 }
 0x418   : > { %v4476_v50 = vsel %vm4474_vm9, %v4475_v60, %v8511_v33  ;;  %vm4315_vm14 = vcmp.lt.s32.totalorder %v8747_v44, 0  ;;  %v4399_v18 = vsub.s32 4, %v8474_v29  ;;  %vm4314_vm15 = vcmp.le.f32.partialorder %v4313_v23, 0.7853982 }
 0x419   : > { %v4388_v0 = vor.u32 %v4387_v41, %v4386_v19  ;;  %v4391_v36 = vshll.u32 %v4390_v37, 23  ;;  %v4477_v43 = vadd.s32 %v4476_v50, %v4472_v9  ;;  %v4473_v42 = vadd.s32 %v8510_v55, %v8507_v61 }
 0x41a   : > { %v4400_v15 = vsel %vm4315_vm14, %v4399_v18, %v8474_v29  ;;  %vm4405_vm4 = vweird.f32 %v8747_v44  ;;  %vm4419_vm5 = vcmp.lt.s32.totalorder %v8750_v24, 0  ;;  %vm4418_vm6 = vcmp.le.f32.partialorder %v4417_v53, 0.7853982 }
 0x41b   : > { %v5173_v20 = vpop.eup %5172  ;;  %v4392_v38 = vor.u32 4788187, %v4391_v36  ;;  %v4395_v1 = vcvt.s32.f32 %v4388_v0  ;;  %v4478_v22 = vadd.s32 536870912, %v4477_v43  ;;  %v4402_v27 = vsel %vm4314_vm15, 0, %v4400_v15 }
 0x41c   : > { %v5175_v40 = vpop.eup %5174  ;;  %v4309_v11 = vxor.u32 2147483648, %v5173_v20  ;;  %v4406_v49 = vadd.s32 3, %v4402_v27 }
 0x41d   : > { %v4306_v14 = vxor.u32 2147483648, %v5175_v40  ;;  %v4393_v13 = vand.u32 2147483647, %v4392_v38  ;;  %v4479_v7 = vshrl.u32 %v4478_v22, 30 }
 0x41e   : > { %v4310_v48 = vsel %vm4308_vm11, %v4309_v11, %v5175_v40  ;;  %v4407_v23 = vand.u32 3, %v4406_v49 }
 0x41f   : > { %v4307_v46 = vsel %vm4305_vm10, %v5173_v20, %v4306_v14  ;;  %v4396_v3 = vmul.f32 %v4395_v1, %v4393_v13  ;;  %v4480_v57 = vshll.u32 %v4479_v7, 30  ;;  %v4503_v25 = vsub.s32 4, %v4479_v7 }
 0x420   : > { %v4311_v51 = vsel %vm4304_vm12, %v4307_v46, %v4310_v48  ;;  %vm4412_vm1 = vcmp.eq.s32.totalorder %v4407_v23, 2  ;;  %vm4409_vm2 = vcmp.eq.s32.totalorder %v4407_v23, 0  ;;  %vm4408_vm3 = vcmp.lt.s32.totalorder %v4407_v23, 2 }
 0x421   : > { %v4312_v54 = vsel %vm4301_vm13, nan, %v4311_v51  ;;  %v4397_v26 = vxor.u32 2147483648, %v4396_v3  ;;  %v4481_v47 = vsub.s32 %v4477_v43, %v4480_v57  ;;  %v4504_v39 = vsel %vm4419_vm5, %v4503_v25, %v4479_v7 }
 0x422   : > { %4557 = vst [vmem:[%s5997_s17 + $0x120] sm:$0xff] %v4312_v54  ;;  %v4506_v41 = vsel %vm4418_vm6, 0, %v4504_v39  ;;  %vm4509_vm10 = vweird.f32 %v8750_v24 }
 0x423   : > { %v4398_v59 = vsel %vm4315_vm14, %v4397_v26, %v4396_v3  ;;  %v4483_v31 = vsub.s32 0, %v4481_v47  ;;  %v4510_v37 = vadd.s32 3, %v4506_v41 }
 0x424   : > { %v4401_v16 = vsel %vm4314_vm15, %v8747_v44, %v4398_v59 }
 0x425   : > { %5176 = vcosq.f32 %v4401_v16  ;;  %v4803_v62 = vmin.u32 %v4483_v31, %v4481_v47  ;;  %v4511_v9 = vand.u32 3, %v4510_v37 }
 0x426   : > { %5178 = vsinq.f32 %v4401_v16 }
 0x427   : > { %v4485_v4 = vclz %v4803_v62  ;;  %vm4516_vm7 = vcmp.eq.s32.totalorder %v4511_v9, 2  ;;  %vm4513_vm8 = vcmp.eq.s32.totalorder %v4511_v9, 0  ;;  %vm4512_vm9 = vcmp.lt.s32.totalorder %v4511_v9, 2 }
 0x429   : > { %v4804_v10 = vadd.s32 4294967294, %v4485_v4 }
 0x42b   : > { %vm4805_vm0 = vcmp.lt.s32.totalorder %v4804_v10, 0 }
 0x42c   : > { %v4488_v17 = vsel %vm4805_vm0, 0, %v4804_v10 }
 0x42d   : > { %v4489_v21 = vsub.s32 32, %v4488_v17  ;;  %v4490_v56 = vshll.u32 %v4481_v47, %v4488_v17  ;;  %v4493_v63 = vsub.s32 4294967266, %v4488_v17 }
 0x42f   : > { %v4491_v28 = vshrl.u32 %v4473_v42, %v4489_v21  ;;  %v4494_v29 = vadd.s32 127, %v4493_v63 }
 0x431   : > { %v4492_v32 = vor.u32 %v4491_v28, %v4490_v56  ;;  %v4495_v34 = vshll.u32 %v4494_v29, 23 }
 0x432   : > { %v5177_v52 = vpop.eup %5176 }
 0x433   : > { %v5179_v12 = vpop.eup %5178  ;;  %v4413_v35 = vxor.u32 2147483648, %v5177_v52  ;;  %v4496_v8 = vor.u32 4788187, %v4495_v34  ;;  %v4499_v5 = vcvt.s32.f32 %v4492_v32 }
 0x434   : > { %v4410_v45 = vxor.u32 2147483648, %v5179_v12 }
 0x435   : > { %v4414_v6 = vsel %vm4412_vm1, %v4413_v35, %v5179_v12  ;;  %v4497_v30 = vand.u32 2147483647, %v4496_v8 }
 0x436   : > { %v4411_v61 = vsel %vm4409_vm2, %v5177_v52, %v4410_v45 }
 0x437   : > { %v4415_v58 = vsel %vm4408_vm3, %v4411_v61, %v4414_v6  ;;  %v4500_v33 = vmul.f32 %v4499_v5, %v4497_v30 }
 0x438   : > { %v4416_v55 = vsel %vm4405_vm4, nan, %v4415_v58 }
 0x439   : > { %4558 = vst [vmem:[%s5997_s17 + $0x128] sm:$0xff] %v4416_v55  ;;  %v4501_v19 = vxor.u32 2147483648, %v4500_v33 }
 0x43b   : > { %v4502_v2 = vsel %vm4419_vm5, %v4501_v19, %v4500_v33 }
 0x43c   : > { %v4505_v44 = vsel %vm4418_vm6, %v8750_v24, %v4502_v2 }
 0x43d   : > { %5180 = vcosq.f32 %v4505_v44 }
 0x43e   : > { %5182 = vsinq.f32 %v4505_v44 }
 0x44a   : > { %v5181_v60 = vpop.eup %5180 }
 0x44b   : > { %v5183_v0 = vpop.eup %5182  ;;  %v4517_v36 = vxor.u32 2147483648, %v5181_v60 }
 0x44c   : > { %v4514_v20 = vxor.u32 2147483648, %v5183_v0 }
 0x44d   : > { %v4518_v53 = vsel %vm4516_vm7, %v4517_v36, %v5183_v0  ;;  %4567 = sbr.rel (!%p5344_p5) target bundleno = 1133 (0x46d), region = 40 }
 0x44e   : > { %v4515_v50 = vsel %vm4513_vm8, %v5181_v60, %v4514_v20 }
 0x44f   : > { %v4519_v40 = vsel %vm4512_vm9, %v4515_v50, %v4518_v53 }
 0x450   : > { %v4520_v11 = vsel %vm4509_vm10, nan, %v4519_v40 }
 0x451   : > { %4559 = vst [vmem:[%s5997_s17 + $0x130] sm:$0xff] %v4520_v11 }
 0x452   : > { %s8758_s24 = smov (!%p4570_p9, %s4569_s24), 39 }
 0x453   : > { %s8540_s25 = sshll.u32 %s8758_s24, 7 }
 0x454   : > { %s4574_s26 = ssub.s32 4992, %s8540_s25 }
 0x455   : > { %4575 = vsyncadd %s8535_s19, %s4574_s26  ;;  %p4807_p10 = scmp.ne.s32.totalorder %s8540_s25, 0  ;;  %s4813_s27 = smul.u32 4992, %s5327_s16 }
 0x456   : > { %s4580_s22 = sshll.u32 %s5997_s17, 4  ;;  %s5283_s5 = smov [#allocation5]   ;;  %s8552_s22 = int_to_ptr.vmem [resolvable:$true] %s4580_s22 }
 0x457   : > { %s8550_s30 = scalar_lea.hbm %s8598_s3, %s4813_s27  ;;  %s5210_s4 = scalar_lea.vmem %s8552_s22, %s8540_s25 }
 0x458   : > { %p5211_p5 = scmp.ne.s32.totalorder %s8552_s22, %s5210_s4  ;;  %s5214_s6 = sshll.u32 %s5283_s5, 4  ;;  %s5215_s6 = int_to_ptr.vmem [resolvable:$false] %s5214_s6 }
 0x459   : > { %s5216_s16 = scalar_lea.vmem %s5215_s6, 9984  ;;  %p5217_p13 = scmp.lt.s32.totalorder %s8552_s22, %s5215_s6 }
 0x45a   : > { %p5212_p11 = pnand %p5211_p5, %p4807_p10  ;;  %p5218_p0 = scmp.lt.s32.totalorder %s5216_s16, %s5210_s4 }
 0x45c   : > { %p5213_p12 = pneg %p5212_p11  ;;  %p5219_p1 = por %p5218_p0, %p5217_p13 }
 0x45e   : > { %p5220_p2 = pnand %p5219_p1, %p5213_p12 }
 0x460   : > { %5223 = shalt.err (!%p5220_p2)
}
 0x461   : > { %s5224_s7 = scalar_lea.hbm %s8550_s30, %s8540_s25  ;;  %s5228_s10 = scalar_lea.hbm %s8598_s3, 20096 }
 0x462   : > { %p5225_p3 = scmp.ne.s32.totalorder %s8550_s30, %s5224_s7  ;;  %p5229_p8 = scmp.lt.s32.totalorder %s8550_s30, %s8598_s3 }
 0x463   : > { %p5230_p9 = scmp.lt.s32.totalorder %s5228_s10, %s5224_s7 }
 0x464   : > { %p5226_p4 = pnand %p5225_p3, %p4807_p10 }
 0x465   : > { %p5231_p5 = por %p5230_p9, %p5229_p8 }
 0x466   : > { %p5227_p7 = pneg %p5226_p4 }
 0x468   : > { %p5232_p11 = pnand %p5231_p5, %p5227_p7 }
 0x46a   : > { %5235 = shalt.err (!%p5232_p11)
}
 0x46b   : > { %s5284_s20 = smov 128   ;;  %s5285_s24 = smov 8  }
 0x46c   : > { %4586 = dma.vmem_to_hbm [thread:$0]  (%p4807_p10), %s8552_s22, %s8540_s25, %s8550_s30, %s8535_s19, %s5284_s20, %s5284_s20, %s5285_s24  }
 0x46d PF: > { %p4986_p12 = scmp.ge.s32.totalorder %s5274_s15, 2  ;;  %s4595_s26 = sand.u32 1, %s5262_s12  }
 0x46e   : > { %s4596_s27 = scalar_lea.sflag [#allocation4], %s4595_s26 }
 0x46f   : > { %p4981_p13 = pnand %p4986_p12, %p5348_p6 }
 0x471   : > { %p4982_p0 = pneg %p4981_p13 }
 0x473   : > { %5257 = dma.done.wait (%p4982_p0), %s4596_s27, 4992  }
 0x474   : > { %5259 = vsyncadd (%p4982_p0), %s4596_s27, 4294962304  ;;  %p14_p1 = scmp.ge.s32.totalorder %s5331_s18, 7   ;;  %s8753_s12 = smov %s5266_s13 }
 0x475   : > { %s8754_s13 = smov %s5270_s14  ;;  %s8755_s14 = smov %s5342_s21 }
 0x476   : > { %s8756_s15 = smov %s5331_s18  ;;  %16 = sbr.rel (!%p14_p1) target bundleno = 4 (0x4), region = 69 }
 0x47b   :  { %4601 = vsyncpa [#allocation3], 1 }
 0x47c   :  { %4603 = vsyncpa [#allocation3 + $0x1], 1 }
 0x47d   :  { %4604 = vsyncpa [#allocation4], 1 }
 0x47e   :  { %4606 = vsyncpa [#allocation4 + $0x1], 1 }

</bundles_post_ra>
